<compile_context>
chip_gen: v6e
topology: v6e:2x2x1
jax: 0.10.0
libtpu: 0.0.40
codegen_flags: <defaults>
</compile_context>

<pallas_src>
import functools

import jax
import jax.numpy as jnp
from jax import lax
from jax.experimental import pallas as pl
from jax.experimental.pallas import tpu as pltpu

_VMEM = pl.BlockSpec(memory_space=pltpu.MemorySpace.VMEM)


def _pad8(n):
    return ((n + 7) // 8) * 8


def _round_up(n, m):
    return ((n + m - 1) // m) * m


# --------------------------------------------------------------------------
# Fused Pallas kernel: full forward pass
# --------------------------------------------------------------------------
def _fused_kernel(feats_ref, valid2_ref, wA_ref, wG_ref, wC_ref, bias_ref, o_ref,
                  *, T, B, dC, dM, L, Fin, oBoth, oPost):
    f32, bf16 = jnp.float32, jnp.bfloat16
    Hc = 4 * dC                       # fused hidden lanes [main_fwd | pros_fwd | main_bwd | pros_bwd]
    W1 = Hc                           # lane width of the 128-lane projection slab
    WC = wC_ref.shape[1]              # lane width of the ctx+SLA slab (>= dM+1)
    NP = T * B                        # past rows, time-major (row = t*B + b)
    N = NP + B

    lane = lax.broadcasted_iota(jnp.int32, (1, Hc), 1)
    fwd_lanes = lane < (2 * dC)       # fwd chains occupy lanes [0, 2*dC)

    # ---- slab views (static offsets) -------------------------------------
    w_feat = wA_ref[0:Fin, :]                         # [text|spk|emo|pros] -> projections
    w_both = wA_ref[oBoth:oBoth + Hc, :]              # enc_linear / prosody_enc_linear
    w_post = wA_ref[oPost:oPost + Hc, :]              # gru_linear / prosody_gru_linear
    b_feat = bias_ref[0:1, 0:W1]
    b_both = bias_ref[1:2, 0:W1]
    b_post = bias_ref[2:3, 0:W1]
    b_ctx = bias_ref[3:4, 0:WC]

    # ---- fused feature projections + both encoders (bf16 MXU, f32 acc) ---
    proj = jnp.dot(feats_ref[...].astype(bf16), w_feat,
                   preferred_element_type=f32) + b_feat                  # (N, W1)
    fused = jnp.maximum(
        jnp.dot(proj.astype(bf16), w_both, preferred_element_type=f32) + b_both, 0.0)
    # lanes of `fused`: [enc | prosody_enc | 0 | 0]
    x = fused[0:NP, :]                                                    # GRU layer-0 input
    cur = jnp.where(lane < dC, fused[NP:N, :], 0.0)                       # current-utt enc only

    # ---- validity masks, hoisted out of the recurrence -------------------
    valid = valid2_ref[:, 0:1]                                            # (NP, 1)
    m_all = jnp.where(fwd_lanes, valid, valid2_ref[:, 1:2])               # (NP, Hc)

    # ---- two bidirectional GRU stacks as one fused recurrence ------------
    for l in range(L):
        wih = wG_ref[(2 * l) * Hc:(2 * l + 1) * Hc, :]
        whh = wG_ref[(2 * l + 1) * Hc:(2 * l + 2) * Hc, :]
        bih = bias_ref[4 + 2 * l:5 + 2 * l, 0:3 * Hc]
        bhh = bias_ref[5 + 2 * l:6 + 2 * l, 0:3 * Hc]
        # hoist all input projections out of the time loop
        gates_in = jnp.dot(x.astype(bf16), wih, preferred_element_type=f32) + bih
        h = jnp.zeros((B, Hc), f32)
        outs = []
        for i in range(T):                           # fully unrolled, static indices
            tf, tb = i, T - 1 - i
            xf = gates_in[tf * B:(tf + 1) * B, :]
            xb = gates_in[tb * B:(tb + 1) * B, :]
            m = m_all[i * B:(i + 1) * B, :]
            # TODO(synk): hold whh in MXU weight regs (matmul_push_rhs/acc_lhs/pop).
            gh = jnp.dot(h.astype(bf16), whh, preferred_element_type=f32) + bhh
            gi_r = jnp.where(fwd_lanes, xf[:, 0:Hc], xb[:, 0:Hc])
            gi_z = jnp.where(fwd_lanes, xf[:, Hc:2 * Hc], xb[:, Hc:2 * Hc])
            gi_n = jnp.where(fwd_lanes, xf[:, 2 * Hc:3 * Hc], xb[:, 2 * Hc:3 * Hc])
            r = jax.nn.sigmoid(gi_r + gh[:, 0:Hc])
            z = jax.nn.sigmoid(gi_z + gh[:, Hc:2 * Hc])
            n = jnp.tanh(gi_n + r * gh[:, 2 * Hc:3 * Hc])
            h_new = (1.0 - z) * n + z * h
            out = m * h_new                          # packed-seq: padded outputs are zero
            h = out + (1.0 - m) * h                  # hidden advances only on valid steps
            outs.append(out)
        # fwd halves of step t + bwd halves of step T-1-t  ->  time-t row block
        x = jnp.concatenate(
            [jnp.where(fwd_lanes, outs[t], outs[T - 1 - t]) for t in range(T)], axis=0)

    # ---- fused gru_linear / prosody_gru_linear (+ReLU) + pad-zero mask ---
    post = jnp.maximum(
        jnp.dot(x.astype(bf16), w_post, preferred_element_type=f32) + b_post, 0.0)
    past = post * valid                              # (NP, Hc): [main | pros | 0 | 0]

    # ---- context_linear with folded SLA logit column + per-batch softmax --
    # wC rows [0,dC) and [dC,2dC) both hold [ctx_w | ctx_w@sla_w] so main+pros are
    # summed by the matmul itself; col dM of `full` is the SLA logit.
    ctx_in = jnp.concatenate([cur, past], axis=0)    # (N, Hc)
    full = jnp.dot(ctx_in.astype(bf16), wC_ref[...], preferred_element_type=f32) + b_ctx
    lg = full[:, dM:dM + 1]                          # (N, 1) logits

    blocks = [full[t * B:(t + 1) * B, :] for t in range(T + 1)]
    lgs = [lg[t * B:(t + 1) * B, :] for t in range(T + 1)]
    mx = functools.reduce(jnp.maximum, lgs)          # per-batch max (sublane-wise)
    es = [jnp.exp(l - mx) for l in lgs]
    numer = functools.reduce(lambda a, b: a + b, [e * blk for e, blk in zip(es, blocks)])
    denom = functools.reduce(lambda a, b: a + b, es)
    o_ref[...] = (numer * pl.reciprocal(denom, approx=True)).astype(o_ref.dtype)


# --------------------------------------------------------------------------
# Parameter init (PyTorch-equivalent structure)
# --------------------------------------------------------------------------
def init_params(key, *, d_model, d_cont, num_layers, text_emb_size,
                g_prosody_emb_size, n_speakers, n_emotions):
    it = iter(jax.random.split(key, 256))

    def uni(shape, scale):
        return jax.random.uniform(next(it), shape, jnp.float32, -scale, scale)

    def linear(d_in, d_out):
        s = d_in ** -0.5
        return {"w": uni((d_in, d_out), s), "b": uni((d_out,), s)}

    def gru_dir(d_in, hid):
        s = hid ** -0.5
        # gate order in the 3*hid columns: [r | z | n]
        return {"wih": uni((d_in, 3 * hid), s), "whh": uni((hid, 3 * hid), s),
                "bih": uni((3 * hid,), s), "bhh": uni((3 * hid,), s)}

    def gru_stack(d_in, hid, n_layers):
        layers = []
        for l in range(n_layers):
            din_l = d_in if l == 0 else 2 * hid
            layers.append({"fwd": gru_dir(din_l, hid), "bwd": gru_dir(din_l, hid)})
        return layers

    return {
        "text_emb_linear": linear(text_emb_size, d_cont),
        "prosody_emb_linear": linear(g_prosody_emb_size, d_cont),
        "speaker_linear": linear(d_model, d_cont),
        "emotion_linear": linear(d_model, d_cont),
        "enc_linear": linear(3 * d_cont, d_cont),
        "prosody_enc_linear": linear(3 * d_cont, d_cont),
        "gru": gru_stack(d_cont, d_cont, num_layers),
        "gru_linear": linear(2 * d_cont, d_cont),
        "prosody_gru": gru_stack(d_cont, d_cont, num_layers),
        "prosody_gru_linear": linear(2 * d_cont, d_cont),
        "context_linear": linear(d_cont, d_model),
        "sla": linear(d_model, 1),
        "speaker_embedding": jax.random.normal(next(it), (n_speakers, d_model), jnp.float32),
        "emotion_embedding": jax.random.normal(next(it), (n_emotions, d_model), jnp.float32),
    }


# --------------------------------------------------------------------------
# Wrapper-side weight packing into a few lane-aligned bf16 slabs
# --------------------------------------------------------------------------
def pack_params(p, *, d_model, d_cont, text_emb_size, g_prosody_emb_size):
    dC, dM = d_cont, d_model
    Hc = 4 * dC
    W1 = Hc
    WC = _round_up(dM + 1, 128)
    L = len(p["gru"])
    f32, bf16 = jnp.float32, jnp.bfloat16

    Fin = text_emb_size + dM + dM + g_prosody_emb_size
    oBoth = _pad8(Fin)
    oPost = oBoth + _pad8(Hc)
    rA = oPost + _pad8(Hc)

    # ---- 128-lane projection slab: [w_feat ; w_both ; w_post] -------------
    wA = jnp.zeros((rA, W1), f32)
    off = 0
    for k, (sz, lin) in enumerate([(text_emb_size, p["text_emb_linear"]),
                                   (dM, p["speaker_linear"]),
                                   (dM, p["emotion_linear"]),
                                   (g_prosody_emb_size, p["prosody_emb_linear"])]):
        wA = wA.at[off:off + sz, k * dC:(k + 1) * dC].set(lin["w"])
        off += sz
    # enc_linear input order [text|spk|emo]; prosody_enc_linear input order [pros|spk|emo]
    wA = wA.at[oBoth:oBoth + 3 * dC, 0:dC].set(p["enc_linear"]["w"])
    wA = wA.at[oBoth + dC:oBoth + 3 * dC, dC:2 * dC].set(p["prosody_enc_linear"]["w"][dC:3 * dC])
    wA = wA.at[oBoth + 3 * dC:oBoth + 4 * dC, dC:2 * dC].set(p["prosody_enc_linear"]["w"][0:dC])
    # post linears: GRU output lanes [main_fwd | pros_fwd | main_bwd | pros_bwd]
    wA = wA.at[oPost + 0:oPost + dC, 0:dC].set(p["gru_linear"]["w"][0:dC])
    wA = wA.at[oPost + 2 * dC:oPost + 3 * dC, 0:dC].set(p["gru_linear"]["w"][dC:2 * dC])
    wA = wA.at[oPost + dC:oPost + 2 * dC, dC:2 * dC].set(p["prosody_gru_linear"]["w"][0:dC])
    wA = wA.at[oPost + 3 * dC:oPost + 4 * dC, dC:2 * dC].set(p["prosody_gru_linear"]["w"][dC:2 * dC])

    # ---- bias slab (f32) ---------------------------------------------------
    WB = max(3 * Hc, WC, W1)
    bias = jnp.zeros((4 + 2 * L, WB), f32)
    bias = bias.at[0, 0:dC].set(p["text_emb_linear"]["b"])
    bias = bias.at[0, dC:2 * dC].set(p["speaker_linear"]["b"])
    bias = bias.at[0, 2 * dC:3 * dC].set(p["emotion_linear"]["b"])
    bias = bias.at[0, 3 * dC:4 * dC].set(p["prosody_emb_linear"]["b"])
    bias = bias.at[1, 0:dC].set(p["enc_linear"]["b"])
    bias = bias.at[1, dC:2 * dC].set(p["prosody_enc_linear"]["b"])
    bias = bias.at[2, 0:dC].set(p["gru_linear"]["b"])
    bias = bias.at[2, dC:2 * dC].set(p["prosody_gru_linear"]["b"])

    # ---- ctx + folded-SLA slab --------------------------------------------
    ctx_w = p["context_linear"]["w"]                       # (dC, dM)
    sla_w = p["sla"]["w"].reshape(dM, 1)
    blockC = jnp.concatenate([ctx_w, ctx_w @ sla_w], axis=1)   # (dC, dM+1)
    wC = jnp.zeros((Hc, WC), f32)
    wC = wC.at[0:dC, 0:dM + 1].set(blockC)                 # main-GRU half
    wC = wC.at[dC:2 * dC, 0:dM + 1].set(blockC)            # prosody-GRU half (folded add)
    bias = bias.at[3, 0:dM].set(p["context_linear"]["b"])
    logit_b = jnp.dot(p["context_linear"]["b"], sla_w)[0] + p["sla"]["b"][0]
    bias = bias.at[3, dM].set(logit_b)

    # ---- 384-lane GRU weight slab: per layer [wih ; whh] -------------------
    chain_dirs = [("gru", "fwd"), ("prosody_gru", "fwd"), ("gru", "bwd"), ("prosody_gru", "bwd")]
    wG = jnp.zeros((L * 2 * Hc, 3 * Hc), f32)
    for l in range(L):
        rih, rhh = 2 * l * Hc, (2 * l + 1) * Hc
        for c, (stack, dr) in enumerate(chain_dirs):
            d = p[stack][l][dr]
            for g in range(3):                             # gate order [r, z, n]
                cols = slice(g * Hc + c * dC, g * Hc + (c + 1) * dC)
                wg = d["wih"][:, g * dC:(g + 1) * dC]
                if l == 0:
                    # layer-0 input lanes: [enc (0:dC) | pros_enc (dC:2dC) | 0 | 0]
                    rin = 0 if stack == "gru" else dC
                    wG = wG.at[rih + rin:rih + rin + dC, cols].set(wg)
                else:
                    # layer-l input = previous layer output lanes [mf | pf | mb | pb]
                    r_fwd = 0 if stack == "gru" else dC
                    r_bwd = 2 * dC if stack == "gru" else 3 * dC
                    wG = wG.at[rih + r_fwd:rih + r_fwd + dC, cols].set(wg[0:dC])
                    wG = wG.at[rih + r_bwd:rih + r_bwd + dC, cols].set(wg[dC:2 * dC])
                wG = wG.at[rhh + c * dC:rhh + (c + 1) * dC, cols].set(d["whh"][:, g * dC:(g + 1) * dC])
                bias = bias.at[4 + 2 * l, cols].set(d["bih"][g * dC:(g + 1) * dC])
                bias = bias.at[5 + 2 * l, cols].set(d["bhh"][g * dC:(g + 1) * dC])

    packed = {
        "wA": wA.astype(bf16), "wG": wG.astype(bf16), "wC": wC.astype(bf16),
        "bias": bias,
        "spk_emb": p["speaker_embedding"], "emo_emb": p["emotion_embedding"],
    }
    dims = {"dC": dC, "dM": dM, "L": L, "Fin": Fin, "oBoth": oBoth, "oPost": oPost, "WC": WC}
    return packed, dims


# --------------------------------------------------------------------------
# Forward wrapper: batch padding, embedding gathers, layout glue, one pallas_call
# --------------------------------------------------------------------------
def conversational_prosody_context_encoder(packed, text_emb, speaker, emotion,
                                           history_text_emb, history_speaker,
                                           history_emotion, history_lens,
                                           h_g_prosody_embs, *, dims):
    dC, dM, L = dims["dC"], dims["dM"], dims["L"]
    Fin, oBoth, oPost, WC = dims["Fin"], dims["oBoth"], dims["oPost"], dims["WC"]
    B, H, _ = history_text_emb.shape               # assumes H == max(history_lens)
    Bp = _pad8(B)                                   # pad batch to the 8-sublane boundary

    def padB(x):
        pad = [(0, Bp - B)] + [(0, 0)] * (x.ndim - 1)
        return jnp.pad(x, pad)

    text_emb_p, speaker_p, emotion_p = padB(text_emb), padB(speaker), padB(emotion)
    h_text_p, h_spk_p = padB(history_text_emb), padB(history_speaker)
    h_emo_p, lens_p, h_pros_p = padB(history_emotion), padB(history_lens), padB(h_g_prosody_embs)

    # embedding gathers + feature-group concat (pure JAX glue)
    spk_ids = jnp.concatenate([h_spk_p, speaker_p[:, None]], axis=1)
    emo_ids = jnp.concatenate([h_emo_p, emotion_p[:, None]], axis=1)
    spk_rows = packed["spk_emb"][spk_ids]
    emo_rows = packed["emo_emb"][emo_ids]
    text_all = jnp.concatenate([h_text_p, text_emb_p[:, None, :]], axis=1)
    pros_all = jnp.concatenate(
        [h_pros_p, jnp.zeros((Bp, 1, h_pros_p.shape[-1]), h_pros_p.dtype)], axis=1)
    feats = jnp.concatenate([text_all, spk_rows, emo_rows, pros_all], axis=-1)
    feats = jnp.transpose(feats, (1, 0, 2)).reshape((H + 1) * Bp, Fin).astype(jnp.float32)

    # validity (col 0) and time-reversed validity (col 1), time-major rows
    valid = (jnp.arange(H)[:, None] < lens_p[None, :]).astype(jnp.float32)     # (H, Bp)
    valid2 = jnp.stack([valid, valid[::-1]], axis=-1).reshape(H * Bp, 2)

    kernel = functools.partial(_fused_kernel, T=H, B=Bp, dC=dC, dM=dM, L=L,
                               Fin=Fin, oBoth=oBoth, oPost=oPost)
    args = (feats, valid2, packed["wA"], packed["wG"], packed["wC"], packed["bias"])
    out = pl.pallas_call(
        kernel,
        out_shape=jax.ShapeDtypeStruct((Bp, WC), jnp.float32),
        in_specs=[_VMEM] * len(args),
        out_specs=_VMEM,
    )(*args)
    return out[:B, :dM]


# --------------------------------------------------------------------------
if __name__ == "__main__":
    d_model, d_cont, num_layers = 32, 32, 1
    text_emb_size, g_prosody_emb_size = 48, 16
    n_speakers, n_emotions = 4, 3
    B, H = 2, 8

    key = jax.random.PRNGKey(0)
    kp, *ks = jax.random.split(key, 10)
    params = init_params(kp, d_model=d_model, d_cont=d_cont, num_layers=num_layers,
                         text_emb_size=text_emb_size,
                         g_prosody_emb_size=g_prosody_emb_size,
                         n_speakers=n_speakers, n_emotions=n_emotions)
    packed, dims = pack_params(params, d_model=d_model, d_cont=d_cont,
                               text_emb_size=text_emb_size,
                               g_prosody_emb_size=g_prosody_emb_size)

    text_emb = jax.random.normal(ks[0], (B, text_emb_size), jnp.float32)
    speaker = jax.random.randint(ks[1], (B,), 0, n_speakers, jnp.int32)
    emotion = jax.random.randint(ks[2], (B,), 0, n_emotions, jnp.int32)
    history_text_emb = jax.random.normal(ks[3], (B, H, text_emb_size), jnp.float32)
    history_speaker = jax.random.randint(ks[4], (B, H), 0, n_speakers, jnp.int32)
    history_emotion = jax.random.randint(ks[5], (B, H), 0, n_emotions, jnp.int32)
    history_lens = jnp.array([H, 5], dtype=jnp.int32)    # max(history_lens) == H
    h_g_prosody_embs = jax.random.normal(ks[6], (B, H, g_prosody_emb_size), jnp.float32)

    fwd = jax.jit(functools.partial(conversational_prosody_context_encoder, dims=dims))
    out = fwd(packed, text_emb, speaker, emotion, history_text_emb, history_speaker,
              history_emotion, history_lens, h_g_prosody_embs)
    out = jax.block_until_ready(out)
    assert out.shape == (B, d_model) and out.dtype == jnp.float32
    assert bool(jnp.all(jnp.isfinite(out)))
    print("KERNEL_OK")
</pallas_src>

<mosaic_0001>
module attributes {stable_mosaic.version = 11 : i64} {
  func.func @_fused_kernel(%arg0: memref<72x128xf32, #tpu.memory_space<vmem>>, %arg1: memref<64x2xf32, #tpu.memory_space<vmem>>, %arg2: memref<384x128xbf16, #tpu.memory_space<vmem>>, %arg3: memref<256x384xbf16, #tpu.memory_space<vmem>>, %arg4: memref<128x128xbf16, #tpu.memory_space<vmem>>, %arg5: memref<6x384xf32, #tpu.memory_space<vmem>>, %arg6: memref<8x128xf32, #tpu.memory_space<vmem>>) attributes {dimension_semantics = [], scalar_prefetch = 0 : i64, scratch_operands = 0 : i64, tpu.core_type = #tpu.core_type<tc>} {
    %0 = tpu.iota {dimensions = array<i32: 1>} : vector<1x128xi32>
    %c64_i32 = arith.constant 64 : i32
    %1 = vector.broadcast %c64_i32 : i32 to vector<1x128xi32>
    %2 = arith.cmpi slt, %0, %1 : vector<1x128xi32>
    %c0 = arith.constant 0 : index
    %c0_0 = arith.constant 0 : index
    %3 = vector.load %arg2[%c0, %c0_0] : memref<384x128xbf16, #tpu.memory_space<vmem>>, vector<128x128xbf16>
    %c128 = arith.constant 128 : index
    %c0_1 = arith.constant 0 : index
    %4 = vector.load %arg2[%c128, %c0_1] : memref<384x128xbf16, #tpu.memory_space<vmem>>, vector<128x128xbf16>
    %c256 = arith.constant 256 : index
    %c0_2 = arith.constant 0 : index
    %5 = vector.load %arg2[%c256, %c0_2] : memref<384x128xbf16, #tpu.memory_space<vmem>>, vector<128x128xbf16>
    %c0_3 = arith.constant 0 : index
    %c0_4 = arith.constant 0 : index
    %6 = vector.load %arg5[%c0_3, %c0_4] : memref<6x384xf32, #tpu.memory_space<vmem>>, vector<1x128xf32>
    %c1 = arith.constant 1 : index
    %c0_5 = arith.constant 0 : index
    %7 = vector.load %arg5[%c1, %c0_5] : memref<6x384xf32, #tpu.memory_space<vmem>>, vector<1x128xf32>
    %c2 = arith.constant 2 : index
    %c0_6 = arith.constant 0 : index
    %8 = vector.load %arg5[%c2, %c0_6] : memref<6x384xf32, #tpu.memory_space<vmem>>, vector<1x128xf32>
    %c3 = arith.constant 3 : index
    %c0_7 = arith.constant 0 : index
    %9 = vector.load %arg5[%c3, %c0_7] : memref<6x384xf32, #tpu.memory_space<vmem>>, vector<1x128xf32>
    %c0_8 = arith.constant 0 : index
    %c0_9 = arith.constant 0 : index
    %10 = vector.load %arg0[%c0_8, %c0_9] : memref<72x128xf32, #tpu.memory_space<vmem>>, vector<72x128xf32>
    %11 = arith.truncf %10 : vector<72x128xf32> to vector<72x128xbf16>
    %cst = arith.constant dense<0.000000e+00> : vector<72x128xf32>
    %12 = tpu.matmul %11, %3, %cst {dimension_numbers = #tpu.dot_dimension_numbers<[1], [0], [0], [1], [0, 0, 1, 1], [], []>} : vector<72x128xbf16>, vector<128x128xbf16>, vector<72x128xf32> -> vector<72x128xf32>
    %13 = vector.broadcast %6 : vector<1x128xf32> to vector<72x128xf32>
    %14 = arith.addf %12, %13 : vector<72x128xf32>
    %15 = arith.truncf %14 : vector<72x128xf32> to vector<72x128xbf16>
    %cst_10 = arith.constant dense<0.000000e+00> : vector<72x128xf32>
    %16 = tpu.matmul %15, %4, %cst_10 {dimension_numbers = #tpu.dot_dimension_numbers<[1], [0], [0], [1], [0, 0, 1, 1], [], []>} : vector<72x128xbf16>, vector<128x128xbf16>, vector<72x128xf32> -> vector<72x128xf32>
    %17 = vector.broadcast %7 : vector<1x128xf32> to vector<72x128xf32>
    %18 = arith.addf %16, %17 : vector<72x128xf32>
    %cst_11 = arith.constant 0.000000e+00 : f32
    %19 = vector.broadcast %cst_11 : f32 to vector<72x128xf32>
    %20 = arith.maximumf %18, %19 : vector<72x128xf32>
    %21 = vector.extract_strided_slice %20 {offsets = [0, 0], sizes = [64, 128], strides = [1, 1]} : vector<72x128xf32> to vector<64x128xf32>
    %c32_i32 = arith.constant 32 : i32
    %22 = vector.broadcast %c32_i32 : i32 to vector<1x128xi32>
    %23 = arith.cmpi slt, %0, %22 : vector<1x128xi32>
    %24 = vector.extract_strided_slice %20 {offsets = [64, 0], sizes = [8, 128], strides = [1, 1]} : vector<72x128xf32> to vector<8x128xf32>
    %cst_12 = arith.constant 0.000000e+00 : f32
    %25 = vector.shape_cast %23 : vector<1x128xi1> to vector<1x128xi1>
    %26 = vector.broadcast %25 : vector<1x128xi1> to vector<8x128xi1>
    %27 = vector.broadcast %cst_12 : f32 to vector<8x128xf32>
    %28 = arith.select %26, %24, %27 : vector<8x128xi1>, vector<8x128xf32>
    %c0_13 = arith.constant 0 : index
    %c0_14 = arith.constant 0 : index
    %29 = vector.load %arg1[%c0_13, %c0_14] : memref<64x2xf32, #tpu.memory_space<vmem>>, vector<64x1xf32>
    %c0_15 = arith.constant 0 : index
    %c1_16 = arith.constant 1 : index
    %30 = vector.load %arg1[%c0_15, %c1_16] : memref<64x2xf32, #tpu.memory_space<vmem>>, vector<64x1xf32>
    %31 = vector.shape_cast %2 : vector<1x128xi1> to vector<1x128xi1>
    %32 = vector.broadcast %31 : vector<1x128xi1> to vector<64x128xi1>
    %33 = vector.shape_cast %29 : vector<64x1xf32> to vector<64x1xf32>
    %34 = vector.broadcast %33 : vector<64x1xf32> to vector<64x128xf32>
    %35 = vector.shape_cast %30 : vector<64x1xf32> to vector<64x1xf32>
    %36 = vector.broadcast %35 : vector<64x1xf32> to vector<64x128xf32>
    %37 = arith.select %32, %34, %36 : vector<64x128xi1>, vector<64x128xf32>
    %c0_17 = arith.constant 0 : index
    %c0_18 = arith.constant 0 : index
    %38 = vector.load %arg3[%c0_17, %c0_18] : memref<256x384xbf16, #tpu.memory_space<vmem>>, vector<128x384xbf16>
    %c128_19 = arith.constant 128 : index
    %c0_20 = arith.constant 0 : index
    %39 = vector.load %arg3[%c128_19, %c0_20] : memref<256x384xbf16, #tpu.memory_space<vmem>>, vector<128x384xbf16>
    %c4 = arith.constant 4 : index
    %c0_21 = arith.constant 0 : index
    %40 = vector.load %arg5[%c4, %c0_21] : memref<6x384xf32, #tpu.memory_space<vmem>>, vector<1x384xf32>
    %c5 = arith.constant 5 : index
    %c0_22 = arith.constant 0 : index
    %41 = vector.load %arg5[%c5, %c0_22] : memref<6x384xf32, #tpu.memory_space<vmem>>, vector<1x384xf32>
    %42 = arith.truncf %21 : vector<64x128xf32> to vector<64x128xbf16>
    %cst_23 = arith.constant dense<0.000000e+00> : vector<64x384xf32>
    %43 = tpu.matmul %42, %38, %cst_23 {dimension_numbers = #tpu.dot_dimension_numbers<[1], [0], [0], [1], [0, 0, 1, 1], [], []>} : vector<64x128xbf16>, vector<128x384xbf16>, vector<64x384xf32> -> vector<64x384xf32>
    %44 = vector.broadcast %40 : vector<1x384xf32> to vector<64x384xf32>
    %45 = arith.addf %43, %44 : vector<64x384xf32>
    %cst_24 = arith.constant 0.000000e+00 : f32
    %46 = vector.broadcast %cst_24 : f32 to vector<8x128xf32>
    %47 = vector.extract_strided_slice %45 {offsets = [0, 0], sizes = [8, 384], strides = [1, 1]} : vector<64x384xf32> to vector<8x384xf32>
    %48 = vector.extract_strided_slice %45 {offsets = [56, 0], sizes = [8, 384], strides = [1, 1]} : vector<64x384xf32> to vector<8x384xf32>
    %49 = vector.extract_strided_slice %37 {offsets = [0, 0], sizes = [8, 128], strides = [1, 1]} : vector<64x128xf32> to vector<8x128xf32>
    %50 = arith.truncf %46 : vector<8x128xf32> to vector<8x128xbf16>
    %cst_25 = arith.constant dense<0.000000e+00> : vector<8x384xf32>
    %51 = tpu.matmul %50, %39, %cst_25 {dimension_numbers = #tpu.dot_dimension_numbers<[1], [0], [0], [1], [0, 0, 1, 1], [], []>} : vector<8x128xbf16>, vector<128x384xbf16>, vector<8x384xf32> -> vector<8x384xf32>
    %52 = vector.broadcast %41 : vector<1x384xf32> to vector<8x384xf32>
    %53 = arith.addf %51, %52 : vector<8x384xf32>
    %54 = vector.extract_strided_slice %47 {offsets = [0, 0], sizes = [8, 128], strides = [1, 1]} : vector<8x384xf32> to vector<8x128xf32>
    %55 = vector.extract_strided_slice %48 {offsets = [0, 0], sizes = [8, 128], strides = [1, 1]} : vector<8x384xf32> to vector<8x128xf32>
    %56 = vector.shape_cast %2 : vector<1x128xi1> to vector<1x128xi1>
    %57 = vector.broadcast %56 : vector<1x128xi1> to vector<8x128xi1>
    %58 = arith.select %57, %54, %55 : vector<8x128xi1>, vector<8x128xf32>
    %59 = vector.extract_strided_slice %47 {offsets = [0, 128], sizes = [8, 128], strides = [1, 1]} : vector<8x384xf32> to vector<8x128xf32>
    %60 = vector.extract_strided_slice %48 {offsets = [0, 128], sizes = [8, 128], strides = [1, 1]} : vector<8x384xf32> to vector<8x128xf32>
    %61 = vector.shape_cast %2 : vector<1x128xi1> to vector<1x128xi1>
    %62 = vector.broadcast %61 : vector<1x128xi1> to vector<8x128xi1>
    %63 = arith.select %62, %59, %60 : vector<8x128xi1>, vector<8x128xf32>
    %64 = vector.extract_strided_slice %47 {offsets = [0, 256], sizes = [8, 128], strides = [1, 1]} : vector<8x384xf32> to vector<8x128xf32>
    %65 = vector.extract_strided_slice %48 {offsets = [0, 256], sizes = [8, 128], strides = [1, 1]} : vector<8x384xf32> to vector<8x128xf32>
    %66 = vector.shape_cast %2 : vector<1x128xi1> to vector<1x128xi1>
    %67 = vector.broadcast %66 : vector<1x128xi1> to vector<8x128xi1>
    %68 = arith.select %67, %64, %65 : vector<8x128xi1>, vector<8x128xf32>
    %69 = vector.extract_strided_slice %53 {offsets = [0, 0], sizes = [8, 128], strides = [1, 1]} : vector<8x384xf32> to vector<8x128xf32>
    %70 = arith.addf %58, %69 : vector<8x128xf32>
    %71 = arith.negf %70 : vector<8x128xf32>
    %72 = math.exp %71 : vector<8x128xf32>
    %cst_26 = arith.constant 1.000000e+00 : f32
    %73 = vector.broadcast %cst_26 : f32 to vector<8x128xf32>
    %74 = arith.addf %73, %72 : vector<8x128xf32>
    %75 = arith.divf %73, %74 : vector<8x128xf32>
    %76 = vector.extract_strided_slice %53 {offsets = [0, 128], sizes = [8, 128], strides = [1, 1]} : vector<8x384xf32> to vector<8x128xf32>
    %77 = arith.addf %63, %76 : vector<8x128xf32>
    %78 = arith.negf %77 : vector<8x128xf32>
    %79 = math.exp %78 : vector<8x128xf32>
    %cst_27 = arith.constant 1.000000e+00 : f32
    %80 = vector.broadcast %cst_27 : f32 to vector<8x128xf32>
    %81 = arith.addf %80, %79 : vector<8x128xf32>
    %82 = arith.divf %80, %81 : vector<8x128xf32>
    %83 = vector.extract_strided_slice %53 {offsets = [0, 256], sizes = [8, 128], strides = [1, 1]} : vector<8x384xf32> to vector<8x128xf32>
    %84 = arith.mulf %75, %83 : vector<8x128xf32>
    %85 = arith.addf %68, %84 : vector<8x128xf32>
    %86 = math.tanh %85 : vector<8x128xf32>
    %cst_28 = arith.constant 1.000000e+00 : f32
    %87 = vector.broadcast %cst_28 : f32 to vector<8x128xf32>
    %88 = arith.subf %87, %82 : vector<8x128xf32>
    %89 = arith.mulf %88, %86 : vector<8x128xf32>
    %90 = arith.mulf %82, %46 : vector<8x128xf32>
    %91 = arith.addf %89, %90 : vector<8x128xf32>
    %92 = arith.mulf %49, %91 : vector<8x128xf32>
    %cst_29 = arith.constant 1.000000e+00 : f32
    %93 = vector.broadcast %cst_29 : f32 to vector<8x128xf32>
    %94 = arith.subf %93, %49 : vector<8x128xf32>
    %95 = arith.mulf %94, %46 : vector<8x128xf32>
    %96 = arith.addf %92, %95 : vector<8x128xf32>
    %97 = vector.extract_strided_slice %45 {offsets = [8, 0], sizes = [8, 384], strides = [1, 1]} : vector<64x384xf32> to vector<8x384xf32>
    %98 = vector.extract_strided_slice %45 {offsets = [48, 0], sizes = [8, 384], strides = [1, 1]} : vector<64x384xf32> to vector<8x384xf32>
    %99 = vector.extract_strided_slice %37 {offsets = [8, 0], sizes = [8, 128], strides = [1, 1]} : vector<64x128xf32> to vector<8x128xf32>
    %100 = arith.truncf %96 : vector<8x128xf32> to vector<8x128xbf16>
    %cst_30 = arith.constant dense<0.000000e+00> : vector<8x384xf32>
    %101 = tpu.matmul %100, %39, %cst_30 {dimension_numbers = #tpu.dot_dimension_numbers<[1], [0], [0], [1], [0, 0, 1, 1], [], []>} : vector<8x128xbf16>, vector<128x384xbf16>, vector<8x384xf32> -> vector<8x384xf32>
    %102 = vector.broadcast %41 : vector<1x384xf32> to vector<8x384xf32>
    %103 = arith.addf %101, %102 : vector<8x384xf32>
    %104 = vector.extract_strided_slice %97 {offsets = [0, 0], sizes = [8, 128], strides = [1, 1]} : vector<8x384xf32> to vector<8x128xf32>
    %105 = vector.extract_strided_slice %98 {offsets = [0, 0], sizes = [8, 128], strides = [1, 1]} : vector<8x384xf32> to vector<8x128xf32>
    %106 = vector.shape_cast %2 : vector<1x128xi1> to vector<1x128xi1>
    %107 = vector.broadcast %106 : vector<1x128xi1> to vector<8x128xi1>
    %108 = arith.select %107, %104, %105 : vector<8x128xi1>, vector<8x128xf32>
    %109 = vector.extract_strided_slice %97 {offsets = [0, 128], sizes = [8, 128], strides = [1, 1]} : vector<8x384xf32> to vector<8x128xf32>
    %110 = vector.extract_strided_slice %98 {offsets = [0, 128], sizes = [8, 128], strides = [1, 1]} : vector<8x384xf32> to vector<8x128xf32>
    %111 = vector.shape_cast %2 : vector<1x128xi1> to vector<1x128xi1>
    %112 = vector.broadcast %111 : vector<1x128xi1> to vector<8x128xi1>
    %113 = arith.select %112, %109, %110 : vector<8x128xi1>, vector<8x128xf32>
    %114 = vector.extract_strided_slice %97 {offsets = [0, 256], sizes = [8, 128], strides = [1, 1]} : vector<8x384xf32> to vector<8x128xf32>
    %115 = vector.extract_strided_slice %98 {offsets = [0, 256], sizes = [8, 128], strides = [1, 1]} : vector<8x384xf32> to vector<8x128xf32>
    %116 = vector.shape_cast %2 : vector<1x128xi1> to vector<1x128xi1>
    %117 = vector.broadcast %116 : vector<1x128xi1> to vector<8x128xi1>
    %118 = arith.select %117, %114, %115 : vector<8x128xi1>, vector<8x128xf32>
    %119 = vector.extract_strided_slice %103 {offsets = [0, 0], sizes = [8, 128], strides = [1, 1]} : vector<8x384xf32> to vector<8x128xf32>
    %120 = arith.addf %108, %119 : vector<8x128xf32>
    %121 = arith.negf %120 : vector<8x128xf32>
    %122 = math.exp %121 : vector<8x128xf32>
    %cst_31 = arith.constant 1.000000e+00 : f32
    %123 = vector.broadcast %cst_31 : f32 to vector<8x128xf32>
    %124 = arith.addf %123, %122 : vector<8x128xf32>
    %125 = arith.divf %123, %124 : vector<8x128xf32>
    %126 = vector.extract_strided_slice %103 {offsets = [0, 128], sizes = [8, 128], strides = [1, 1]} : vector<8x384xf32> to vector<8x128xf32>
    %127 = arith.addf %113, %126 : vector<8x128xf32>
    %128 = arith.negf %127 : vector<8x128xf32>
    %129 = math.exp %128 : vector<8x128xf32>
    %cst_32 = arith.constant 1.000000e+00 : f32
    %130 = vector.broadcast %cst_32 : f32 to vector<8x128xf32>
    %131 = arith.addf %130, %129 : vector<8x128xf32>
    %132 = arith.divf %130, %131 : vector<8x128xf32>
    %133 = vector.extract_strided_slice %103 {offsets = [0, 256], sizes = [8, 128], strides = [1, 1]} : vector<8x384xf32> to vector<8x128xf32>
    %134 = arith.mulf %125, %133 : vector<8x128xf32>
    %135 = arith.addf %118, %134 : vector<8x128xf32>
    %136 = math.tanh %135 : vector<8x128xf32>
    %cst_33 = arith.constant 1.000000e+00 : f32
    %137 = vector.broadcast %cst_33 : f32 to vector<8x128xf32>
    %138 = arith.subf %137, %132 : vector<8x128xf32>
    %139 = arith.mulf %138, %136 : vector<8x128xf32>
    %140 = arith.mulf %132, %96 : vector<8x128xf32>
    %141 = arith.addf %139, %140 : vector<8x128xf32>
    %142 = arith.mulf %99, %141 : vector<8x128xf32>
    %cst_34 = arith.constant 1.000000e+00 : f32
    %143 = vector.broadcast %cst_34 : f32 to vector<8x128xf32>
    %144 = arith.subf %143, %99 : vector<8x128xf32>
    %145 = arith.mulf %144, %96 : vector<8x128xf32>
    %146 = arith.addf %142, %145 : vector<8x128xf32>
    %147 = vector.extract_strided_slice %45 {offsets = [16, 0], sizes = [8, 384], strides = [1, 1]} : vector<64x384xf32> to vector<8x384xf32>
    %148 = vector.extract_strided_slice %45 {offsets = [40, 0], sizes = [8, 384], strides = [1, 1]} : vector<64x384xf32> to vector<8x384xf32>
    %149 = vector.extract_strided_slice %37 {offsets = [16, 0], sizes = [8, 128], strides = [1, 1]} : vector<64x128xf32> to vector<8x128xf32>
    %150 = arith.truncf %146 : vector<8x128xf32> to vector<8x128xbf16>
    %cst_35 = arith.constant dense<0.000000e+00> : vector<8x384xf32>
    %151 = tpu.matmul %150, %39, %cst_35 {dimension_numbers = #tpu.dot_dimension_numbers<[1], [0], [0], [1], [0, 0, 1, 1], [], []>} : vector<8x128xbf16>, vector<128x384xbf16>, vector<8x384xf32> -> vector<8x384xf32>
    %152 = vector.broadcast %41 : vector<1x384xf32> to vector<8x384xf32>
    %153 = arith.addf %151, %152 : vector<8x384xf32>
    %154 = vector.extract_strided_slice %147 {offsets = [0, 0], sizes = [8, 128], strides = [1, 1]} : vector<8x384xf32> to vector<8x128xf32>
    %155 = vector.extract_strided_slice %148 {offsets = [0, 0], sizes = [8, 128], strides = [1, 1]} : vector<8x384xf32> to vector<8x128xf32>
    %156 = vector.shape_cast %2 : vector<1x128xi1> to vector<1x128xi1>
    %157 = vector.broadcast %156 : vector<1x128xi1> to vector<8x128xi1>
    %158 = arith.select %157, %154, %155 : vector<8x128xi1>, vector<8x128xf32>
    %159 = vector.extract_strided_slice %147 {offsets = [0, 128], sizes = [8, 128], strides = [1, 1]} : vector<8x384xf32> to vector<8x128xf32>
    %160 = vector.extract_strided_slice %148 {offsets = [0, 128], sizes = [8, 128], strides = [1, 1]} : vector<8x384xf32> to vector<8x128xf32>
    %161 = vector.shape_cast %2 : vector<1x128xi1> to vector<1x128xi1>
    %162 = vector.broadcast %161 : vector<1x128xi1> to vector<8x128xi1>
    %163 = arith.select %162, %159, %160 : vector<8x128xi1>, vector<8x128xf32>
    %164 = vector.extract_strided_slice %147 {offsets = [0, 256], sizes = [8, 128], strides = [1, 1]} : vector<8x384xf32> to vector<8x128xf32>
    %165 = vector.extract_strided_slice %148 {offsets = [0, 256], sizes = [8, 128], strides = [1, 1]} : vector<8x384xf32> to vector<8x128xf32>
    %166 = vector.shape_cast %2 : vector<1x128xi1> to vector<1x128xi1>
    %167 = vector.broadcast %166 : vector<1x128xi1> to vector<8x128xi1>
    %168 = arith.select %167, %164, %165 : vector<8x128xi1>, vector<8x128xf32>
    %169 = vector.extract_strided_slice %153 {offsets = [0, 0], sizes = [8, 128], strides = [1, 1]} : vector<8x384xf32> to vector<8x128xf32>
    %170 = arith.addf %158, %169 : vector<8x128xf32>
    %171 = arith.negf %170 : vector<8x128xf32>
    %172 = math.exp %171 : vector<8x128xf32>
    %cst_36 = arith.constant 1.000000e+00 : f32
    %173 = vector.broadcast %cst_36 : f32 to vector<8x128xf32>
    %174 = arith.addf %173, %172 : vector<8x128xf32>
    %175 = arith.divf %173, %174 : vector<8x128xf32>
    %176 = vector.extract_strided_slice %153 {offsets = [0, 128], sizes = [8, 128], strides = [1, 1]} : vector<8x384xf32> to vector<8x128xf32>
    %177 = arith.addf %163, %176 : vector<8x128xf32>
    %178 = arith.negf %177 : vector<8x128xf32>
    %179 = math.exp %178 : vector<8x128xf32>
    %cst_37 = arith.constant 1.000000e+00 : f32
    %180 = vector.broadcast %cst_37 : f32 to vector<8x128xf32>
    %181 = arith.addf %180, %179 : vector<8x128xf32>
    %182 = arith.divf %180, %181 : vector<8x128xf32>
    %183 = vector.extract_strided_slice %153 {offsets = [0, 256], sizes = [8, 128], strides = [1, 1]} : vector<8x384xf32> to vector<8x128xf32>
    %184 = arith.mulf %175, %183 : vector<8x128xf32>
    %185 = arith.addf %168, %184 : vector<8x128xf32>
    %186 = math.tanh %185 : vector<8x128xf32>
    %cst_38 = arith.constant 1.000000e+00 : f32
    %187 = vector.broadcast %cst_38 : f32 to vector<8x128xf32>
    %188 = arith.subf %187, %182 : vector<8x128xf32>
    %189 = arith.mulf %188, %186 : vector<8x128xf32>
    %190 = arith.mulf %182, %146 : vector<8x128xf32>
    %191 = arith.addf %189, %190 : vector<8x128xf32>
    %192 = arith.mulf %149, %191 : vector<8x128xf32>
    %cst_39 = arith.constant 1.000000e+00 : f32
    %193 = vector.broadcast %cst_39 : f32 to vector<8x128xf32>
    %194 = arith.subf %193, %149 : vector<8x128xf32>
    %195 = arith.mulf %194, %146 : vector<8x128xf32>
    %196 = arith.addf %192, %195 : vector<8x128xf32>
    %197 = vector.extract_strided_slice %45 {offsets = [24, 0], sizes = [8, 384], strides = [1, 1]} : vector<64x384xf32> to vector<8x384xf32>
    %198 = vector.extract_strided_slice %45 {offsets = [32, 0], sizes = [8, 384], strides = [1, 1]} : vector<64x384xf32> to vector<8x384xf32>
    %199 = vector.extract_strided_slice %37 {offsets = [24, 0], sizes = [8, 128], strides = [1, 1]} : vector<64x128xf32> to vector<8x128xf32>
    %200 = arith.truncf %196 : vector<8x128xf32> to vector<8x128xbf16>
    %cst_40 = arith.constant dense<0.000000e+00> : vector<8x384xf32>
    %201 = tpu.matmul %200, %39, %cst_40 {dimension_numbers = #tpu.dot_dimension_numbers<[1], [0], [0], [1], [0, 0, 1, 1], [], []>} : vector<8x128xbf16>, vector<128x384xbf16>, vector<8x384xf32> -> vector<8x384xf32>
    %202 = vector.broadcast %41 : vector<1x384xf32> to vector<8x384xf32>
    %203 = arith.addf %201, %202 : vector<8x384xf32>
    %204 = vector.extract_strided_slice %197 {offsets = [0, 0], sizes = [8, 128], strides = [1, 1]} : vector<8x384xf32> to vector<8x128xf32>
    %205 = vector.extract_strided_slice %198 {offsets = [0, 0], sizes = [8, 128], strides = [1, 1]} : vector<8x384xf32> to vector<8x128xf32>
    %206 = vector.shape_cast %2 : vector<1x128xi1> to vector<1x128xi1>
    %207 = vector.broadcast %206 : vector<1x128xi1> to vector<8x128xi1>
    %208 = arith.select %207, %204, %205 : vector<8x128xi1>, vector<8x128xf32>
    %209 = vector.extract_strided_slice %197 {offsets = [0, 128], sizes = [8, 128], strides = [1, 1]} : vector<8x384xf32> to vector<8x128xf32>
    %210 = vector.extract_strided_slice %198 {offsets = [0, 128], sizes = [8, 128], strides = [1, 1]} : vector<8x384xf32> to vector<8x128xf32>
    %211 = vector.shape_cast %2 : vector<1x128xi1> to vector<1x128xi1>
    %212 = vector.broadcast %211 : vector<1x128xi1> to vector<8x128xi1>
    %213 = arith.select %212, %209, %210 : vector<8x128xi1>, vector<8x128xf32>
    %214 = vector.extract_strided_slice %197 {offsets = [0, 256], sizes = [8, 128], strides = [1, 1]} : vector<8x384xf32> to vector<8x128xf32>
    %215 = vector.extract_strided_slice %198 {offsets = [0, 256], sizes = [8, 128], strides = [1, 1]} : vector<8x384xf32> to vector<8x128xf32>
    %216 = vector.shape_cast %2 : vector<1x128xi1> to vector<1x128xi1>
    %217 = vector.broadcast %216 : vector<1x128xi1> to vector<8x128xi1>
    %218 = arith.select %217, %214, %215 : vector<8x128xi1>, vector<8x128xf32>
    %219 = vector.extract_strided_slice %203 {offsets = [0, 0], sizes = [8, 128], strides = [1, 1]} : vector<8x384xf32> to vector<8x128xf32>
    %220 = arith.addf %208, %219 : vector<8x128xf32>
    %221 = arith.negf %220 : vector<8x128xf32>
    %222 = math.exp %221 : vector<8x128xf32>
    %cst_41 = arith.constant 1.000000e+00 : f32
    %223 = vector.broadcast %cst_41 : f32 to vector<8x128xf32>
    %224 = arith.addf %223, %222 : vector<8x128xf32>
    %225 = arith.divf %223, %224 : vector<8x128xf32>
    %226 = vector.extract_strided_slice %203 {offsets = [0, 128], sizes = [8, 128], strides = [1, 1]} : vector<8x384xf32> to vector<8x128xf32>
    %227 = arith.addf %213, %226 : vector<8x128xf32>
    %228 = arith.negf %227 : vector<8x128xf32>
    %229 = math.exp %228 : vector<8x128xf32>
    %cst_42 = arith.constant 1.000000e+00 : f32
    %230 = vector.broadcast %cst_42 : f32 to vector<8x128xf32>
    %231 = arith.addf %230, %229 : vector<8x128xf32>
    %232 = arith.divf %230, %231 : vector<8x128xf32>
    %233 = vector.extract_strided_slice %203 {offsets = [0, 256], sizes = [8, 128], strides = [1, 1]} : vector<8x384xf32> to vector<8x128xf32>
    %234 = arith.mulf %225, %233 : vector<8x128xf32>
    %235 = arith.addf %218, %234 : vector<8x128xf32>
    %236 = math.tanh %235 : vector<8x128xf32>
    %cst_43 = arith.constant 1.000000e+00 : f32
    %237 = vector.broadcast %cst_43 : f32 to vector<8x128xf32>
    %238 = arith.subf %237, %232 : vector<8x128xf32>
    %239 = arith.mulf %238, %236 : vector<8x128xf32>
    %240 = arith.mulf %232, %196 : vector<8x128xf32>
    %241 = arith.addf %239, %240 : vector<8x128xf32>
    %242 = arith.mulf %199, %241 : vector<8x128xf32>
    %cst_44 = arith.constant 1.000000e+00 : f32
    %243 = vector.broadcast %cst_44 : f32 to vector<8x128xf32>
    %244 = arith.subf %243, %199 : vector<8x128xf32>
    %245 = arith.mulf %244, %196 : vector<8x128xf32>
    %246 = arith.addf %242, %245 : vector<8x128xf32>
    %247 = vector.extract_strided_slice %45 {offsets = [32, 0], sizes = [8, 384], strides = [1, 1]} : vector<64x384xf32> to vector<8x384xf32>
    %248 = vector.extract_strided_slice %45 {offsets = [24, 0], sizes = [8, 384], strides = [1, 1]} : vector<64x384xf32> to vector<8x384xf32>
    %249 = vector.extract_strided_slice %37 {offsets = [32, 0], sizes = [8, 128], strides = [1, 1]} : vector<64x128xf32> to vector<8x128xf32>
    %250 = arith.truncf %246 : vector<8x128xf32> to vector<8x128xbf16>
    %cst_45 = arith.constant dense<0.000000e+00> : vector<8x384xf32>
    %251 = tpu.matmul %250, %39, %cst_45 {dimension_numbers = #tpu.dot_dimension_numbers<[1], [0], [0], [1], [0, 0, 1, 1], [], []>} : vector<8x128xbf16>, vector<128x384xbf16>, vector<8x384xf32> -> vector<8x384xf32>
    %252 = vector.broadcast %41 : vector<1x384xf32> to vector<8x384xf32>
    %253 = arith.addf %251, %252 : vector<8x384xf32>
    %254 = vector.extract_strided_slice %247 {offsets = [0, 0], sizes = [8, 128], strides = [1, 1]} : vector<8x384xf32> to vector<8x128xf32>
    %255 = vector.extract_strided_slice %248 {offsets = [0, 0], sizes = [8, 128], strides = [1, 1]} : vector<8x384xf32> to vector<8x128xf32>
    %256 = vector.shape_cast %2 : vector<1x128xi1> to vector<1x128xi1>
    %257 = vector.broadcast %256 : vector<1x128xi1> to vector<8x128xi1>
    %258 = arith.select %257, %254, %255 : vector<8x128xi1>, vector<8x128xf32>
    %259 = vector.extract_strided_slice %247 {offsets = [0, 128], sizes = [8, 128], strides = [1, 1]} : vector<8x384xf32> to vector<8x128xf32>
    %260 = vector.extract_strided_slice %248 {offsets = [0, 128], sizes = [8, 128], strides = [1, 1]} : vector<8x384xf32> to vector<8x128xf32>
    %261 = vector.shape_cast %2 : vector<1x128xi1> to vector<1x128xi1>
    %262 = vector.broadcast %261 : vector<1x128xi1> to vector<8x128xi1>
    %263 = arith.select %262, %259, %260 : vector<8x128xi1>, vector<8x128xf32>
    %264 = vector.extract_strided_slice %247 {offsets = [0, 256], sizes = [8, 128], strides = [1, 1]} : vector<8x384xf32> to vector<8x128xf32>
    %265 = vector.extract_strided_slice %248 {offsets = [0, 256], sizes = [8, 128], strides = [1, 1]} : vector<8x384xf32> to vector<8x128xf32>
    %266 = vector.shape_cast %2 : vector<1x128xi1> to vector<1x128xi1>
    %267 = vector.broadcast %266 : vector<1x128xi1> to vector<8x128xi1>
    %268 = arith.select %267, %264, %265 : vector<8x128xi1>, vector<8x128xf32>
    %269 = vector.extract_strided_slice %253 {offsets = [0, 0], sizes = [8, 128], strides = [1, 1]} : vector<8x384xf32> to vector<8x128xf32>
    %270 = arith.addf %258, %269 : vector<8x128xf32>
    %271 = arith.negf %270 : vector<8x128xf32>
    %272 = math.exp %271 : vector<8x128xf32>
    %cst_46 = arith.constant 1.000000e+00 : f32
    %273 = vector.broadcast %cst_46 : f32 to vector<8x128xf32>
    %274 = arith.addf %273, %272 : vector<8x128xf32>
    %275 = arith.divf %273, %274 : vector<8x128xf32>
    %276 = vector.extract_strided_slice %253 {offsets = [0, 128], sizes = [8, 128], strides = [1, 1]} : vector<8x384xf32> to vector<8x128xf32>
    %277 = arith.addf %263, %276 : vector<8x128xf32>
    %278 = arith.negf %277 : vector<8x128xf32>
    %279 = math.exp %278 : vector<8x128xf32>
    %cst_47 = arith.constant 1.000000e+00 : f32
    %280 = vector.broadcast %cst_47 : f32 to vector<8x128xf32>
    %281 = arith.addf %280, %279 : vector<8x128xf32>
    %282 = arith.divf %280, %281 : vector<8x128xf32>
    %283 = vector.extract_strided_slice %253 {offsets = [0, 256], sizes = [8, 128], strides = [1, 1]} : vector<8x384xf32> to vector<8x128xf32>
    %284 = arith.mulf %275, %283 : vector<8x128xf32>
    %285 = arith.addf %268, %284 : vector<8x128xf32>
    %286 = math.tanh %285 : vector<8x128xf32>
    %cst_48 = arith.constant 1.000000e+00 : f32
    %287 = vector.broadcast %cst_48 : f32 to vector<8x128xf32>
    %288 = arith.subf %287, %282 : vector<8x128xf32>
    %289 = arith.mulf %288, %286 : vector<8x128xf32>
    %290 = arith.mulf %282, %246 : vector<8x128xf32>
    %291 = arith.addf %289, %290 : vector<8x128xf32>
    %292 = arith.mulf %249, %291 : vector<8x128xf32>
    %cst_49 = arith.constant 1.000000e+00 : f32
    %293 = vector.broadcast %cst_49 : f32 to vector<8x128xf32>
    %294 = arith.subf %293, %249 : vector<8x128xf32>
    %295 = arith.mulf %294, %246 : vector<8x128xf32>
    %296 = arith.addf %292, %295 : vector<8x128xf32>
    %297 = vector.extract_strided_slice %45 {offsets = [40, 0], sizes = [8, 384], strides = [1, 1]} : vector<64x384xf32> to vector<8x384xf32>
    %298 = vector.extract_strided_slice %45 {offsets = [16, 0], sizes = [8, 384], strides = [1, 1]} : vector<64x384xf32> to vector<8x384xf32>
    %299 = vector.extract_strided_slice %37 {offsets = [40, 0], sizes = [8, 128], strides = [1, 1]} : vector<64x128xf32> to vector<8x128xf32>
    %300 = arith.truncf %296 : vector<8x128xf32> to vector<8x128xbf16>
    %cst_50 = arith.constant dense<0.000000e+00> : vector<8x384xf32>
    %301 = tpu.matmul %300, %39, %cst_50 {dimension_numbers = #tpu.dot_dimension_numbers<[1], [0], [0], [1], [0, 0, 1, 1], [], []>} : vector<8x128xbf16>, vector<128x384xbf16>, vector<8x384xf32> -> vector<8x384xf32>
    %302 = vector.broadcast %41 : vector<1x384xf32> to vector<8x384xf32>
    %303 = arith.addf %301, %302 : vector<8x384xf32>
    %304 = vector.extract_strided_slice %297 {offsets = [0, 0], sizes = [8, 128], strides = [1, 1]} : vector<8x384xf32> to vector<8x128xf32>
    %305 = vector.extract_strided_slice %298 {offsets = [0, 0], sizes = [8, 128], strides = [1, 1]} : vector<8x384xf32> to vector<8x128xf32>
    %306 = vector.shape_cast %2 : vector<1x128xi1> to vector<1x128xi1>
    %307 = vector.broadcast %306 : vector<1x128xi1> to vector<8x128xi1>
    %308 = arith.select %307, %304, %305 : vector<8x128xi1>, vector<8x128xf32>
    %309 = vector.extract_strided_slice %297 {offsets = [0, 128], sizes = [8, 128], strides = [1, 1]} : vector<8x384xf32> to vector<8x128xf32>
    %310 = vector.extract_strided_slice %298 {offsets = [0, 128], sizes = [8, 128], strides = [1, 1]} : vector<8x384xf32> to vector<8x128xf32>
    %311 = vector.shape_cast %2 : vector<1x128xi1> to vector<1x128xi1>
    %312 = vector.broadcast %311 : vector<1x128xi1> to vector<8x128xi1>
    %313 = arith.select %312, %309, %310 : vector<8x128xi1>, vector<8x128xf32>
    %314 = vector.extract_strided_slice %297 {offsets = [0, 256], sizes = [8, 128], strides = [1, 1]} : vector<8x384xf32> to vector<8x128xf32>
    %315 = vector.extract_strided_slice %298 {offsets = [0, 256], sizes = [8, 128], strides = [1, 1]} : vector<8x384xf32> to vector<8x128xf32>
    %316 = vector.shape_cast %2 : vector<1x128xi1> to vector<1x128xi1>
    %317 = vector.broadcast %316 : vector<1x128xi1> to vector<8x128xi1>
    %318 = arith.select %317, %314, %315 : vector<8x128xi1>, vector<8x128xf32>
    %319 = vector.extract_strided_slice %303 {offsets = [0, 0], sizes = [8, 128], strides = [1, 1]} : vector<8x384xf32> to vector<8x128xf32>
    %320 = arith.addf %308, %319 : vector<8x128xf32>
    %321 = arith.negf %320 : vector<8x128xf32>
    %322 = math.exp %321 : vector<8x128xf32>
    %cst_51 = arith.constant 1.000000e+00 : f32
    %323 = vector.broadcast %cst_51 : f32 to vector<8x128xf32>
    %324 = arith.addf %323, %322 : vector<8x128xf32>
    %325 = arith.divf %323, %324 : vector<8x128xf32>
    %326 = vector.extract_strided_slice %303 {offsets = [0, 128], sizes = [8, 128], strides = [1, 1]} : vector<8x384xf32> to vector<8x128xf32>
    %327 = arith.addf %313, %326 : vector<8x128xf32>
    %328 = arith.negf %327 : vector<8x128xf32>
    %329 = math.exp %328 : vector<8x128xf32>
    %cst_52 = arith.constant 1.000000e+00 : f32
    %330 = vector.broadcast %cst_52 : f32 to vector<8x128xf32>
    %331 = arith.addf %330, %329 : vector<8x128xf32>
    %332 = arith.divf %330, %331 : vector<8x128xf32>
    %333 = vector.extract_strided_slice %303 {offsets = [0, 256], sizes = [8, 128], strides = [1, 1]} : vector<8x384xf32> to vector<8x128xf32>
    %334 = arith.mulf %325, %333 : vector<8x128xf32>
    %335 = arith.addf %318, %334 : vector<8x128xf32>
    %336 = math.tanh %335 : vector<8x128xf32>
    %cst_53 = arith.constant 1.000000e+00 : f32
    %337 = vector.broadcast %cst_53 : f32 to vector<8x128xf32>
    %338 = arith.subf %337, %332 : vector<8x128xf32>
    %339 = arith.mulf %338, %336 : vector<8x128xf32>
    %340 = arith.mulf %332, %296 : vector<8x128xf32>
    %341 = arith.addf %339, %340 : vector<8x128xf32>
    %342 = arith.mulf %299, %341 : vector<8x128xf32>
    %cst_54 = arith.constant 1.000000e+00 : f32
    %343 = vector.broadcast %cst_54 : f32 to vector<8x128xf32>
    %344 = arith.subf %343, %299 : vector<8x128xf32>
    %345 = arith.mulf %344, %296 : vector<8x128xf32>
    %346 = arith.addf %342, %345 : vector<8x128xf32>
    %347 = vector.extract_strided_slice %45 {offsets = [48, 0], sizes = [8, 384], strides = [1, 1]} : vector<64x384xf32> to vector<8x384xf32>
    %348 = vector.extract_strided_slice %45 {offsets = [8, 0], sizes = [8, 384], strides = [1, 1]} : vector<64x384xf32> to vector<8x384xf32>
    %349 = vector.extract_strided_slice %37 {offsets = [48, 0], sizes = [8, 128], strides = [1, 1]} : vector<64x128xf32> to vector<8x128xf32>
    %350 = arith.truncf %346 : vector<8x128xf32> to vector<8x128xbf16>
    %cst_55 = arith.constant dense<0.000000e+00> : vector<8x384xf32>
    %351 = tpu.matmul %350, %39, %cst_55 {dimension_numbers = #tpu.dot_dimension_numbers<[1], [0], [0], [1], [0, 0, 1, 1], [], []>} : vector<8x128xbf16>, vector<128x384xbf16>, vector<8x384xf32> -> vector<8x384xf32>
    %352 = vector.broadcast %41 : vector<1x384xf32> to vector<8x384xf32>
    %353 = arith.addf %351, %352 : vector<8x384xf32>
    %354 = vector.extract_strided_slice %347 {offsets = [0, 0], sizes = [8, 128], strides = [1, 1]} : vector<8x384xf32> to vector<8x128xf32>
    %355 = vector.extract_strided_slice %348 {offsets = [0, 0], sizes = [8, 128], strides = [1, 1]} : vector<8x384xf32> to vector<8x128xf32>
    %356 = vector.shape_cast %2 : vector<1x128xi1> to vector<1x128xi1>
    %357 = vector.broadcast %356 : vector<1x128xi1> to vector<8x128xi1>
    %358 = arith.select %357, %354, %355 : vector<8x128xi1>, vector<8x128xf32>
    %359 = vector.extract_strided_slice %347 {offsets = [0, 128], sizes = [8, 128], strides = [1, 1]} : vector<8x384xf32> to vector<8x128xf32>
    %360 = vector.extract_strided_slice %348 {offsets = [0, 128], sizes = [8, 128], strides = [1, 1]} : vector<8x384xf32> to vector<8x128xf32>
    %361 = vector.shape_cast %2 : vector<1x128xi1> to vector<1x128xi1>
    %362 = vector.broadcast %361 : vector<1x128xi1> to vector<8x128xi1>
    %363 = arith.select %362, %359, %360 : vector<8x128xi1>, vector<8x128xf32>
    %364 = vector.extract_strided_slice %347 {offsets = [0, 256], sizes = [8, 128], strides = [1, 1]} : vector<8x384xf32> to vector<8x128xf32>
    %365 = vector.extract_strided_slice %348 {offsets = [0, 256], sizes = [8, 128], strides = [1, 1]} : vector<8x384xf32> to vector<8x128xf32>
    %366 = vector.shape_cast %2 : vector<1x128xi1> to vector<1x128xi1>
    %367 = vector.broadcast %366 : vector<1x128xi1> to vector<8x128xi1>
    %368 = arith.select %367, %364, %365 : vector<8x128xi1>, vector<8x128xf32>
    %369 = vector.extract_strided_slice %353 {offsets = [0, 0], sizes = [8, 128], strides = [1, 1]} : vector<8x384xf32> to vector<8x128xf32>
    %370 = arith.addf %358, %369 : vector<8x128xf32>
    %371 = arith.negf %370 : vector<8x128xf32>
    %372 = math.exp %371 : vector<8x128xf32>
    %cst_56 = arith.constant 1.000000e+00 : f32
    %373 = vector.broadcast %cst_56 : f32 to vector<8x128xf32>
    %374 = arith.addf %373, %372 : vector<8x128xf32>
    %375 = arith.divf %373, %374 : vector<8x128xf32>
    %376 = vector.extract_strided_slice %353 {offsets = [0, 128], sizes = [8, 128], strides = [1, 1]} : vector<8x384xf32> to vector<8x128xf32>
    %377 = arith.addf %363, %376 : vector<8x128xf32>
    %378 = arith.negf %377 : vector<8x128xf32>
    %379 = math.exp %378 : vector<8x128xf32>
    %cst_57 = arith.constant 1.000000e+00 : f32
    %380 = vector.broadcast %cst_57 : f32 to vector<8x128xf32>
    %381 = arith.addf %380, %379 : vector<8x128xf32>
    %382 = arith.divf %380, %381 : vector<8x128xf32>
    %383 = vector.extract_strided_slice %353 {offsets = [0, 256], sizes = [8, 128], strides = [1, 1]} : vector<8x384xf32> to vector<8x128xf32>
    %384 = arith.mulf %375, %383 : vector<8x128xf32>
    %385 = arith.addf %368, %384 : vector<8x128xf32>
    %386 = math.tanh %385 : vector<8x128xf32>
    %cst_58 = arith.constant 1.000000e+00 : f32
    %387 = vector.broadcast %cst_58 : f32 to vector<8x128xf32>
    %388 = arith.subf %387, %382 : vector<8x128xf32>
    %389 = arith.mulf %388, %386 : vector<8x128xf32>
    %390 = arith.mulf %382, %346 : vector<8x128xf32>
    %391 = arith.addf %389, %390 : vector<8x128xf32>
    %392 = arith.mulf %349, %391 : vector<8x128xf32>
    %cst_59 = arith.constant 1.000000e+00 : f32
    %393 = vector.broadcast %cst_59 : f32 to vector<8x128xf32>
    %394 = arith.subf %393, %349 : vector<8x128xf32>
    %395 = arith.mulf %394, %346 : vector<8x128xf32>
    %396 = arith.addf %392, %395 : vector<8x128xf32>
    %397 = vector.extract_strided_slice %45 {offsets = [56, 0], sizes = [8, 384], strides = [1, 1]} : vector<64x384xf32> to vector<8x384xf32>
    %398 = vector.extract_strided_slice %45 {offsets = [0, 0], sizes = [8, 384], strides = [1, 1]} : vector<64x384xf32> to vector<8x384xf32>
    %399 = vector.extract_strided_slice %37 {offsets = [56, 0], sizes = [8, 128], strides = [1, 1]} : vector<64x128xf32> to vector<8x128xf32>
    %400 = arith.truncf %396 : vector<8x128xf32> to vector<8x128xbf16>
    %cst_60 = arith.constant dense<0.000000e+00> : vector<8x384xf32>
    %401 = tpu.matmul %400, %39, %cst_60 {dimension_numbers = #tpu.dot_dimension_numbers<[1], [0], [0], [1], [0, 0, 1, 1], [], []>} : vector<8x128xbf16>, vector<128x384xbf16>, vector<8x384xf32> -> vector<8x384xf32>
    %402 = vector.broadcast %41 : vector<1x384xf32> to vector<8x384xf32>
    %403 = arith.addf %401, %402 : vector<8x384xf32>
    %404 = vector.extract_strided_slice %397 {offsets = [0, 0], sizes = [8, 128], strides = [1, 1]} : vector<8x384xf32> to vector<8x128xf32>
    %405 = vector.extract_strided_slice %398 {offsets = [0, 0], sizes = [8, 128], strides = [1, 1]} : vector<8x384xf32> to vector<8x128xf32>
    %406 = vector.shape_cast %2 : vector<1x128xi1> to vector<1x128xi1>
    %407 = vector.broadcast %406 : vector<1x128xi1> to vector<8x128xi1>
    %408 = arith.select %407, %404, %405 : vector<8x128xi1>, vector<8x128xf32>
    %409 = vector.extract_strided_slice %397 {offsets = [0, 128], sizes = [8, 128], strides = [1, 1]} : vector<8x384xf32> to vector<8x128xf32>
    %410 = vector.extract_strided_slice %398 {offsets = [0, 128], sizes = [8, 128], strides = [1, 1]} : vector<8x384xf32> to vector<8x128xf32>
    %411 = vector.shape_cast %2 : vector<1x128xi1> to vector<1x128xi1>
    %412 = vector.broadcast %411 : vector<1x128xi1> to vector<8x128xi1>
    %413 = arith.select %412, %409, %410 : vector<8x128xi1>, vector<8x128xf32>
    %414 = vector.extract_strided_slice %397 {offsets = [0, 256], sizes = [8, 128], strides = [1, 1]} : vector<8x384xf32> to vector<8x128xf32>
    %415 = vector.extract_strided_slice %398 {offsets = [0, 256], sizes = [8, 128], strides = [1, 1]} : vector<8x384xf32> to vector<8x128xf32>
    %416 = vector.shape_cast %2 : vector<1x128xi1> to vector<1x128xi1>
    %417 = vector.broadcast %416 : vector<1x128xi1> to vector<8x128xi1>
    %418 = arith.select %417, %414, %415 : vector<8x128xi1>, vector<8x128xf32>
    %419 = vector.extract_strided_slice %403 {offsets = [0, 0], sizes = [8, 128], strides = [1, 1]} : vector<8x384xf32> to vector<8x128xf32>
    %420 = arith.addf %408, %419 : vector<8x128xf32>
    %421 = arith.negf %420 : vector<8x128xf32>
    %422 = math.exp %421 : vector<8x128xf32>
    %cst_61 = arith.constant 1.000000e+00 : f32
    %423 = vector.broadcast %cst_61 : f32 to vector<8x128xf32>
    %424 = arith.addf %423, %422 : vector<8x128xf32>
    %425 = arith.divf %423, %424 : vector<8x128xf32>
    %426 = vector.extract_strided_slice %403 {offsets = [0, 128], sizes = [8, 128], strides = [1, 1]} : vector<8x384xf32> to vector<8x128xf32>
    %427 = arith.addf %413, %426 : vector<8x128xf32>
    %428 = arith.negf %427 : vector<8x128xf32>
    %429 = math.exp %428 : vector<8x128xf32>
    %cst_62 = arith.constant 1.000000e+00 : f32
    %430 = vector.broadcast %cst_62 : f32 to vector<8x128xf32>
    %431 = arith.addf %430, %429 : vector<8x128xf32>
    %432 = arith.divf %430, %431 : vector<8x128xf32>
    %433 = vector.extract_strided_slice %403 {offsets = [0, 256], sizes = [8, 128], strides = [1, 1]} : vector<8x384xf32> to vector<8x128xf32>
    %434 = arith.mulf %425, %433 : vector<8x128xf32>
    %435 = arith.addf %418, %434 : vector<8x128xf32>
    %436 = math.tanh %435 : vector<8x128xf32>
    %cst_63 = arith.constant 1.000000e+00 : f32
    %437 = vector.broadcast %cst_63 : f32 to vector<8x128xf32>
    %438 = arith.subf %437, %432 : vector<8x128xf32>
    %439 = arith.mulf %438, %436 : vector<8x128xf32>
    %440 = arith.mulf %432, %396 : vector<8x128xf32>
    %441 = arith.addf %439, %440 : vector<8x128xf32>
    %442 = arith.mulf %399, %441 : vector<8x128xf32>
    %443 = vector.shape_cast %2 : vector<1x128xi1> to vector<1x128xi1>
    %444 = vector.broadcast %443 : vector<1x128xi1> to vector<8x128xi1>
    %445 = arith.select %444, %92, %442 : vector<8x128xi1>, vector<8x128xf32>
    %446 = vector.shape_cast %2 : vector<1x128xi1> to vector<1x128xi1>
    %447 = vector.broadcast %446 : vector<1x128xi1> to vector<8x128xi1>
    %448 = arith.select %447, %142, %392 : vector<8x128xi1>, vector<8x128xf32>
    %449 = vector.shape_cast %2 : vector<1x128xi1> to vector<1x128xi1>
    %450 = vector.broadcast %449 : vector<1x128xi1> to vector<8x128xi1>
    %451 = arith.select %450, %192, %342 : vector<8x128xi1>, vector<8x128xf32>
    %452 = vector.shape_cast %2 : vector<1x128xi1> to vector<1x128xi1>
    %453 = vector.broadcast %452 : vector<1x128xi1> to vector<8x128xi1>
    %454 = arith.select %453, %242, %292 : vector<8x128xi1>, vector<8x128xf32>
    %455 = vector.shape_cast %2 : vector<1x128xi1> to vector<1x128xi1>
    %456 = vector.broadcast %455 : vector<1x128xi1> to vector<8x128xi1>
    %457 = arith.select %456, %292, %242 : vector<8x128xi1>, vector<8x128xf32>
    %458 = vector.shape_cast %2 : vector<1x128xi1> to vector<1x128xi1>
    %459 = vector.broadcast %458 : vector<1x128xi1> to vector<8x128xi1>
    %460 = arith.select %459, %342, %192 : vector<8x128xi1>, vector<8x128xf32>
    %461 = vector.shape_cast %2 : vector<1x128xi1> to vector<1x128xi1>
    %462 = vector.broadcast %461 : vector<1x128xi1> to vector<8x128xi1>
    %463 = arith.select %462, %392, %142 : vector<8x128xi1>, vector<8x128xf32>
    %464 = vector.shape_cast %2 : vector<1x128xi1> to vector<1x128xi1>
    %465 = vector.broadcast %464 : vector<1x128xi1> to vector<8x128xi1>
    %466 = arith.select %465, %442, %92 : vector<8x128xi1>, vector<8x128xf32>
    %467 = tpu.concatenate %445, %448, %451, %454, %457, %460, %463, %466 in 0 : vector<8x128xf32>, vector<8x128xf32>, vector<8x128xf32>, vector<8x128xf32>, vector<8x128xf32>, vector<8x128xf32>, vector<8x128xf32>, vector<8x128xf32> -> vector<64x128xf32>
    %468 = arith.truncf %467 : vector<64x128xf32> to vector<64x128xbf16>
    %cst_64 = arith.constant dense<0.000000e+00> : vector<64x128xf32>
    %469 = tpu.matmul %468, %5, %cst_64 {dimension_numbers = #tpu.dot_dimension_numbers<[1], [0], [0], [1], [0, 0, 1, 1], [], []>} : vector<64x128xbf16>, vector<128x128xbf16>, vector<64x128xf32> -> vector<64x128xf32>
    %470 = vector.broadcast %8 : vector<1x128xf32> to vector<64x128xf32>
    %471 = arith.addf %469, %470 : vector<64x128xf32>
    %cst_65 = arith.constant 0.000000e+00 : f32
    %472 = vector.broadcast %cst_65 : f32 to vector<64x128xf32>
    %473 = arith.maximumf %471, %472 : vector<64x128xf32>
    %474 = vector.broadcast %29 : vector<64x1xf32> to vector<64x128xf32>
    %475 = arith.mulf %473, %474 : vector<64x128xf32>
    %476 = tpu.concatenate %28, %475 in 0 : vector<8x128xf32>, vector<64x128xf32> -> vector<72x128xf32>
    %477 = arith.truncf %476 : vector<72x128xf32> to vector<72x128xbf16>
    %c0_66 = arith.constant 0 : index
    %c0_67 = arith.constant 0 : index
    %478 = vector.load %arg4[%c0_66, %c0_67] : memref<128x128xbf16, #tpu.memory_space<vmem>>, vector<128x128xbf16>
    %cst_68 = arith.constant dense<0.000000e+00> : vector<72x128xf32>
    %479 = tpu.matmul %477, %478, %cst_68 {dimension_numbers = #tpu.dot_dimension_numbers<[1], [0], [0], [1], [0, 0, 1, 1], [], []>} : vector<72x128xbf16>, vector<128x128xbf16>, vector<72x128xf32> -> vector<72x128xf32>
    %480 = vector.broadcast %9 : vector<1x128xf32> to vector<72x128xf32>
    %481 = arith.addf %479, %480 : vector<72x128xf32>
    %482 = vector.extract_strided_slice %481 {offsets = [0, 32], sizes = [72, 1], strides = [1, 1]} : vector<72x128xf32> to vector<72x1xf32>
    %483 = vector.extract_strided_slice %481 {offsets = [0, 0], sizes = [8, 128], strides = [1, 1]} : vector<72x128xf32> to vector<8x128xf32>
    %484 = vector.extract_strided_slice %481 {offsets = [8, 0], sizes = [8, 128], strides = [1, 1]} : vector<72x128xf32> to vector<8x128xf32>
    %485 = vector.extract_strided_slice %481 {offsets = [16, 0], sizes = [8, 128], strides = [1, 1]} : vector<72x128xf32> to vector<8x128xf32>
    %486 = vector.extract_strided_slice %481 {offsets = [24, 0], sizes = [8, 128], strides = [1, 1]} : vector<72x128xf32> to vector<8x128xf32>
    %487 = vector.extract_strided_slice %481 {offsets = [32, 0], sizes = [8, 128], strides = [1, 1]} : vector<72x128xf32> to vector<8x128xf32>
    %488 = vector.extract_strided_slice %481 {offsets = [40, 0], sizes = [8, 128], strides = [1, 1]} : vector<72x128xf32> to vector<8x128xf32>
    %489 = vector.extract_strided_slice %481 {offsets = [48, 0], sizes = [8, 128], strides = [1, 1]} : vector<72x128xf32> to vector<8x128xf32>
    %490 = vector.extract_strided_slice %481 {offsets = [56, 0], sizes = [8, 128], strides = [1, 1]} : vector<72x128xf32> to vector<8x128xf32>
    %491 = vector.extract_strided_slice %481 {offsets = [64, 0], sizes = [8, 128], strides = [1, 1]} : vector<72x128xf32> to vector<8x128xf32>
    %492 = vector.extract_strided_slice %482 {offsets = [0, 0], sizes = [8, 1], strides = [1, 1]} : vector<72x1xf32> to vector<8x1xf32>
    %493 = vector.extract_strided_slice %482 {offsets = [8, 0], sizes = [8, 1], strides = [1, 1]} : vector<72x1xf32> to vector<8x1xf32>
    %494 = vector.extract_strided_slice %482 {offsets = [16, 0], sizes = [8, 1], strides = [1, 1]} : vector<72x1xf32> to vector<8x1xf32>
    %495 = vector.extract_strided_slice %482 {offsets = [24, 0], sizes = [8, 1], strides = [1, 1]} : vector<72x1xf32> to vector<8x1xf32>
    %496 = vector.extract_strided_slice %482 {offsets = [32, 0], sizes = [8, 1], strides = [1, 1]} : vector<72x1xf32> to vector<8x1xf32>
    %497 = vector.extract_strided_slice %482 {offsets = [40, 0], sizes = [8, 1], strides = [1, 1]} : vector<72x1xf32> to vector<8x1xf32>
    %498 = vector.extract_strided_slice %482 {offsets = [48, 0], sizes = [8, 1], strides = [1, 1]} : vector<72x1xf32> to vector<8x1xf32>
    %499 = vector.extract_strided_slice %482 {offsets = [56, 0], sizes = [8, 1], strides = [1, 1]} : vector<72x1xf32> to vector<8x1xf32>
    %500 = vector.extract_strided_slice %482 {offsets = [64, 0], sizes = [8, 1], strides = [1, 1]} : vector<72x1xf32> to vector<8x1xf32>
    %501 = arith.maximumf %492, %493 : vector<8x1xf32>
    %502 = arith.maximumf %501, %494 : vector<8x1xf32>
    %503 = arith.maximumf %502, %495 : vector<8x1xf32>
    %504 = arith.maximumf %503, %496 : vector<8x1xf32>
    %505 = arith.maximumf %504, %497 : vector<8x1xf32>
    %506 = arith.maximumf %505, %498 : vector<8x1xf32>
    %507 = arith.maximumf %506, %499 : vector<8x1xf32>
    %508 = arith.maximumf %507, %500 : vector<8x1xf32>
    %509 = arith.subf %492, %508 : vector<8x1xf32>
    %510 = math.exp %509 : vector<8x1xf32>
    %511 = arith.subf %493, %508 : vector<8x1xf32>
    %512 = math.exp %511 : vector<8x1xf32>
    %513 = arith.subf %494, %508 : vector<8x1xf32>
    %514 = math.exp %513 : vector<8x1xf32>
    %515 = arith.subf %495, %508 : vector<8x1xf32>
    %516 = math.exp %515 : vector<8x1xf32>
    %517 = arith.subf %496, %508 : vector<8x1xf32>
    %518 = math.exp %517 : vector<8x1xf32>
    %519 = arith.subf %497, %508 : vector<8x1xf32>
    %520 = math.exp %519 : vector<8x1xf32>
    %521 = arith.subf %498, %508 : vector<8x1xf32>
    %522 = math.exp %521 : vector<8x1xf32>
    %523 = arith.subf %499, %508 : vector<8x1xf32>
    %524 = math.exp %523 : vector<8x1xf32>
    %525 = arith.subf %500, %508 : vector<8x1xf32>
    %526 = math.exp %525 : vector<8x1xf32>
    %527 = vector.broadcast %510 : vector<8x1xf32> to vector<8x128xf32>
    %528 = arith.mulf %527, %483 : vector<8x128xf32>
    %529 = vector.broadcast %512 : vector<8x1xf32> to vector<8x128xf32>
    %530 = arith.mulf %529, %484 : vector<8x128xf32>
    %531 = vector.broadcast %514 : vector<8x1xf32> to vector<8x128xf32>
    %532 = arith.mulf %531, %485 : vector<8x128xf32>
    %533 = vector.broadcast %516 : vector<8x1xf32> to vector<8x128xf32>
    %534 = arith.mulf %533, %486 : vector<8x128xf32>
    %535 = vector.broadcast %518 : vector<8x1xf32> to vector<8x128xf32>
    %536 = arith.mulf %535, %487 : vector<8x128xf32>
    %537 = vector.broadcast %520 : vector<8x1xf32> to vector<8x128xf32>
    %538 = arith.mulf %537, %488 : vector<8x128xf32>
    %539 = vector.broadcast %522 : vector<8x1xf32> to vector<8x128xf32>
    %540 = arith.mulf %539, %489 : vector<8x128xf32>
    %541 = vector.broadcast %524 : vector<8x1xf32> to vector<8x128xf32>
    %542 = arith.mulf %541, %490 : vector<8x128xf32>
    %543 = vector.broadcast %526 : vector<8x1xf32> to vector<8x128xf32>
    %544 = arith.mulf %543, %491 : vector<8x128xf32>
    %545 = arith.addf %528, %530 : vector<8x128xf32>
    %546 = arith.addf %545, %532 : vector<8x128xf32>
    %547 = arith.addf %546, %534 : vector<8x128xf32>
    %548 = arith.addf %547, %536 : vector<8x128xf32>
    %549 = arith.addf %548, %538 : vector<8x128xf32>
    %550 = arith.addf %549, %540 : vector<8x128xf32>
    %551 = arith.addf %550, %542 : vector<8x128xf32>
    %552 = arith.addf %551, %544 : vector<8x128xf32>
    %553 = arith.addf %510, %512 : vector<8x1xf32>
    %554 = arith.addf %553, %514 : vector<8x1xf32>
    %555 = arith.addf %554, %516 : vector<8x1xf32>
    %556 = arith.addf %555, %518 : vector<8x1xf32>
    %557 = arith.addf %556, %520 : vector<8x1xf32>
    %558 = arith.addf %557, %522 : vector<8x1xf32>
    %559 = arith.addf %558, %524 : vector<8x1xf32>
    %560 = arith.addf %559, %526 : vector<8x1xf32>
    %561 = tpu.reciprocal %560 {approx = true} : vector<8x1xf32> -> vector<8x1xf32>
    %562 = vector.broadcast %561 : vector<8x1xf32> to vector<8x128xf32>
    %563 = arith.mulf %552, %562 : vector<8x128xf32>
    %c0_69 = arith.constant 0 : index
    %c0_70 = arith.constant 0 : index
    %564 = vector.load %arg6[%c0_69, %c0_70] : memref<8x128xf32, #tpu.memory_space<vmem>>, vector<8x128xf32>
    tpu.vector_store %arg6[%c0_69, %c0_70], %563 {strides = array<i32>} : memref<8x128xf32, #tpu.memory_space<vmem>>, vector<8x128xf32>,
    return
  }
}

</mosaic_0001>

<bundles_post_ra>
// kernel: conversational_prosody_context_encoder.1
= control target key start
LH: loop header
LB: loop body
LE: loop exit
PB: predicated region body
PF: predicated region fallthrough
CT: control target
= control target key end

     0   :  { %v4272_v0 = vmov 0.0   ;;  %vm3001_vm0 = vmmov 0   ;;  %vm3004_vm3 = vmmov 1   ;;  %s4263_s2 = inlined_call_operand.vmem [shape: bf16[384,128], index: 2, kind: input, shape index: {}]   ;;  %s4264_s0 = inlined_call_operand.vmem [shape: f32[72,128], index: 0, kind: input, shape index: {}]   ;;  %s4265_s3 = inlined_call_operand.vmem [shape: bf16[256,384], index: 3, kind: input, shape index: {}]   ;;  %s4266_s5 = inlined_call_operand.vmem [shape: f32[6,384], index: 5, kind: input, shape index: {}]   ;;  %s4267_s1 = inlined_call_operand.vmem [shape: f32[64,2], index: 1, kind: input, shape index: {}]   ;;  %s4268_s4 = inlined_call_operand.vmem [shape: bf16[128,128], index: 4, kind: input, shape index: {}]   ;;  %s4269_s6 = inlined_call_operand.vmem [shape: f32[8,128], index: 6, kind: output, shape index: {}]  }
   0x1   :  { %2450 = vmatprep.subr.bf16.mxu0 %v4272_v0  ;;  %v2779_v1 = vld [vmem:[%s4263_s2 + $0x38] sm:$0xff]   ;;  %2466 = vmatprep.mubr.msk.bf16.mxu0 %vm3001_vm0, %v4272_v0  ;;  %v2780_v2 = vld [vmem:[%s4263_s2 + $0x30] sm:$0xff]   ;;  %v2781_v3 = vld [vmem:[%s4263_s2 + $0x28] sm:$0xff]  }
   0x2   :  { %2486 = vmatprep.subr.bf16.mxu1 %v4272_v0  ;;  %2502 = vmatprep.mubr.msk.bf16.mxu1 %vm3001_vm0, %v4272_v0  ;;  %v2782_v4 = vld [vmem:[%s4263_s2 + $0x20] sm:$0xff]   ;;  %v2787_v5 = vld [vmem:[%s4263_s2 + $0x78] sm:$0xff]   ;;  %v2788_v6 = vld [vmem:[%s4263_s2 + $0x70] sm:$0xff]  }
   0x3   :  { %2451 = vmatpush3.bf16.msra.mxu0 %v2779_v1  ;;  %2487 = vmatpush3.bf16.msra.mxu1 %v2787_v5  ;;  %v2783_v7 = vld [vmem:[%s4263_s2 + $0x18] sm:$0xff]   ;;  %v2784_v8 = vld [vmem:[%s4263_s2 + $0x10] sm:$0xff]   ;;  %v2789_v9 = vld [vmem:[%s4263_s2 + $0x68] sm:$0xff]  }
   0x4   :  { %2452 = vmatprep.subr.bf16.mxu0 %v4272_v0  ;;  %2488 = vmatprep.subr.bf16.mxu1 %v4272_v0  ;;  %v2790_v10 = vld [vmem:[%s4263_s2 + $0x60] sm:$0xff]   ;;  %v2785_v11 = vld [vmem:[%s4263_s2 + $0x8] sm:$0xff]   ;;  %v2791_v12 = vld [vmem:[%s4263_s2 + $0x58] sm:$0xff]  }
   0x5   :  { %v2786_v13 = vld [vmem:[%s4263_s2] sm:$0xff]   ;;  %v80_v15 = vld [vmem:[%s4264_s0 + $0x8] sm:$0xff]  ;;  %v2792_v17 = vld [vmem:[%s4263_s2 + $0x50] sm:$0xff]  }
   0x6   :  { %v79_v14 = vld [vmem:[%s4264_s0] sm:$0xff]  ;;  %v81_v18 = vld [vmem:[%s4264_s0 + $0x10] sm:$0xff]  ;;  %v82_v19 = vld [vmem:[%s4264_s0 + $0x18] sm:$0xff] }
   0x7   :  { %2453 = vmatpush3.bf16.msra.mxu0 %v2780_v2  ;;  %2489 = vmatpush3.bf16.msra.mxu1 %v2788_v6  ;;  %v88_v16 = vpack.c.bf16 %v80_v15, %v79_v14  ;;  %v89_v20 = vpack.c.bf16 %v82_v19, %v81_v18  ;;  %v83_v21 = vld [vmem:[%s4264_s0 + $0x20] sm:$0xff]  ;;  %v84_v22 = vld [vmem:[%s4264_s0 + $0x28] sm:$0xff]  ;;  %v85_v24 = vld [vmem:[%s4264_s0 + $0x30] sm:$0xff] }
   0x8   :  { %2454 = vmatprep.subr.bf16.mxu0 %v4272_v0  ;;  %2490 = vmatprep.subr.bf16.mxu1 %v4272_v0  ;;  %v90_v23 = vpack.c.bf16 %v84_v22, %v83_v21  ;;  %v86_v25 = vld [vmem:[%s4264_s0 + $0x38] sm:$0xff]  ;;  %v2793_v27 = vld [vmem:[%s4263_s2 + $0x48] sm:$0xff]   ;;  %v2794_v28 = vld [vmem:[%s4263_s2 + $0x40] sm:$0xff]  }
   0x9   :  { %v91_v26 = vpack.c.bf16 %v86_v25, %v85_v24  ;;  %v87_v29 = vld [vmem:[%s4264_s0 + $0x40] sm:$0xff]  ;;  %v2795_v31 = vld [vmem:[%s4265_s3 + $0xa8] ss:$12 sps:$4 sm:$0xff]   ;;  %v2797_v32 = vld [vmem:[%s4265_s3 + $0xac] ss:$12 sps:$4 sm:$0xff]  }
   0xa   :  { %v92_v30 = vpack.c.bf16 %v87_v29, %v87_v29  ;;  %v2800_v33 = vld [vmem:[%s4265_s3 + $0x94] ss:$12 sps:$4 sm:$0xff]   ;;  %v2798_v34 = vld [vmem:[%s4265_s3 + $0x90] ss:$12 sps:$4 sm:$0xff]   ;;  %v2801_v37 = vld [vmem:[%s4265_s3 + $0x78] ss:$12 sps:$4 sm:$0xff]  }
   0xb   :  { %2455 = vmatpush3.bf16.msra.mxu0 %v2781_v3  ;;  %2491 = vmatpush3.bf16.msra.mxu1 %v2789_v9  ;;  %v2803_v35 = vld [vmem:[%s4265_s3 + $0x7c] ss:$12 sps:$4 sm:$0xff]   ;;  %v2806_v38 = vld [vmem:[%s4265_s3 + $0x64] ss:$12 sps:$4 sm:$0xff]   ;;  %v2804_v39 = vld [vmem:[%s4265_s3 + $0x60] ss:$12 sps:$4 sm:$0xff]  }
   0xc   :  { %2456 = vmatprep.subr.bf16.mxu0 %v4272_v0  ;;  %2492 = vmatprep.subr.bf16.mxu1 %v4272_v0  ;;  %v2807_v36 = vld [vmem:[%s4265_s3 + $0xb0] ss:$12 sps:$4 sm:$0xff]   ;;  %v2810_v40 = vld [vmem:[%s4265_s3 + $0x4c] ss:$12 sps:$4 sm:$0xff]   ;;  %v2808_v41 = vld [vmem:[%s4265_s3 + $0x48] ss:$12 sps:$4 sm:$0xff]  }
   0xd   :  { %v2814_v42 = vld [vmem:[%s4265_s3 + $0x34] ss:$12 sps:$4 sm:$0xff]   ;;  %v2812_v43 = vld [vmem:[%s4265_s3 + $0x30] ss:$12 sps:$4 sm:$0xff]   ;;  %v2811_v52 = vld [vmem:[%s4265_s3 + $0x98] ss:$12 sps:$4 sm:$0xff]  }
   0xe   :  { %v75_v45 = vld [vmem:[%s4266_s5] ss:$0 sm:$0xff]  ;;  %v2816_v61 = vld [vmem:[%s4265_s3 + $0x68] ss:$12 sps:$4 sm:$0xff]   ;;  %v2820_v14 = vld [vmem:[%s4265_s3 + $0x50] ss:$12 sps:$4 sm:$0xff]  }
   0xf   :  { %2457 = vmatpush3.bf16.msra.mxu0 %v2782_v4  ;;  %2493 = vmatpush3.bf16.msra.mxu1 %v2790_v10  ;;  %v2815_v55 = vld [vmem:[%s4265_s3 + $0x80] ss:$12 sps:$4 sm:$0xff]   ;;  %v2817_v15 = vld [vmem:[%s4265_s3 + $0x18] ss:$12 sps:$4 sm:$0xff]  }
  0x10   :  { %2458 = vmatprep.subr.bf16.mxu0 %v4272_v0  ;;  %2494 = vmatprep.subr.bf16.mxu1 %v4272_v0  ;;  %v2824_v18 = vld [vmem:[%s4265_s3 + $0x38] ss:$12 sps:$4 sm:$0xff]   ;;  %v2827_v24 = vld [vmem:[%s4265_s3 + $0x20] ss:$12 sps:$4 sm:$0xff]  }
  0x11   :  { %v352_v29 = vld [vmem:[%s4267_s1 + $0x8] sm:$0xff] }
  0x13   :  { %2459 = vmatpush3.bf16.msra.mxu0 %v2783_v7  ;;  %2495 = vmatpush3.bf16.msra.mxu1 %v2791_v12 }
  0x14   :  { %2460 = vmatprep.subr.bf16.mxu0 %v4272_v0  ;;  %2496 = vmatprep.subr.bf16.mxu1 %v4272_v0 }
  0x17   :  { %2461 = vmatpush3.bf16.msra.mxu0 %v2784_v8  ;;  %2497 = vmatpush3.bf16.msra.mxu1 %v2792_v17  ;;  %v2823_v17 = vld [vmem:[%s4265_s3 + $0x4] ss:$12 sps:$4 sm:$0xff]  }
  0x18   :  { %2462 = vmatprep.subr.bf16.mxu0 %v4272_v0  ;;  %2498 = vmatprep.subr.bf16.mxu1 %v4272_v0 }
  0x1b   :  { %2463 = vmatpush3.bf16.msra.mxu0 %v2785_v11  ;;  %2499 = vmatpush3.bf16.msra.mxu1 %v2793_v27 }
  0x1c   :  { %2464 = vmatprep.subr.bf16.mxu0 %v4272_v0  ;;  %2500 = vmatprep.subr.bf16.mxu1 %v4272_v0 }
  0x1f   :  { %2465 = vmatpush3.bf16.msra.mxu0 %v2786_v13  ;;  %2501 = vmatpush3.bf16.msra.mxu1 %v2794_v28  ;;  %v2819_v13 = vld [vmem:[%s4265_s3 + $0x1c] ss:$12 sps:$4 sm:$0xff]  }
  0x20   :  { %657 = vmatprep.subr.bf16.mxu0 %v2797_v32  ;;  %2522 = vmatprep.subr.bf16.mxu1 %v2807_v36  ;;  %v2831_v28 = vld [vmem:[%s4265_s3 + $0x8] ss:$12 sps:$4 sm:$0xff]  }
  0x21   :  { %v353_v32 = vld [vmem:[%s4267_s1 + $0x10] sm:$0xff] }
  0x22   :  { %2467 = vmatmul.mubr.bf16.vlgmr.msra.gmra.mxu0 %v88_v16 }
  0x23   :  { %2470 = vmatprep.mubr.msk.bf16.mxu0 %vm3001_vm0, %v4272_v0  ;;  %658 = vmatpush1.bf16.msra.mxu0 %v2795_v31  ;;  %v3003_v31 = vmov 1  }
  0x24   :  { %659 = vmatprep.subr.bf16.mxu0 %v2800_v33  ;;  %v354_v33 = vld [vmem:[%s4267_s1 + $0x18] sm:$0xff] }
  0x27   :  { %660 = vmatpush1.bf16.msra.mxu0 %v2798_v34  ;;  %v355_v34 = vld [vmem:[%s4267_s1 + $0x20] sm:$0xff] }
  0x28   :  { %661 = vmatprep.subr.bf16.mxu0 %v2803_v35  ;;  %v356_v35 = vld [vmem:[%s4267_s1 + $0x28] sm:$0xff] }
  0x2a   :  { %2471 = vmatmul.mubr.bf16.gmra.mxu0 %v89_v20  ;;  %v2821_v20 = vld [vmem:[%s4265_s3] ss:$12 sps:$4 sm:$0xff]  }
  0x2b   :  { %2474 = vmatprep.mubr.msk.bf16.mxu0 %vm3001_vm0, %v4272_v0  ;;  %662 = vmatpush1.bf16.msra.mxu0 %v2801_v37  ;;  %v358_v37 = vld [vmem:[%s4267_s1 + $0x38] sm:$0xff] }
  0x2c   :  { %663 = vmatprep.subr.bf16.mxu0 %v2806_v38  ;;  %v3265_v38 = vld [vmem:[%s4266_s5 + $0x1] ss:$0 sm:$0xff] }
  0x2f   :  { %664 = vmatpush1.bf16.msra.mxu0 %v2804_v39 }
  0x30   :  { %665 = vmatprep.subr.bf16.mxu0 %v2810_v40 }
  0x32   :  { %2475 = vmatmul.mubr.bf16.gmra.mxu0 %v90_v23  ;;  %v3224_v23 = vld [vmem:[%s4265_s3 + $0x16c] ss:$12 sps:$4 sm:$0xff]  }
  0x33   :  { %2478 = vmatprep.mubr.msk.bf16.mxu0 %vm3001_vm0, %v4272_v0  ;;  %666 = vmatpush1.bf16.msra.mxu0 %v2808_v41 }
  0x34   :  { %667 = vmatprep.subr.bf16.mxu0 %v2814_v42 }
  0x37   :  { %668 = vmatpush1.bf16.msra.mxu0 %v2812_v43 }
  0x38   :  { %669 = vmatprep.subr.bf16.mxu0 %v2819_v13  ;;  %v3337_v13 = vld [vmem:[%s4265_s3 + $0x108] ss:$12 sps:$4 sm:$0xff]  }
  0x3a   :  { %2479 = vmatmul.mubr.bf16.gmra.mxu0 %v91_v26  ;;  %v4270_v26 = vmov 0  }
  0x3b   :  { %2482 = vmatprep.mubr.msk.bf16.mxu0 %vm3001_vm0, %v4272_v0  ;;  %670 = vmatpush1.bf16.msra.mxu0 %v2817_v15  ;;  %v3343_v15 = vld [vmem:[%s4265_s3 + $0xf4] ss:$12 sps:$4 sm:$0xff]  }
  0x3c   :  { %671 = vmatprep.subr.bf16.mxu0 %v2823_v17  ;;  %2774 = vset.pattern.permute.xlu1 %v4270_v26 }
  0x3d   :  { %2772 = vset.pattern.permute.xlu0 %v4270_v26  ;;  %368 = vperm.xlu1 %2774, %v352_v29  }
  0x3f   :  { %672 = vmatpush1.bf16.msra.mxu0 %v2821_v20  ;;  %v3357_v20 = vld [vmem:[%s4265_s3 + $0xf0] ss:$12 sps:$4 sm:$0xff]  }
  0x40   :  { %939 = vmatprep.subr.bf16.mxu0 %v3224_v23 }
  0x41   :  { %2775 = vset.pattern.permute.xlu1 %v3003_v31 }
  0x42   :  { %2483 = vmatmul.mubr.bf16.gmra.mxu0 %v92_v30  ;;  %v351_v30 = vld [vmem:[%s4267_s1] sm:$0xff]  ;;  %406 = vperm.xlu1 %2775, %v352_v29  }
  0x43   :  { %689 = vmatprep.mubr.bf16.mxu0 %v4270_v26  ;;  %363 = vperm.xlu0 %2772, %v351_v30   ;;  %v3378_v29 = vld [vmem:[%s4265_s3 + $0xd8] ss:$12 sps:$4 sm:$0xff]  }
  0x46   :  { %2776 = vset.pattern.permute.xlu1 %v4270_v26 }
  0x47   :  { %2773 = vset.pattern.permute.xlu0 %v3003_v31  ;;  %373 = vperm.xlu1 %2776, %v353_v32   ;;  %v3384_v31 = vld [vmem:[%s4265_s3 + $0xc4] ss:$12 sps:$4 sm:$0xff]  }
  0x48   :  { %402 = vperm.xlu0 %2773, %v351_v30  }
  0x4b   :  { %378 = vperm.xlu1 %2776, %v354_v33  }
  0x4c   :  { %410 = vperm.xlu0 %2773, %v353_v32   ;;  %v3390_v32 = vld [vmem:[%s4265_s3 + $0x110] ss:$12 sps:$4 sm:$0xff]  }
  0x4f   :  { %383 = vperm.xlu1 %2776, %v355_v34  }
  0x50   :  { %414 = vperm.xlu0 %2773, %v354_v33   ;;  %v3397_v33 = vld [vmem:[%s4265_s3 + $0xc0] ss:$12 sps:$4 sm:$0xff]  }
  0x53   :  { %388 = vperm.xlu1 %2776, %v356_v35  }
  0x54   :  { %418 = vperm.xlu0 %2773, %v355_v34   ;;  %v3405_v34 = vld [vmem:[%s4265_s3 + $0xf8] ss:$12 sps:$4 sm:$0xff]  }
  0x58   :  { %422 = vperm.xlu0 %2773, %v356_v35   ;;  %v3415_v35 = vld [vmem:[%s4265_s3 + $0xe0] ss:$12 sps:$4 sm:$0xff]  }
  0xe2   :  { %v175_v44 = vpop.f32.mrf.mxu0 }
  0xe3   :  { %v176_v48 = vadd.f32 %v175_v44, %v75_v45 }
  0xe4   :  { %v2468_v46 = vpop.f32.mrf.mxu0 }
  0xe6   :  { %v178_v47 = vpop.f32.mrf.mxu0 }
  0xe7   :  { %v179_v49 = vadd.f32 %v178_v47, %v75_v45 }
  0xe8   :  { %v2469_v50 = vpop.f32.mrf.mxu0 }
  0xe9   :  { %v213_v51 = vpack.c.bf16 %v179_v49, %v176_v48  ;;  %v3272_v48 = vld [vmem:[%s4265_s3 + $0x168] ss:$12 sps:$4 sm:$0xff]  }
  0xea   :  { %v183_v53 = vpop.f32.mrf.mxu0  ;;  %v3277_v50 = vld [vmem:[%s4265_s3 + $0x154] ss:$12 sps:$4 sm:$0xff]  }
  0xeb   :  { %2503 = vmatmul.mubr.bf16.vlgmr.msra.gmra.mxu1 %v213_v51  ;;  %v184_v57 = vadd.f32 %v183_v53, %v75_v45 }
  0xec   :  { %v2472_v54 = vpop.f32.mrf.mxu0  ;;  %2506 = vmatprep.mubr.msk.bf16.mxu1 %vm3001_vm0, %v4272_v0  ;;  %2523 = vmatpush3.bf16.msra.mxu1 %v2807_v36  ;;  %v357_v36 = vld [vmem:[%s4267_s1 + $0x30] sm:$0xff] }
  0xed   :  { %2524 = vmatprep.subr.bf16.mxu1 %v2811_v52  ;;  %426 = vperm.xlu0 %2773, %v357_v36   ;;  %v3284_v54 = vld [vmem:[%s4265_s3 + $0x150] ss:$12 sps:$4 sm:$0xff]  }
  0xee   :  { %v186_v56 = vpop.f32.mrf.mxu0  ;;  %393 = vperm.xlu1 %2776, %v357_v36   ;;  %v3426_v36 = vld [vmem:[%s4265_s3 + $0xc8] ss:$12 sps:$4 sm:$0xff]  }
  0xef   :  { %v187_v58 = vadd.f32 %v186_v56, %v75_v45  ;;  %v3292_v56 = vld [vmem:[%s4265_s3 + $0x13c] ss:$12 sps:$4 sm:$0xff]  }
  0xf0   :  { %v2473_v59 = vpop.f32.mrf.mxu0  ;;  %2525 = vmatpush3.bf16.msra.mxu1 %v2811_v52 }
  0xf1   :  { %v214_v60 = vpack.c.bf16 %v187_v58, %v184_v57  ;;  %2526 = vmatprep.subr.bf16.mxu1 %v2815_v55  ;;  %430 = vperm.xlu0 %2773, %v358_v37  }
  0xf2   :  { %v191_v62 = vpop.f32.mrf.mxu0  ;;  %398 = vperm.xlu1 %2776, %v358_v37  }
  0xf3   :  { %2507 = vmatmul.mubr.bf16.gmra.mxu1 %v214_v60  ;;  %v192_v2 = vadd.f32 %v191_v62, %v75_v45 }
  0xf4   :  { %v2476_v63 = vpop.f32.mrf.mxu0  ;;  %2510 = vmatprep.mubr.msk.bf16.mxu1 %vm3001_vm0, %v4272_v0  ;;  %2527 = vmatpush3.bf16.msra.mxu1 %v2815_v55 }
  0xf5   :  { %2528 = vmatprep.subr.bf16.mxu1 %v2816_v61  ;;  %v3304_v63 = vld [vmem:[%s4265_s3 + $0x124] ss:$12 sps:$4 sm:$0xff]  }
  0xf6   :  { %v194_v1 = vpop.f32.mrf.mxu0 }
  0xf7   :  { %v195_v3 = vadd.f32 %v194_v1, %v75_v45  ;;  %v3309_v1 = vld [vmem:[%s4265_s3 + $0x170] ss:$12 sps:$4 sm:$0xff]  }
  0xf8   :  { %v2477_v4 = vpop.f32.mrf.mxu0  ;;  %2529 = vmatpush3.bf16.msra.mxu1 %v2816_v61  ;;  %v3298_v61 = vld [vmem:[%s4265_s3 + $0x138] ss:$12 sps:$4 sm:$0xff]  }
  0xf9   :  { %v215_v5 = vpack.c.bf16 %v195_v3, %v192_v2  ;;  %2530 = vmatprep.subr.bf16.mxu1 %v2820_v14 }
  0xfa   :  { %v199_v6 = vpop.f32.mrf.mxu0 }
  0xfb   :  { %2511 = vmatmul.mubr.bf16.gmra.mxu1 %v215_v5  ;;  %v200_v9 = vadd.f32 %v199_v6, %v75_v45  ;;  %v3316_v5 = vld [vmem:[%s4265_s3 + $0x120] ss:$12 sps:$4 sm:$0xff]  }
  0xfc   :  { %v2480_v7 = vpop.f32.mrf.mxu0  ;;  %2514 = vmatprep.mubr.msk.bf16.mxu1 %vm3001_vm0, %v4272_v0  ;;  %2531 = vmatpush3.bf16.msra.mxu1 %v2820_v14 }
  0xfd   :  { %2532 = vmatprep.subr.bf16.mxu1 %v2824_v18  ;;  %v3324_v7 = vld [vmem:[%s4265_s3 + $0x10c] ss:$12 sps:$4 sm:$0xff]  }
  0xfe   :  { %v202_v8 = vpop.f32.mrf.mxu0 }
  0xff   :  { %v203_v10 = vadd.f32 %v202_v8, %v75_v45  ;;  %v3330_v8 = vld [vmem:[%s4265_s3 + $0x158] ss:$12 sps:$4 sm:$0xff]  }
 0x100   :  { %v2481_v11 = vpop.f32.mrf.mxu0  ;;  %2533 = vmatpush3.bf16.msra.mxu1 %v2824_v18 }
 0x101   :  { %v216_v12 = vpack.c.bf16 %v203_v10, %v200_v9  ;;  %2534 = vmatprep.subr.bf16.mxu1 %v2827_v24 }
 0x102   :  { %v207_v16 = vpop.f32.mrf.mxu0 }
 0x103   :  { %2515 = vmatmul.mubr.bf16.gmra.mxu1 %v216_v12  ;;  %v208_v19 = vadd.f32 %v207_v16, %v75_v45  ;;  %v3349_v16 = vld [vmem:[%s4265_s3 + $0x140] ss:$12 sps:$4 sm:$0xff]  }
 0x104   :  { %2518 = vmatprep.mubr.msk.bf16.mxu1 %vm3001_vm0, %v4272_v0  ;;  %v2484_v21 = vpop.f32.mrf.mxu0  ;;  %2535 = vmatpush3.bf16.msra.mxu1 %v2827_v24  ;;  %v3371_v24 = vld [vmem:[%s4265_s3 + $0x128] ss:$12 sps:$4 sm:$0xff]  }
 0x105   :  { %v217_v22 = vpack.c.bf16 %v208_v19, %v208_v19  ;;  %2536 = vmatprep.subr.bf16.mxu1 %v2831_v28 }
 0x106   :  { %v210_v25 = vpop.f32.mrf.mxu0 }
 0x108   :  { %v2485_v27 = vpop.f32.mrf.mxu0  ;;  %2537 = vmatpush3.bf16.msra.mxu1 %v2831_v28 }
 0x109   :  { %2546 = vmatprep.subr.bf16.mxu1 %v4272_v0 }
 0x10b   :  { %2519 = vmatmul.mubr.bf16.gmra.mxu1 %v217_v22  ;;  %v3365_v22 = vld [vmem:[%s4265_s3 + $0xdc] ss:$12 sps:$4 sm:$0xff]  }
 0x1ab   :  { %v300_v39 = vpop.f32.mrf.mxu1 }
 0x1ac   :  { %v301_v41 = vadd.f32 %v300_v39, %v3265_v38 }
 0x1ad   :  { %v2504_v40 = vpop.f32.mrf.mxu1 }
 0x1ae   :  { %v338_v45 = vmax.f32 %v301_v41, 0.0  ;;  %v24_v41 = vlaneseq }
 0x1af   :  { %v303_v42 = vpop.f32.mrf.mxu1 }
 0x1b0   :  { %v304_v43 = vadd.f32 %v303_v42, %v3265_v38  ;;  %v3467_v42 = vshrl.u32 %v24_v41, 7 }
 0x1b1   :  { %v2505_v44 = vpop.f32.mrf.mxu1 }
 0x1b2   :  { %v339_v46 = vmax.f32 %v304_v43, 0.0  ;;  %v516_v43 = vsub.s32 0, %v3467_v42  ;;  %v2230_v44 = vld [vmem:[%s4266_s5 + $0x4] ss:$8 sm:$0x7] }
 0x1b3   :  { %v308_v47 = vpop.f32.mrf.mxu1 }
 0x1b4   :  { %v509_v49 = vpack.c.bf16 %v339_v46, %v338_v45  ;;  %v309_v52 = vadd.f32 %v308_v47, %v3265_v38  ;;  %v4275_v46 = vsub.s32 1, %v3467_v42  ;;  %v4274_v47 = vsub.s32 2, %v3467_v42 }
 0x1b5   :  { %v2508_v51 = vpop.f32.mrf.mxu1 }
 0x1b6   :  { %690 = vmatmul.mubr.bf16.vlgmr.msra.gmra.mxu0 %v509_v49  ;;  %2538 = vmatprep.mubr.bf16.mxu1 %v509_v49  ;;  %v340_v58 = vmax.f32 %v309_v52, 0.0  ;;  %v517_v51 = vrot.slane %v2230_v44, %v516_v43 }
 0x1b7   :  { %940 = vmatpush1.bf16.msra.mxu0 %v3272_v48  ;;  %v311_v53 = vpop.f32.mrf.mxu1  ;;  %699 = vmatprep.mubr.bf16.mxu0 %v4270_v26 }
 0x1b8   :  { %v312_v55 = vadd.f32 %v311_v53, %v3265_v38  ;;  %941 = vmatprep.subr.bf16.mxu0 %v3277_v50  ;;  %v3481_v53 = vrot.slane %v2230_v44, %v4275_v46 }
 0x1b9   :  { %v2509_v57 = vpop.f32.mrf.mxu1 }
 0x1ba   :  { %v341_v59 = vmax.f32 %v312_v55, 0.0  ;;  %v3485_v57 = vrot.slane %v2230_v44, %v4274_v47 }
 0x1bb   :  { %942 = vmatpush1.bf16.msra.mxu0 %v3284_v54  ;;  %v316_v60 = vpop.f32.mrf.mxu1 }
 0x1bc   :  { %v510_v62 = vpack.c.bf16 %v341_v59, %v340_v58  ;;  %943 = vmatprep.subr.bf16.mxu0 %v3292_v56  ;;  %v317_v3 = vadd.f32 %v316_v60, %v3265_v38 }
 0x1bd   :  { %v2512_v2 = vpop.f32.mrf.mxu1 }
 0x1be   :  { %700 = vmatmul.mubr.bf16.gmra.mxu0 %v510_v62  ;;  %2539 = vmatmul.mubr.bf16.vlgmr.msra.gmra.mxu1 %v510_v62  ;;  %v342_v10 = vmax.f32 %v317_v3, 0.0 }
 0x1bf   :  { %944 = vmatpush1.bf16.msra.mxu0 %v3298_v61  ;;  %v319_v4 = vpop.f32.mrf.mxu1  ;;  %709 = vmatprep.mubr.bf16.mxu0 %v4270_v26 }
 0x1c0   :  { %v320_v6 = vadd.f32 %v319_v4, %v3265_v38  ;;  %945 = vmatprep.subr.bf16.mxu0 %v3304_v63  ;;  %2547 = vmatpush3.bf16.msra.mxu1 %v3309_v1 }
 0x1c1   :  { %v2513_v9 = vpop.f32.mrf.mxu1  ;;  %2548 = vmatprep.subr.bf16.mxu1 %v4272_v0 }
 0x1c2   :  { %v343_v11 = vmax.f32 %v320_v6, 0.0 }
 0x1c3   :  { %946 = vmatpush1.bf16.msra.mxu0 %v3316_v5  ;;  %v324_v12 = vpop.f32.mrf.mxu1 }
 0x1c4   :  { %v511_v14 = vpack.c.bf16 %v343_v11, %v342_v10  ;;  %947 = vmatprep.subr.bf16.mxu0 %v3324_v7  ;;  %2549 = vmatpush3.bf16.msra.mxu1 %v3330_v8  ;;  %v325_v18 = vadd.f32 %v324_v12, %v3265_v38  ;;  %v3492_v10 = vand.u32 127, %v24_v41 }
 0x1c5   :  { %v2516_v17 = vpop.f32.mrf.mxu1  ;;  %2550 = vmatprep.subr.bf16.mxu1 %v4272_v0 }
 0x1c6   :  { %710 = vmatmul.mubr.bf16.gmra.mxu0 %v511_v14  ;;  %2542 = vmatprep.mubr.bf16.mxu1 %v511_v14  ;;  %v344_v27 = vmax.f32 %v325_v18, 0.0  ;;  %vm26_vm1 = vcmp.lt.s32.totalorder %v3492_v10, 64  ;;  %vm347_vm2 = vcmp.lt.s32.totalorder %v3492_v10, 32 }
 0x1c7   :  { %948 = vmatpush1.bf16.msra.mxu0 %v3337_v13  ;;  %v327_v19 = vpop.f32.mrf.mxu1  ;;  %719 = vmatprep.mubr.bf16.mxu0 %v4270_v26  ;;  %vm2312_vm4 = vmpackc.low %vm3004_vm3, %vm347_vm2 }
 0x1c8   :  { %v328_v21 = vadd.f32 %v327_v19, %v3265_v38  ;;  %949 = vmatprep.subr.bf16.mxu0 %v3343_v15  ;;  %2551 = vmatpush3.bf16.msra.mxu1 %v3349_v16 }
 0x1c9   :  { %v2517_v25 = vpop.f32.mrf.mxu1  ;;  %2552 = vmatprep.subr.bf16.mxu1 %v4272_v0 }
 0x1ca   :  { %v345_v28 = vmax.f32 %v328_v21, 0.0 }
 0x1cb   :  { %950 = vmatpush1.bf16.msra.mxu0 %v3357_v20  ;;  %v3460_v37 = vpop.f32.mrf.mxu1 }
 0x1cc   :  { %v512_v30 = vpack.c.bf16 %v345_v28, %v344_v27  ;;  %951 = vmatprep.subr.bf16.mxu0 %v3365_v22  ;;  %2553 = vmatpush3.bf16.msra.mxu1 %v3371_v24  ;;  %4276 = vst [vmem:[#allocation2_spill] sm:$0xff] %v3460_v37 }
 0x1cd   :  { %2554 = vmatprep.subr.bf16.mxu1 %v4272_v0  ;;  %v2520_v38 = vpop.f32.mrf.mxu1 }
 0x1ce   :  { %720 = vmatmul.mubr.bf16.gmra.mxu0 %v512_v30  ;;  %2543 = vmatmul.mubr.bf16.gmra.mxu1 %v512_v30 }
 0x1cf   :  { %952 = vmatpush1.bf16.msra.mxu0 %v3378_v29  ;;  %971 = vmatprep.mubr.bf16.mxu0 %v4270_v26  ;;  %v335_v39 = vpop.f32.mrf.mxu1 }
 0x1d0   :  { %953 = vmatprep.subr.bf16.mxu0 %v3384_v31  ;;  %2555 = vmatpush3.bf16.msra.mxu1 %v3390_v32 }
 0x1d1   :  { %2556 = vmatprep.subr.bf16.mxu1 %v4272_v0  ;;  %2562 = vmatprep.mubr.msk.bf16.mxu1 %vm3001_vm0, %v4272_v0  ;;  %v2521_v40 = vpop.f32.mrf.mxu1 }
 0x1d3   :  { %954 = vmatpush1.bf16.msra.mxu0 %v3397_v33 }
 0x1d4   :  { %2557 = vmatpush3.bf16.msra.mxu1 %v3405_v34  ;;  %1049 = vmatprep.subr.bf16.mxu0 %v3224_v23 }
 0x1d5   :  { %2558 = vmatprep.subr.bf16.mxu1 %v4272_v0 }
 0x1d6   :  { %972 = vmatmul.mubr.bf16.vlgmr.msra.gmra.mxu0 %v4270_v26 }
 0x1d7   :  { %1050 = vmatpush1.bf16.msra.mxu0 %v3272_v48  ;;  %1081 = vmatprep.mubr.bf16.mxu0 %v4270_v26 }
 0x1d8   :  { %2559 = vmatpush3.bf16.msra.mxu1 %v3415_v35  ;;  %1051 = vmatprep.subr.bf16.mxu0 %v3277_v50 }
 0x1d9   :  { %2560 = vmatprep.subr.bf16.mxu1 %v4272_v0 }
 0x1db   :  { %1052 = vmatpush1.bf16.msra.mxu0 %v3284_v54 }
 0x1dc   :  { %2561 = vmatpush3.bf16.msra.mxu1 %v3426_v36  ;;  %1053 = vmatprep.subr.bf16.mxu0 %v3292_v56 }
 0x1dd   :  { %2566 = vmatprep.subr.bf16.mxu1 %v4272_v0 }
 0x1df   :  { %2563 = vmatmul.mubr.bf16.vlgmr.msra.gmra.mxu1 %v4270_v26  ;;  %1054 = vmatpush1.bf16.msra.mxu0 %v3298_v61 }
 0x1e0   :  { %2567 = vmatpush3.bf16.msra.mxu1 %v3309_v1  ;;  %1055 = vmatprep.subr.bf16.mxu0 %v3304_v63 }
 0x1e1   :  { %2568 = vmatprep.subr.bf16.mxu1 %v4272_v0  ;;  %2582 = vmatprep.mubr.msk.bf16.mxu1 %vm3001_vm0, %v4272_v0 }
 0x1e3   :  { %1056 = vmatpush1.bf16.msra.mxu0 %v3316_v5 }
 0x1e4   :  { %2569 = vmatpush3.bf16.msra.mxu1 %v3330_v8  ;;  %1057 = vmatprep.subr.bf16.mxu0 %v3324_v7 }
 0x1e5   :  { %2570 = vmatprep.subr.bf16.mxu1 %v4272_v0 }
 0x1e7   :  { %1058 = vmatpush1.bf16.msra.mxu0 %v3337_v13 }
 0x1e8   :  { %2571 = vmatpush3.bf16.msra.mxu1 %v3349_v16  ;;  %1059 = vmatprep.subr.bf16.mxu0 %v3343_v15 }
 0x1e9   :  { %2572 = vmatprep.subr.bf16.mxu1 %v4272_v0 }
 0x1eb   :  { %1060 = vmatpush1.bf16.msra.mxu0 %v3357_v20 }
 0x1ec   :  { %2573 = vmatpush3.bf16.msra.mxu1 %v3371_v24  ;;  %1061 = vmatprep.subr.bf16.mxu0 %v3365_v22 }
 0x1ed   :  { %2574 = vmatprep.subr.bf16.mxu1 %v4272_v0 }
 0x1ef   :  { %1062 = vmatpush1.bf16.msra.mxu0 %v3378_v29 }
 0x1f0   :  { %2575 = vmatpush3.bf16.msra.mxu1 %v3390_v32  ;;  %1063 = vmatprep.subr.bf16.mxu0 %v3384_v31 }
 0x1f1   :  { %2576 = vmatprep.subr.bf16.mxu1 %v4272_v0 }
 0x1f3   :  { %1064 = vmatpush1.bf16.msra.mxu0 %v3397_v33 }
 0x1f4   :  { %2577 = vmatpush3.bf16.msra.mxu1 %v3405_v34  ;;  %1159 = vmatprep.subr.bf16.mxu0 %v3224_v23 }
 0x1f5   :  { %2578 = vmatprep.subr.bf16.mxu1 %v4272_v0 }
 0x1f8   :  { %2579 = vmatpush3.bf16.msra.mxu1 %v3415_v35 }
 0x1f9   :  { %2580 = vmatprep.subr.bf16.mxu1 %v4272_v0 }
 0x1fc   :  { %2581 = vmatpush3.bf16.msra.mxu1 %v3426_v36 }
 0x1fd   :  { %2586 = vmatprep.subr.bf16.mxu1 %v4272_v0 }
 0x276   :  { %v3473_v45 = vpop.f32.mrf.mxu0 }
 0x278   :  { %v3477_v49 = vpop.f32.mrf.mxu0 }
 0x27a   :  { %v695_v52 = vpop.f32.mrf.mxu0 }
 0x27b   :  { %v696_v55 = vadd.f32 %v695_v52, %v517_v51 }
 0x27c   :  { %v697_v58 = vpop.f32.mrf.mxu0 }
 0x27d   :  { %v698_v59 = vadd.f32 %v697_v58, %v3481_v53 }
 0x27e   :  { %v701_v60 = vpop.f32.mrf.mxu0  ;;  %v2540_v62 = vpop.f32.mrf.mxu1 }
 0x27f   :  { %v702_v2 = vadd.f32 %v701_v60, %v517_v51  ;;  %v3489_v3 = vadd.f32 %v2540_v62, %v3485_v57 }
 0x280   :  { %v703_v4 = vpop.f32.mrf.mxu0  ;;  %v764_v6 = vpop.f32.mrf.mxu1 }
 0x281   :  { %v704_v9 = vadd.f32 %v703_v4, %v3481_v53 }
 0x282   :  { %v705_v11 = vpop.f32.mrf.mxu0  ;;  %v2541_v12 = vpop.f32.mrf.mxu1 }
 0x283   :  { %v706_v14 = vadd.f32 %v705_v11, %v517_v51  ;;  %v776_v17 = vadd.f32 %v2541_v12, %v3485_v57 }
 0x284   :  { %v707_v18 = vpop.f32.mrf.mxu0  ;;  %v767_v19 = vpop.f32.mrf.mxu1 }
 0x285   :  { %v708_v21 = vadd.f32 %v707_v18, %v3481_v53  ;;  %v768_v25 = vadd.f32 %v767_v19, %v3485_v57 }
 0x286   :  { %v711_v27 = vpop.f32.mrf.mxu0 }
 0x287   :  { %v712_v28 = vadd.f32 %v711_v27, %v517_v51 }
 0x288   :  { %v713_v30 = vpop.f32.mrf.mxu0 }
 0x289   :  { %v714_v38 = vadd.f32 %v713_v30, %v3481_v53  ;;  %v3501_v39 = vsel %vm26_vm1, %v706_v14, %v712_v28  ;;  %v3505_v40 = vsel %vm26_vm1, %v712_v28, %v706_v14 }
 0x28a   :  { %v715_v41 = vpop.f32.mrf.mxu0 }
 0x28b   :  { %v716_v44 = vadd.f32 %v715_v41, %v517_v51  ;;  %v3509_v52 = vsel %vm26_vm1, %v708_v21, %v714_v38  ;;  %v3513_v58 = vsel %vm26_vm1, %v714_v38, %v708_v21  ;;  %v2231_v21 = vld [vmem:[%s4266_s5 + $0x5] ss:$8 sm:$0x7] }
 0x28c   :  { %v717_v60 = vpop.f32.mrf.mxu0 }
 0x28d   :  { %v718_v62 = vadd.f32 %v717_v60, %v3481_v53  ;;  %v3518_v4 = vsel %vm26_vm1, %v702_v2, %v716_v44  ;;  %v3522_v11 = vsel %vm26_vm1, %v716_v44, %v702_v2 }
 0x28e   :  { %v721_v12 = vpop.f32.mrf.mxu0  ;;  %v2544_v14 = vpop.f32.mrf.mxu1 }
 0x28f   :  { %v722_v18 = vadd.f32 %v721_v12, %v517_v51  ;;  %v789_v19 = vadd.f32 %v2544_v14, %v3485_v57  ;;  %v3530_v27 = vsel %vm26_vm1, %v704_v9, %v718_v62  ;;  %v3534_v28 = vsel %vm26_vm1, %v718_v62, %v704_v9 }
 0x290   :  { %4277 = vst [vmem:[#allocation3_spill] sm:$0xff] %v3534_v28  ;;  %v723_v30 = vpop.f32.mrf.mxu0  ;;  %v780_v2 = vpop.f32.mrf.mxu1  ;;  %v765_v12 = vadd.f32 %v764_v6, %v3485_v57  ;;  %v3547_v9 = vrot.slane %v2231_v21, %v516_v43 }
 0x291   :  { %v3538_v38 = vsel %vm26_vm1, %v768_v25, %v789_v19  ;;  %v3542_v41 = vsel %vm26_vm1, %v789_v19, %v768_v25  ;;  %v724_v44 = vadd.f32 %v723_v30, %v3481_v53  ;;  %v781_v60 = vadd.f32 %v780_v2, %v3485_v57 }
 0x292   :  { %4278 = vst [vmem:[#allocation4_spill] sm:$0xff] %v3542_v41  ;;  %v725_v14 = vpop.f32.mrf.mxu0  ;;  %v2545_v26 = vpop.f32.mrf.mxu1  ;;  %v3551_v62 = vsel %vm26_vm1, %v696_v55, %v722_v18  ;;  %v3555_v0 = vsel %vm26_vm1, %v722_v18, %v696_v55  ;;  %v692_v30 = vadd.f32 %v3473_v45, %v517_v51  ;;  %v694_v45 = vadd.f32 %v3477_v49, %v3481_v53 }
 0x293   :  { %4279 = vst [vmem:[#allocation5_spill] sm:$0xff] %v3555_v0  ;;  %v3559_v25 = vsel %vm26_vm1, %v776_v17, %v781_v60  ;;  %v3563_v19 = vsel %vm26_vm1, %v781_v60, %v776_v17  ;;  %v726_v6 = vadd.f32 %v725_v14, %v517_v51  ;;  %v792_v43 = vadd.f32 %v2545_v26, %v3485_v57 }
 0x294   :  { %v727_v2 = vpop.f32.mrf.mxu0  ;;  %v783_v47 = vpop.f32.mrf.mxu1  ;;  %v3569_v46 = vsel %vm26_vm1, %v698_v59, %v724_v44  ;;  %v3573_v55 = vsel %vm26_vm1, %v724_v44, %v698_v59 }
 0x295   :  { %4280 = vst [vmem:[#allocation6_spill] sm:$0xff] %v3573_v55  ;;  %v3577_v18 = vsel %vm26_vm1, %v792_v43, %v765_v12  ;;  %v728_v17 = vadd.f32 %v727_v2, %v3481_v53  ;;  %v784_v26 = vadd.f32 %v783_v47, %v3485_v57  ;;  %v3585_v60 = vsel %vm26_vm1, %v726_v6, %v692_v30 }
 0x296   :  { %4281 = vst [vmem:[#allocation7_spill] sm:$0xff] %v3577_v18  ;;  %v973_v51 = vpop.f32.mrf.mxu0  ;;  %4282 = vst [vmem:[#allocation8_spill] sm:$0xff] %v3585_v60  ;;  %v4284_v57 = vsub.s32 1, %v3467_v42  ;;  %v1020_v53 = vsel %vm26_vm1, %v692_v30, %v726_v6 }
 0x297   :  { %v3590_v59 = vsel %vm26_vm1, %v3489_v3, %v784_v26  ;;  %v3595_v44 = vsel %vm26_vm1, %v784_v26, %v3489_v3  ;;  %v974_v47 = vadd.f32 %v973_v51, %v3547_v9  ;;  %v3606_v2 = vsel %vm26_vm1, %v728_v17, %v694_v45 }
 0x298   :  { %4283 = vst [vmem:[#allocation9_spill] sm:$0xff] %v3595_v44  ;;  %v3600_v49 = vrot.slane %v2231_v21, %v4284_v57  ;;  %v975_v14 = vpop.f32.mrf.mxu0  ;;  %v1021_v51 = vsel %vm26_vm1, %v694_v45, %v728_v17 }
 0x299   :  { %v1023_v37 = vadd.f32 %v1020_v53, %v974_v47 }
 0x29a   :  { %v977_v18 = vpop.f32.mrf.mxu0  ;;  %v976_v3 = vadd.f32 %v975_v14, %v3600_v49 }
 0x29b   :  { %v2280_v60 = vmul.f32 -1.442695, %v1023_v37  ;;  %v4285_v18 = vsub.s32 2, %v3467_v42 }
 0x29c   :  { %v978_v26 = vpop.f32.mrf.mxu0  ;;  %v1030_v57 = vadd.f32 %v1021_v51, %v976_v3 }
 0x29d   :  { %2875 = vpow2.f32 %v2280_v60  ;;  %v3613_v37 = vrot.slane %v2231_v21, %v4285_v18  ;;  %v4286_v18 = vmov 0.0  }
 0x29e   :  { %v2281_v0 = vmul.f32 -1.442695, %v1030_v57 }
 0x29f   :  { %v1014_v41 = vpop.f32.mrf.mxu1 }
 0x2a0   :  { %2877 = vpow2.f32 %v2281_v0  ;;  %v1015_v60 = vadd.f32 %v1014_v41, %v3613_v37  ;;  %v3618_v0 = vpop.permute.xlu0 %363 }
 0x2a1   :  { %v2564_v55 = vpop.f32.mrf.mxu1 }
 0x2a2   :  { %v1022_v55 = vsel %vm26_vm1, %v765_v12, %v792_v43 }
 0x2a3   :  { %v1017_v6 = vpop.f32.mrf.mxu1 }
 0x2a5   :  { %v2565_v30 = vpop.f32.mrf.mxu1 }
 0x2aa   :  { %v2876_v44 = vpop.eup %2875 }
 0x2ab   :  { %v1027_v28 = vadd.f32 1.0, %v2876_v44 }
 0x2ad   :  { %2879 = vrcp.f32 %v1027_v28  ;;  %v2878_v47 = vpop.eup %2877  ;;  %v403_v28 = vpop.permute.xlu0 %402 }
 0x2ae   :  { %v1034_v53 = vadd.f32 1.0, %v2878_v47  ;;  %v433_v42 = vsel %vm26_vm1, %v3618_v0, %v403_v28  ;;  %v4287_v47 = vmov 0  }
 0x2af   :  { %v1045_v51 = vsub.f32 1.0, %v433_v42 }
 0x2b0   :  { %2881 = vrcp.f32 %v1034_v53 }
 0x2b1   :  { %v1046_v30 = vmul.f32 0.0, %v1045_v51 }
 0x2ba   :  { %v2880_v14 = vpop.eup %2879 }
 0x2bb   :  { %v1037_v17 = vmul.f32 %v2880_v14, %v1015_v60 }
 0x2bd   :  { %v1038_v45 = vadd.f32 %v1037_v17, %v1022_v55  ;;  %v2882_v44 = vpop.eup %2881 }
 0x2be   :  { %v1040_v21 = vsub.f32 1.0, %v2882_v44  ;;  %v1042_v41 = vmul.f32 0.0, %v2882_v44 }
 0x2bf   :  { %2883 = vtanh.f32 %v1038_v45 }
 0x2cc   :  { %v2884_v3 = vpop.eup %2883 }
 0x2cd   :  { %v1041_v26 = vmul.f32 %v2884_v3, %v1040_v21 }
 0x2cf   :  { %v1043_v57 = vadd.f32 %v1042_v41, %v1041_v26 }
 0x2d1   :  { %v3623_v6 = vmul.f32 %v1043_v57, %v433_v42 }
 0x2d3   :  { %v3626_v12 = vadd.f32 %v1046_v30, %v3623_v6 }
 0x2d5   :  { %v1048_v43 = vpack.c.bf16 %v3626_v12, %v3626_v12 }
 0x2d7   :  { %1082 = vmatmul.mubr.bf16.vlgmr.msra.gmra.mxu0 %v1048_v43  ;;  %2583 = vmatmul.mubr.bf16.vlgmr.msra.gmra.mxu1 %v1048_v43 }
 0x2d8   :  { %1160 = vmatpush1.bf16.msra.mxu0 %v3272_v48  ;;  %2587 = vmatpush3.bf16.msra.mxu1 %v3309_v1 }
 0x2d9   :  { %1161 = vmatprep.subr.bf16.mxu0 %v3277_v50  ;;  %2588 = vmatprep.subr.bf16.mxu1 %v4286_v18 }
 0x2da   :  { %1191 = vmatprep.mubr.bf16.mxu0 %v4287_v47  ;;  %2602 = vmatprep.mubr.msk.bf16.mxu1 %vm3001_vm0, %v4286_v18 }
 0x2dc   :  { %1162 = vmatpush1.bf16.msra.mxu0 %v3284_v54  ;;  %2589 = vmatpush3.bf16.msra.mxu1 %v3330_v8 }
 0x2dd   :  { %1163 = vmatprep.subr.bf16.mxu0 %v3292_v56  ;;  %2590 = vmatprep.subr.bf16.mxu1 %v4286_v18 }
 0x2e0   :  { %1164 = vmatpush1.bf16.msra.mxu0 %v3298_v61  ;;  %2591 = vmatpush3.bf16.msra.mxu1 %v3349_v16 }
 0x2e1   :  { %1165 = vmatprep.subr.bf16.mxu0 %v3304_v63  ;;  %2592 = vmatprep.subr.bf16.mxu1 %v4286_v18 }
 0x2e4   :  { %1166 = vmatpush1.bf16.msra.mxu0 %v3316_v5  ;;  %2593 = vmatpush3.bf16.msra.mxu1 %v3371_v24 }
 0x2e5   :  { %1167 = vmatprep.subr.bf16.mxu0 %v3324_v7  ;;  %2594 = vmatprep.subr.bf16.mxu1 %v4286_v18 }
 0x2e8   :  { %1168 = vmatpush1.bf16.msra.mxu0 %v3337_v13  ;;  %2595 = vmatpush3.bf16.msra.mxu1 %v3390_v32 }
 0x2e9   :  { %1169 = vmatprep.subr.bf16.mxu0 %v3343_v15  ;;  %2596 = vmatprep.subr.bf16.mxu1 %v4286_v18 }
 0x2ec   :  { %1170 = vmatpush1.bf16.msra.mxu0 %v3357_v20  ;;  %2597 = vmatpush3.bf16.msra.mxu1 %v3405_v34 }
 0x2ed   :  { %1171 = vmatprep.subr.bf16.mxu0 %v3365_v22  ;;  %2598 = vmatprep.subr.bf16.mxu1 %v4286_v18 }
 0x2f0   :  { %1172 = vmatpush1.bf16.msra.mxu0 %v3378_v29  ;;  %2599 = vmatpush3.bf16.msra.mxu1 %v3415_v35 }
 0x2f1   :  { %1173 = vmatprep.subr.bf16.mxu0 %v3384_v31  ;;  %2600 = vmatprep.subr.bf16.mxu1 %v4286_v18 }
 0x2f4   :  { %1174 = vmatpush1.bf16.msra.mxu0 %v3397_v33  ;;  %2601 = vmatpush3.bf16.msra.mxu1 %v3426_v36 }
 0x2f5   :  { %1269 = vmatprep.subr.bf16.mxu0 %v3224_v23  ;;  %2606 = vmatprep.subr.bf16.mxu1 %v4286_v18 }
 0x397   :  { %v1083_v53 = vpop.f32.mrf.mxu0  ;;  %v1124_v60 = vpop.f32.mrf.mxu1 }
 0x398   :  { %v1084_v14 = vadd.f32 %v1083_v53, %v3547_v9 }
 0x399   :  { %v1085_v17 = vpop.f32.mrf.mxu0  ;;  %v2584_v55 = vpop.f32.mrf.mxu1 }
 0x39a   :  { %v1133_v45 = vadd.f32 %v3551_v62, %v1084_v14  ;;  %v1086_v21 = vadd.f32 %v1085_v17, %v3600_v49  ;;  %v1125_v55 = vadd.f32 %v1124_v60, %v3613_v37  ;;  %v3671_v17 = vpop.permute.xlu1 %368 }
 0x39b   :  { %v1087_v44 = vpop.f32.mrf.mxu0  ;;  %v1127_v28 = vpop.f32.mrf.mxu1 }
 0x39c   :  { %v2282_v42 = vmul.f32 -1.442695, %v1133_v45  ;;  %v1140_v41 = vadd.f32 %v3569_v46, %v1086_v21 }
 0x39d   :  { %v1088_v3 = vpop.f32.mrf.mxu0  ;;  %v2585_v26 = vpop.f32.mrf.mxu1 }
 0x39e   :  { %2885 = vpow2.f32 %v2282_v42  ;;  %v2283_v51 = vmul.f32 -1.442695, %v1140_v41  ;;  %v407_v28 = vpop.permute.xlu1 %406 }
 0x39f   :  { %v434_v46 = vsel %vm26_vm1, %v3671_v17, %v407_v28 }
 0x3a0   :  { %2887 = vpow2.f32 %v2283_v51  ;;  %v1155_v3 = vsub.f32 1.0, %v434_v46 }
 0x3a2   :  { %v1156_v51 = vmul.f32 %v1155_v3, %v3626_v12 }
 0x3ab   :  { %v2886_v57 = vpop.eup %2885 }
 0x3ac   :  { %v1137_v30 = vadd.f32 1.0, %v2886_v57 }
 0x3ad   :  { %v2888_v43 = vpop.eup %2887 }
 0x3ae   :  { %2889 = vrcp.f32 %v1137_v30  ;;  %v1144_v53 = vadd.f32 1.0, %v2888_v43 }
 0x3b0   :  { %2891 = vrcp.f32 %v1144_v53 }
 0x3bb   :  { %v2890_v62 = vpop.eup %2889 }
 0x3bc   :  { %v1147_v14 = vmul.f32 %v2890_v62, %v1125_v55 }
 0x3bd   :  { %v2892_v44 = vpop.eup %2891 }
 0x3be   :  { %v1148_v45 = vadd.f32 %v1147_v14, %v3538_v38  ;;  %v1150_v42 = vsub.f32 1.0, %v2892_v44  ;;  %v1152_v60 = vmul.f32 %v2892_v44, %v3626_v12 }
 0x3c0   :  { %2893 = vtanh.f32 %v1148_v45 }
 0x3cd   :  { %v2894_v21 = vpop.eup %2893 }
 0x3ce   :  { %v1151_v26 = vmul.f32 %v2894_v21, %v1150_v42 }
 0x3d0   :  { %v1153_v41 = vadd.f32 %v1152_v60, %v1151_v26 }
 0x3d2   :  { %v3678_v57 = vmul.f32 %v1153_v41, %v434_v46 }
 0x3d4   :  { %v3681_v38 = vadd.f32 %v1156_v51, %v3678_v57 }
 0x3d6   :  { %v1158_v30 = vpack.c.bf16 %v3681_v38, %v3681_v38 }
 0x3d8   :  { %1192 = vmatmul.mubr.bf16.vlgmr.msra.gmra.mxu0 %v1158_v30  ;;  %2603 = vmatmul.mubr.bf16.vlgmr.msra.gmra.mxu1 %v1158_v30 }
 0x3d9   :  { %1270 = vmatpush1.bf16.msra.mxu0 %v3272_v48  ;;  %2607 = vmatpush3.bf16.msra.mxu1 %v3309_v1 }
 0x3da   :  { %1271 = vmatprep.subr.bf16.mxu0 %v3277_v50  ;;  %2608 = vmatprep.subr.bf16.mxu1 %v4286_v18 }
 0x3db   :  { %1301 = vmatprep.mubr.bf16.mxu0 %v4287_v47  ;;  %2622 = vmatprep.mubr.msk.bf16.mxu1 %vm3001_vm0, %v4286_v18 }
 0x3dd   :  { %1272 = vmatpush1.bf16.msra.mxu0 %v3284_v54  ;;  %2609 = vmatpush3.bf16.msra.mxu1 %v3330_v8 }
 0x3de   :  { %1273 = vmatprep.subr.bf16.mxu0 %v3292_v56  ;;  %2610 = vmatprep.subr.bf16.mxu1 %v4286_v18 }
 0x3e1   :  { %1274 = vmatpush1.bf16.msra.mxu0 %v3298_v61  ;;  %2611 = vmatpush3.bf16.msra.mxu1 %v3349_v16 }
 0x3e2   :  { %1275 = vmatprep.subr.bf16.mxu0 %v3304_v63  ;;  %2612 = vmatprep.subr.bf16.mxu1 %v4286_v18 }
 0x3e5   :  { %1276 = vmatpush1.bf16.msra.mxu0 %v3316_v5  ;;  %2613 = vmatpush3.bf16.msra.mxu1 %v3371_v24 }
 0x3e6   :  { %1277 = vmatprep.subr.bf16.mxu0 %v3324_v7  ;;  %2614 = vmatprep.subr.bf16.mxu1 %v4286_v18 }
 0x3e9   :  { %1278 = vmatpush1.bf16.msra.mxu0 %v3337_v13  ;;  %2615 = vmatpush3.bf16.msra.mxu1 %v3390_v32 }
 0x3ea   :  { %1279 = vmatprep.subr.bf16.mxu0 %v3343_v15  ;;  %2616 = vmatprep.subr.bf16.mxu1 %v4286_v18 }
 0x3ed   :  { %1280 = vmatpush1.bf16.msra.mxu0 %v3357_v20  ;;  %2617 = vmatpush3.bf16.msra.mxu1 %v3405_v34 }
 0x3ee   :  { %1281 = vmatprep.subr.bf16.mxu0 %v3365_v22  ;;  %2618 = vmatprep.subr.bf16.mxu1 %v4286_v18 }
 0x3f1   :  { %1282 = vmatpush1.bf16.msra.mxu0 %v3378_v29  ;;  %2619 = vmatpush3.bf16.msra.mxu1 %v3415_v35 }
 0x3f2   :  { %1283 = vmatprep.subr.bf16.mxu0 %v3384_v31  ;;  %2620 = vmatprep.subr.bf16.mxu1 %v4286_v18 }
 0x3f5   :  { %1284 = vmatpush1.bf16.msra.mxu0 %v3397_v33  ;;  %2621 = vmatpush3.bf16.msra.mxu1 %v3426_v36 }
 0x3f6   :  { %1379 = vmatprep.subr.bf16.mxu0 %v3224_v23  ;;  %2626 = vmatprep.subr.bf16.mxu1 %v4286_v18 }
 0x498   :  { %v1193_v12 = vpop.f32.mrf.mxu0  ;;  %v1234_v43 = vpop.f32.mrf.mxu1 }
 0x499   :  { %v1194_v53 = vadd.f32 %v1193_v12, %v3547_v9  ;;  %v1235_v12 = vadd.f32 %v1234_v43, %v3613_v37 }
 0x49a   :  { %v1195_v55 = vpop.f32.mrf.mxu0  ;;  %v2604_v62 = vpop.f32.mrf.mxu1 }
 0x49b   :  { %v1243_v14 = vadd.f32 %v3518_v4, %v1194_v53  ;;  %v1196_v46 = vadd.f32 %v1195_v55, %v3600_v49 }
 0x49c   :  { %v1197_v45 = vpop.f32.mrf.mxu0  ;;  %v1237_v44 = vpop.f32.mrf.mxu1 }
 0x49d   :  { %v2284_v28 = vmul.f32 -1.442695, %v1243_v14  ;;  %v1250_v3 = vadd.f32 %v3530_v27, %v1196_v46  ;;  %v3726_v14 = vpop.permute.xlu1 %373  ;;  %v411_v45 = vpop.permute.xlu0 %410 }
 0x49e   :  { %v1198_v42 = vpop.f32.mrf.mxu0  ;;  %v2605_v21 = vpop.f32.mrf.mxu1 }
 0x49f   :  { %2895 = vpow2.f32 %v2284_v28  ;;  %v2285_v26 = vmul.f32 -1.442695, %v1250_v3  ;;  %v435_v28 = vsel %vm26_vm1, %v3726_v14, %v411_v45 }
 0x4a0   :  { %v1265_v43 = vsub.f32 1.0, %v435_v28 }
 0x4a1   :  { %2897 = vpow2.f32 %v2285_v26 }
 0x4ac   :  { %v2896_v60 = vpop.eup %2895 }
 0x4ad   :  { %v1247_v41 = vadd.f32 1.0, %v2896_v60 }
 0x4ae   :  { %v2898_v51 = vpop.eup %2897 }
 0x4af   :  { %2899 = vrcp.f32 %v1247_v41  ;;  %v1254_v30 = vadd.f32 1.0, %v2898_v51 }
 0x4b1   :  { %2901 = vrcp.f32 %v1254_v30 }
 0x4bc   :  { %v2900_v4 = vpop.eup %2899 }
 0x4bd   :  { %v1257_v53 = vmul.f32 %v2900_v4, %v1235_v12 }
 0x4be   :  { %v2902_v55 = vpop.eup %2901 }
 0x4bf   :  { %v1258_v62 = vadd.f32 %v1257_v53, %v3590_v59  ;;  %v1260_v27 = vsub.f32 1.0, %v2902_v55  ;;  %v1262_v42 = vmul.f32 %v2902_v55, %v3681_v38  ;;  %v1266_v59 = vmul.f32 %v1265_v43, %v3681_v38 }
 0x4c1   :  { %2903 = vtanh.f32 %v1258_v62 }
 0x4ce   :  { %v2904_v44 = vpop.eup %2903 }
 0x4cf   :  { %v1261_v46 = vmul.f32 %v2904_v44, %v1260_v27 }
 0x4d1   :  { %v1263_v21 = vadd.f32 %v1262_v42, %v1261_v46 }
 0x4d3   :  { %v3732_v3 = vmul.f32 %v1263_v21, %v435_v28 }
 0x4d5   :  { %v3736_v26 = vadd.f32 %v1266_v59, %v3732_v3 }
 0x4d7   :  { %v1268_v60 = vpack.c.bf16 %v3736_v26, %v3736_v26 }
 0x4d9   :  { %1302 = vmatmul.mubr.bf16.vlgmr.msra.gmra.mxu0 %v1268_v60  ;;  %2623 = vmatmul.mubr.bf16.vlgmr.msra.gmra.mxu1 %v1268_v60 }
 0x4da   :  { %1380 = vmatpush1.bf16.msra.mxu0 %v3272_v48  ;;  %2627 = vmatpush3.bf16.msra.mxu1 %v3309_v1 }
 0x4db   :  { %1381 = vmatprep.subr.bf16.mxu0 %v3277_v50  ;;  %2628 = vmatprep.subr.bf16.mxu1 %v4286_v18 }
 0x4dc   :  { %1411 = vmatprep.mubr.bf16.mxu0 %v4287_v47  ;;  %2642 = vmatprep.mubr.msk.bf16.mxu1 %vm3001_vm0, %v4286_v18 }
 0x4de   :  { %1382 = vmatpush1.bf16.msra.mxu0 %v3284_v54  ;;  %2629 = vmatpush3.bf16.msra.mxu1 %v3330_v8 }
 0x4df   :  { %1383 = vmatprep.subr.bf16.mxu0 %v3292_v56  ;;  %2630 = vmatprep.subr.bf16.mxu1 %v4286_v18 }
 0x4e2   :  { %1384 = vmatpush1.bf16.msra.mxu0 %v3298_v61  ;;  %2631 = vmatpush3.bf16.msra.mxu1 %v3349_v16 }
 0x4e3   :  { %1385 = vmatprep.subr.bf16.mxu0 %v3304_v63  ;;  %2632 = vmatprep.subr.bf16.mxu1 %v4286_v18 }
 0x4e6   :  { %1386 = vmatpush1.bf16.msra.mxu0 %v3316_v5  ;;  %2633 = vmatpush3.bf16.msra.mxu1 %v3371_v24 }
 0x4e7   :  { %1387 = vmatprep.subr.bf16.mxu0 %v3324_v7  ;;  %2634 = vmatprep.subr.bf16.mxu1 %v4286_v18 }
 0x4ea   :  { %1388 = vmatpush1.bf16.msra.mxu0 %v3337_v13  ;;  %2635 = vmatpush3.bf16.msra.mxu1 %v3390_v32 }
 0x4eb   :  { %1389 = vmatprep.subr.bf16.mxu0 %v3343_v15  ;;  %2636 = vmatprep.subr.bf16.mxu1 %v4286_v18 }
 0x4ee   :  { %1390 = vmatpush1.bf16.msra.mxu0 %v3357_v20  ;;  %2637 = vmatpush3.bf16.msra.mxu1 %v3405_v34 }
 0x4ef   :  { %1391 = vmatprep.subr.bf16.mxu0 %v3365_v22  ;;  %2638 = vmatprep.subr.bf16.mxu1 %v4286_v18 }
 0x4f2   :  { %1392 = vmatpush1.bf16.msra.mxu0 %v3378_v29  ;;  %2639 = vmatpush3.bf16.msra.mxu1 %v3415_v35 }
 0x4f3   :  { %1393 = vmatprep.subr.bf16.mxu0 %v3384_v31  ;;  %2640 = vmatprep.subr.bf16.mxu1 %v4286_v18 }
 0x4f6   :  { %1394 = vmatpush1.bf16.msra.mxu0 %v3397_v33  ;;  %2641 = vmatpush3.bf16.msra.mxu1 %v3426_v36 }
 0x4f7   :  { %1489 = vmatprep.subr.bf16.mxu0 %v3224_v23  ;;  %2646 = vmatprep.subr.bf16.mxu1 %v4286_v18 }
 0x599   :  { %v1303_v38 = vpop.f32.mrf.mxu0  ;;  %v1344_v41 = vpop.f32.mrf.mxu1 }
 0x59a   :  { %v1304_v51 = vadd.f32 %v1303_v38, %v3547_v9  ;;  %v1345_v59 = vadd.f32 %v1344_v41, %v3613_v37 }
 0x59b   :  { %v1305_v30 = vpop.f32.mrf.mxu0  ;;  %v2624_v12 = vpop.f32.mrf.mxu1 }
 0x59c   :  { %v1353_v4 = vadd.f32 %v3501_v39, %v1304_v51  ;;  %v1306_v45 = vadd.f32 %v1305_v30, %v3600_v49  ;;  %v3781_v30 = vpop.permute.xlu1 %378  ;;  %v415_v12 = vpop.permute.xlu0 %414 }
 0x59d   :  { %v1307_v53 = vpop.f32.mrf.mxu0  ;;  %v1347_v62 = vpop.f32.mrf.mxu1 }
 0x59e   :  { %v2286_v55 = vmul.f32 -1.442695, %v1353_v4  ;;  %v1360_v23 = vadd.f32 %v3509_v52, %v1306_v45  ;;  %v436_v53 = vsel %vm26_vm1, %v3781_v30, %v415_v12 }
 0x59f   :  { %v1308_v27 = vpop.f32.mrf.mxu0  ;;  %v2625_v44 = vpop.f32.mrf.mxu1  ;;  %v1375_v41 = vsub.f32 1.0, %v436_v53 }
 0x5a0   :  { %2905 = vpow2.f32 %v2286_v55  ;;  %v2287_v28 = vmul.f32 -1.442695, %v1360_v23 }
 0x5a2   :  { %2907 = vpow2.f32 %v2287_v28  ;;  %v3841_v28 = vpop.permute.xlu1 %383 }
 0x5ad   :  { %v2906_v46 = vpop.eup %2905 }
 0x5ae   :  { %v1357_v42 = vadd.f32 1.0, %v2906_v46  ;;  %v419_v46 = vpop.permute.xlu0 %418 }
 0x5af   :  { %v2908_v43 = vpop.eup %2907 }
 0x5b0   :  { %2909 = vrcp.f32 %v1357_v42  ;;  %v1364_v21 = vadd.f32 1.0, %v2908_v43  ;;  %v437_v43 = vsel %vm26_vm1, %v3841_v28, %v419_v46 }
 0x5b2   :  { %2911 = vrcp.f32 %v1364_v21 }
 0x5bd   :  { %v2910_v39 = vpop.eup %2909 }
 0x5be   :  { %v1367_v60 = vmul.f32 %v2910_v39, %v1345_v59  ;;  %v1485_v39 = vsub.f32 1.0, %v437_v43 }
 0x5bf   :  { %v2912_v51 = vpop.eup %2911 }
 0x5c0   :  { %v1368_v38 = vadd.f32 %v1367_v60, %v3559_v25  ;;  %v1370_v52 = vsub.f32 1.0, %v2912_v51  ;;  %v1372_v55 = vmul.f32 %v2912_v51, %v3736_v26  ;;  %v1376_v25 = vmul.f32 %v1375_v41, %v3736_v26  ;;  %v3892_v41 = vld [vmem:[%s4265_s3 + $0x13c] ss:$12 sps:$4 sm:$0xff]  }
 0x5c2   :  { %2913 = vtanh.f32 %v1368_v38 }
 0x5cf   :  { %v2914_v4 = vpop.eup %2913 }
 0x5d0   :  { %v1371_v62 = vmul.f32 %v2914_v4, %v1370_v52  ;;  %v3858_v52 = vld [vmem:[%s4265_s3 + $0x168] ss:$12 sps:$4 sm:$0xff]   ;;  %v3864_v4 = vld [vmem:[%s4265_s3 + $0x170] ss:$12 sps:$4 sm:$0xff]  }
 0x5d2   :  { %v1373_v45 = vadd.f32 %v1372_v55, %v1371_v62  ;;  %v3880_v62 = vld [vmem:[%s4265_s3 + $0x150] ss:$12 sps:$4 sm:$0xff]   ;;  %v3886_v55 = vld [vmem:[%s4265_s3 + $0x158] ss:$12 sps:$4 sm:$0xff]  }
 0x5d4   :  { %v3787_v27 = vmul.f32 %v1373_v45, %v436_v53  ;;  %v3870_v53 = vld [vmem:[%s4265_s3 + $0x154] ss:$12 sps:$4 sm:$0xff]   ;;  %v3899_v45 = vld [vmem:[%s4265_s3 + $0x138] ss:$12 sps:$4 sm:$0xff]  }
 0x5d6   :  { %v3791_v44 = vadd.f32 %v1376_v25, %v3787_v27  ;;  %v3905_v25 = vld [vmem:[%s4265_s3 + $0x140] ss:$12 sps:$4 sm:$0xff]  }
 0x5d8   :  { %v1378_v23 = vpack.c.bf16 %v3791_v44, %v3791_v44 }
 0x5da   :  { %1412 = vmatmul.mubr.bf16.vlgmr.msra.gmra.mxu0 %v1378_v23  ;;  %2643 = vmatmul.mubr.bf16.vlgmr.msra.gmra.mxu1 %v1378_v23  ;;  %v3918_v23 = vld [vmem:[%s4265_s3 + $0x120] ss:$12 sps:$4 sm:$0xff]  }
 0x5db   :  { %1490 = vmatpush1.bf16.msra.mxu0 %v3272_v48  ;;  %2647 = vmatpush3.bf16.msra.mxu1 %v3309_v1  ;;  %v3831_v48 = vld [vmem:[%s4265_s3 + $0x16c] ss:$12 sps:$4 sm:$0xff]  }
 0x5dc   :  { %1491 = vmatprep.subr.bf16.mxu0 %v3277_v50  ;;  %2648 = vmatprep.subr.bf16.mxu1 %v4286_v18 }
 0x5dd   :  { %1521 = vmatprep.mubr.bf16.mxu0 %v4287_v47  ;;  %2662 = vmatprep.mubr.msk.bf16.mxu1 %vm3001_vm0, %v4286_v18 }
 0x5df   :  { %1492 = vmatpush1.bf16.msra.mxu0 %v3284_v54  ;;  %2649 = vmatpush3.bf16.msra.mxu1 %v3330_v8 }
 0x5e0   :  { %1493 = vmatprep.subr.bf16.mxu0 %v3292_v56  ;;  %2650 = vmatprep.subr.bf16.mxu1 %v4286_v18 }
 0x5e3   :  { %1494 = vmatpush1.bf16.msra.mxu0 %v3298_v61  ;;  %2651 = vmatpush3.bf16.msra.mxu1 %v3349_v16 }
 0x5e4   :  { %1495 = vmatprep.subr.bf16.mxu0 %v3304_v63  ;;  %2652 = vmatprep.subr.bf16.mxu1 %v4286_v18 }
 0x5e7   :  { %1496 = vmatpush1.bf16.msra.mxu0 %v3316_v5  ;;  %2653 = vmatpush3.bf16.msra.mxu1 %v3371_v24 }
 0x5e8   :  { %1497 = vmatprep.subr.bf16.mxu0 %v3324_v7  ;;  %2654 = vmatprep.subr.bf16.mxu1 %v4286_v18 }
 0x5eb   :  { %1498 = vmatpush1.bf16.msra.mxu0 %v3337_v13  ;;  %2655 = vmatpush3.bf16.msra.mxu1 %v3390_v32 }
 0x5ec   :  { %1499 = vmatprep.subr.bf16.mxu0 %v3343_v15  ;;  %2656 = vmatprep.subr.bf16.mxu1 %v4286_v18 }
 0x5ef   :  { %1500 = vmatpush1.bf16.msra.mxu0 %v3357_v20  ;;  %2657 = vmatpush3.bf16.msra.mxu1 %v3405_v34 }
 0x5f0   :  { %1501 = vmatprep.subr.bf16.mxu0 %v3365_v22  ;;  %2658 = vmatprep.subr.bf16.mxu1 %v4286_v18 }
 0x5f3   :  { %1502 = vmatpush1.bf16.msra.mxu0 %v3378_v29  ;;  %2659 = vmatpush3.bf16.msra.mxu1 %v3415_v35 }
 0x5f4   :  { %1503 = vmatprep.subr.bf16.mxu0 %v3384_v31  ;;  %2660 = vmatprep.subr.bf16.mxu1 %v4286_v18 }
 0x5f7   :  { %1504 = vmatpush1.bf16.msra.mxu0 %v3397_v33  ;;  %2661 = vmatpush3.bf16.msra.mxu1 %v3426_v36 }
 0x5f8   :  { %1599 = vmatprep.subr.bf16.mxu0 %v3831_v48  ;;  %2666 = vmatprep.subr.bf16.mxu1 %v4286_v18 }
 0x69a   :  { %v1413_v50 = vpop.f32.mrf.mxu0  ;;  %v1454_v54 = vpop.f32.mrf.mxu1 }
 0x69b   :  { %v1414_v56 = vadd.f32 %v1413_v50, %v3547_v9  ;;  %v1455_v33 = vadd.f32 %v1454_v54, %v3613_v37  ;;  %v3924_v50 = vld [vmem:[%s4265_s3 + $0x128] ss:$12 sps:$4 sm:$0xff]   ;;  %v3930_v54 = vld [vmem:[%s4265_s3 + $0x10c] ss:$12 sps:$4 sm:$0xff]  }
 0x69c   :  { %v1415_v61 = vpop.f32.mrf.mxu0  ;;  %v2644_v63 = vpop.f32.mrf.mxu1 }
 0x69d   :  { %v1463_v1 = vadd.f32 %v3505_v40, %v1414_v56  ;;  %v1416_v13 = vadd.f32 %v1415_v61, %v3600_v49  ;;  %v3937_v56 = vld [vmem:[%s4265_s3 + $0x108] ss:$12 sps:$4 sm:$0xff]   ;;  %v3943_v61 = vld [vmem:[%s4265_s3 + $0x110] ss:$12 sps:$4 sm:$0xff]  }
 0x69e   :  { %v1417_v5 = vpop.f32.mrf.mxu0  ;;  %v1457_v7 = vpop.f32.mrf.mxu1  ;;  %v3949_v63 = vld [vmem:[%s4265_s3 + $0xf4] ss:$12 sps:$4 sm:$0xff]  }
 0x69f   :  { %v2288_v8 = vmul.f32 -1.442695, %v1463_v1  ;;  %v1470_v20 = vadd.f32 %v3513_v58, %v1416_v13  ;;  %v3956_v1 = vld [vmem:[%s4265_s3 + $0xf0] ss:$12 sps:$4 sm:$0xff]   ;;  %v3962_v5 = vld [vmem:[%s4265_s3 + $0xf8] ss:$12 sps:$4 sm:$0xff]  }
 0x6a0   :  { %v1418_v15 = vpop.f32.mrf.mxu0  ;;  %v2645_v16 = vpop.f32.mrf.mxu1  ;;  %v3968_v7 = vld [vmem:[%s4265_s3 + $0xdc] ss:$12 sps:$4 sm:$0xff]   ;;  %v3981_v13 = vld [vmem:[%s4265_s3 + $0xe0] ss:$12 sps:$4 sm:$0xff]  }
 0x6a1   :  { %2915 = vpow2.f32 %v2288_v8  ;;  %v2289_v22 = vmul.f32 -1.442695, %v1470_v20  ;;  %v3975_v8 = vld [vmem:[%s4265_s3 + $0xd8] ss:$12 sps:$4 sm:$0xff]   ;;  %v3994_v16 = vld [vmem:[%s4265_s3 + $0xc0] ss:$12 sps:$4 sm:$0xff]  }
 0x6a2   :  { %v3987_v15 = vld [vmem:[%s4265_s3 + $0xc4] ss:$12 sps:$4 sm:$0xff]  }
 0x6a3   :  { %2917 = vpow2.f32 %v2289_v22 }
 0x6ae   :  { %v2916_v24 = vpop.eup %2915 }
 0x6af   :  { %v1467_v29 = vadd.f32 1.0, %v2916_v24 }
 0x6b0   :  { %v2918_v31 = vpop.eup %2917 }
 0x6b1   :  { %2919 = vrcp.f32 %v1467_v29  ;;  %v1474_v32 = vadd.f32 1.0, %v2918_v31 }
 0x6b3   :  { %2921 = vrcp.f32 %v1474_v32 }
 0x6be   :  { %v2920_v34 = vpop.eup %2919 }
 0x6bf   :  { %v1477_v35 = vmul.f32 %v2920_v34, %v1455_v33 }
 0x6c0   :  { %v2922_v26 = vpop.eup %2921 }
 0x6c1   :  { %v1478_v40 = vadd.f32 %v1477_v35, %v3563_v19  ;;  %v1480_v58 = vsub.f32 1.0, %v2922_v26  ;;  %v1482_v59 = vmul.f32 %v2922_v26, %v3791_v44  ;;  %v1486_v19 = vmul.f32 %v1485_v39, %v3791_v44  ;;  %v3911_v44 = vld [vmem:[%s4265_s3 + $0x124] ss:$12 sps:$4 sm:$0xff]  }
 0x6c3   :  { %2923 = vtanh.f32 %v1478_v40 }
 0x6d0   :  { %v2924_v42 = vpop.eup %2923 }
 0x6d1   :  { %v1481_v21 = vmul.f32 %v2924_v42, %v1480_v58 }
 0x6d3   :  { %v1483_v60 = vadd.f32 %v1482_v59, %v1481_v21 }
 0x6d5   :  { %v3847_v38 = vmul.f32 %v1483_v60, %v437_v43 }
 0x6d7   :  { %v3851_v51 = vadd.f32 %v1486_v19, %v3847_v38  ;;  %v4289_v19 = vld [vmem:[#allocation9_spill] sm:$0xff] }
 0x6d9   :  { %v1488_v12 = vpack.c.bf16 %v3851_v51, %v3851_v51 }
 0x6db   :  { %1522 = vmatmul.mubr.bf16.vlgmr.msra.gmra.mxu0 %v1488_v12  ;;  %2663 = vmatmul.mubr.bf16.vlgmr.msra.gmra.mxu1 %v1488_v12 }
 0x6dc   :  { %1600 = vmatpush1.bf16.msra.mxu0 %v3858_v52  ;;  %2667 = vmatpush3.bf16.msra.mxu1 %v3864_v4 }
 0x6dd   :  { %1601 = vmatprep.subr.bf16.mxu0 %v3870_v53  ;;  %2668 = vmatprep.subr.bf16.mxu1 %v4286_v18 }
 0x6de   :  { %1631 = vmatprep.mubr.bf16.mxu0 %v4287_v47  ;;  %2682 = vmatprep.mubr.msk.bf16.mxu1 %vm3001_vm0, %v4286_v18 }
 0x6e0   :  { %1602 = vmatpush1.bf16.msra.mxu0 %v3880_v62  ;;  %2669 = vmatpush3.bf16.msra.mxu1 %v3886_v55 }
 0x6e1   :  { %1603 = vmatprep.subr.bf16.mxu0 %v3892_v41  ;;  %2670 = vmatprep.subr.bf16.mxu1 %v4286_v18 }
 0x6e4   :  { %1604 = vmatpush1.bf16.msra.mxu0 %v3899_v45  ;;  %2671 = vmatpush3.bf16.msra.mxu1 %v3905_v25 }
 0x6e5   :  { %1605 = vmatprep.subr.bf16.mxu0 %v3911_v44  ;;  %2672 = vmatprep.subr.bf16.mxu1 %v4286_v18 }
 0x6e8   :  { %1606 = vmatpush1.bf16.msra.mxu0 %v3918_v23  ;;  %2673 = vmatpush3.bf16.msra.mxu1 %v3924_v50 }
 0x6e9   :  { %1607 = vmatprep.subr.bf16.mxu0 %v3930_v54  ;;  %2674 = vmatprep.subr.bf16.mxu1 %v4286_v18 }
 0x6ec   :  { %1608 = vmatpush1.bf16.msra.mxu0 %v3937_v56  ;;  %2675 = vmatpush3.bf16.msra.mxu1 %v3943_v61 }
 0x6ed   :  { %1609 = vmatprep.subr.bf16.mxu0 %v3949_v63  ;;  %2676 = vmatprep.subr.bf16.mxu1 %v4286_v18 }
 0x6f0   :  { %1610 = vmatpush1.bf16.msra.mxu0 %v3956_v1  ;;  %2677 = vmatpush3.bf16.msra.mxu1 %v3962_v5 }
 0x6f1   :  { %1611 = vmatprep.subr.bf16.mxu0 %v3968_v7  ;;  %2678 = vmatprep.subr.bf16.mxu1 %v4286_v18 }
 0x6f4   :  { %1612 = vmatpush1.bf16.msra.mxu0 %v3975_v8  ;;  %2679 = vmatpush3.bf16.msra.mxu1 %v3981_v13 }
 0x6f5   :  { %1613 = vmatprep.subr.bf16.mxu0 %v3987_v15  ;;  %2680 = vmatprep.subr.bf16.mxu1 %v4286_v18 }
 0x6f8   :  { %1614 = vmatpush1.bf16.msra.mxu0 %v3994_v16  ;;  %2681 = vmatpush3.bf16.msra.mxu1 %v3426_v36  ;;  %v4288_v36 = vld [vmem:[#allocation3_spill] sm:$0xff] }
 0x6f9   :  { %1709 = vmatprep.subr.bf16.mxu0 %v3831_v48  ;;  %2686 = vmatprep.subr.bf16.mxu1 %v4286_v18 }
 0x79b   :  { %v1523_v20 = vpop.f32.mrf.mxu0  ;;  %v1564_v22 = vpop.f32.mrf.mxu1 }
 0x79c   :  { %v1524_v24 = vadd.f32 %v1523_v20, %v3547_v9  ;;  %v1565_v39 = vadd.f32 %v1564_v22, %v3613_v37 }
 0x79d   :  { %v1525_v29 = vpop.f32.mrf.mxu0  ;;  %v2664_v31 = vpop.f32.mrf.mxu1 }
 0x79e   :  { %v1573_v32 = vadd.f32 %v3522_v11, %v1524_v24  ;;  %v1526_v40 = vadd.f32 %v1525_v29, %v3600_v49  ;;  %v4006_v24 = vpop.permute.xlu1 %388  ;;  %v423_v29 = vpop.permute.xlu0 %422 }
 0x79f   :  { %v1527_v33 = vpop.f32.mrf.mxu0  ;;  %v1567_v34 = vpop.f32.mrf.mxu1 }
 0x7a0   :  { %v2290_v35 = vmul.f32 -1.442695, %v1573_v32  ;;  %v1580_v48 = vadd.f32 %v4288_v36, %v1526_v40  ;;  %v438_v33 = vsel %vm26_vm1, %v4006_v24, %v423_v29  ;;  %v4017_v36 = vsel %vm26_vm1, %v3787_v27, %v3847_v38 }
 0x7a1   :  { %v1528_v26 = vpop.f32.mrf.mxu0  ;;  %v2665_v46 = vpop.f32.mrf.mxu1  ;;  %v1595_v22 = vsub.f32 1.0, %v438_v33 }
 0x7a2   :  { %2925 = vpow2.f32 %v2290_v35  ;;  %v2291_v58 = vmul.f32 -1.442695, %v1580_v48 }
 0x7a3   :  { %v1596_v46 = vmul.f32 %v1595_v22, %v3851_v51 }
 0x7a4   :  { %2927 = vpow2.f32 %v2291_v58 }
 0x7af   :  { %v2926_v42 = vpop.eup %2925 }
 0x7b0   :  { %v1577_v43 = vadd.f32 1.0, %v2926_v42  ;;  %v4030_v42 = vsel %vm26_vm1, %v3847_v38, %v3787_v27 }
 0x7b1   :  { %v2928_v21 = vpop.eup %2927 }
 0x7b2   :  { %2929 = vrcp.f32 %v1577_v43  ;;  %v1584_v59 = vadd.f32 1.0, %v2928_v21 }
 0x7b4   :  { %2931 = vrcp.f32 %v1584_v59 }
 0x7bf   :  { %v2930_v11 = vpop.eup %2929 }
 0x7c0   :  { %v1587_v60 = vmul.f32 %v2930_v11, %v1565_v39  ;;  %v4085_v11 = vpop.permute.xlu1 %393 }
 0x7c1   :  { %v2932_v20 = vpop.eup %2931 }
 0x7c2   :  { %v1588_v12 = vadd.f32 %v1587_v60, %v4289_v19  ;;  %v1590_v31 = vsub.f32 1.0, %v2932_v20  ;;  %v1592_v35 = vmul.f32 %v2932_v20, %v3851_v51  ;;  %v427_v60 = vpop.permute.xlu0 %426 }
 0x7c3   :  { %v439_v20 = vsel %vm26_vm1, %v4085_v11, %v427_v60 }
 0x7c4   :  { %2933 = vtanh.f32 %v1588_v12 }
 0x7d1   :  { %v2934_v32 = vpop.eup %2933 }
 0x7d2   :  { %v1591_v34 = vmul.f32 %v2934_v32, %v1590_v31  ;;  %v1705_v32 = vsub.f32 1.0, %v439_v20 }
 0x7d4   :  { %v1593_v40 = vadd.f32 %v1592_v35, %v1591_v34 }
 0x7d6   :  { %v1594_v26 = vmul.f32 %v1593_v40, %v438_v33 }
 0x7d8   :  { %v4019_v48 = vadd.f32 %v1596_v46, %v1594_v26  ;;  %v4024_v58 = vsel %vm26_vm1, %v3732_v3, %v1594_v26  ;;  %v4035_v51 = vsel %vm26_vm1, %v1594_v26, %v3732_v3  ;;  %v2859_v26 = vld [vmem:[%s4263_s2 + $0xb8] sm:$0xff]   ;;  %v2860_v46 = vld [vmem:[%s4263_s2 + $0xb0] sm:$0xff]  }
 0x7d9   :  { %v1824_v43 = vpack.c.bf16 %v4017_v36, %v4024_v58  ;;  %v1825_v21 = vpack.c.bf16 %v4035_v51, %v4030_v42  ;;  %v2874_v36 = vld [vmem:[%s4268_s4] sm:$0xff]  }
 0x7da   :  { %v1598_v59 = vpack.c.bf16 %v4019_v48, %v4019_v48  ;;  %v1706_v35 = vmul.f32 %v1705_v32, %v4019_v48  ;;  %v77_v42 = vld [vmem:[%s4266_s5 + $0x2] ss:$0 sm:$0xff] }
 0x7dc   :  { %1632 = vmatmul.mubr.bf16.vlgmr.msra.gmra.mxu0 %v1598_v59  ;;  %2683 = vmatmul.mubr.bf16.vlgmr.msra.gmra.mxu1 %v1598_v59  ;;  %v2862_v59 = vld [vmem:[%s4263_s2 + $0xa0] sm:$0xff]  }
 0x7dd   :  { %1710 = vmatpush1.bf16.msra.mxu0 %v3858_v52  ;;  %2687 = vmatpush3.bf16.msra.mxu1 %v3864_v4 }
 0x7de   :  { %1711 = vmatprep.subr.bf16.mxu0 %v3870_v53  ;;  %2688 = vmatprep.subr.bf16.mxu1 %v4286_v18  ;;  %v4290_v53 = vld [vmem:[#allocation5_spill] sm:$0xff] }
 0x7df   :  { %1741 = vmatprep.mubr.bf16.mxu0 %v4287_v47  ;;  %2702 = vmatprep.mubr.msk.bf16.mxu1 %vm3001_vm0, %v4286_v18  ;;  %v2998_v47 = vld [vmem:[%s4265_s3 + $0xc8] ss:$12 sps:$4 sm:$0xff]  }
 0x7e1   :  { %1712 = vmatpush1.bf16.msra.mxu0 %v3880_v62  ;;  %2689 = vmatpush3.bf16.msra.mxu1 %v3886_v55 }
 0x7e2   :  { %1713 = vmatprep.subr.bf16.mxu0 %v3892_v41  ;;  %2690 = vmatprep.subr.bf16.mxu1 %v4286_v18 }
 0x7e5   :  { %1714 = vmatpush1.bf16.msra.mxu0 %v3899_v45  ;;  %2691 = vmatpush3.bf16.msra.mxu1 %v3905_v25 }
 0x7e6   :  { %1715 = vmatprep.subr.bf16.mxu0 %v3911_v44  ;;  %2692 = vmatprep.subr.bf16.mxu1 %v4286_v18 }
 0x7e9   :  { %1716 = vmatpush1.bf16.msra.mxu0 %v3918_v23  ;;  %2693 = vmatpush3.bf16.msra.mxu1 %v3924_v50  ;;  %v4291_v50 = vld [vmem:[#allocation6_spill] sm:$0xff] }
 0x7ea   :  { %1717 = vmatprep.subr.bf16.mxu0 %v3930_v54  ;;  %2694 = vmatprep.subr.bf16.mxu1 %v4286_v18 }
 0x7ed   :  { %1718 = vmatpush1.bf16.msra.mxu0 %v3937_v56  ;;  %2695 = vmatpush3.bf16.msra.mxu1 %v3943_v61 }
 0x7ee   :  { %1719 = vmatprep.subr.bf16.mxu0 %v3949_v63  ;;  %2696 = vmatprep.subr.bf16.mxu1 %v4286_v18 }
 0x7f1   :  { %1720 = vmatpush1.bf16.msra.mxu0 %v3956_v1  ;;  %2697 = vmatpush3.bf16.msra.mxu1 %v3962_v5 }
 0x7f2   :  { %1721 = vmatprep.subr.bf16.mxu0 %v3968_v7  ;;  %2698 = vmatprep.subr.bf16.mxu1 %v4286_v18 }
 0x7f5   :  { %1722 = vmatpush1.bf16.msra.mxu0 %v3975_v8  ;;  %2699 = vmatpush3.bf16.msra.mxu1 %v3981_v13 }
 0x7f6   :  { %1723 = vmatprep.subr.bf16.mxu0 %v3987_v15  ;;  %2700 = vmatprep.subr.bf16.mxu1 %v4286_v18  ;;  %v4292_v15 = vld [vmem:[#allocation4_spill] sm:$0xff] }
 0x7f9   :  { %1724 = vmatpush1.bf16.msra.mxu0 %v3994_v16  ;;  %2701 = vmatpush3.bf16.msra.mxu1 %v2998_v47  ;;  %v2863_v47 = vld [vmem:[%s4263_s2 + $0x98] sm:$0xff]  }
 0x7fa   :  { %2730 = vmatprep.subr.bf16.mxu1 %v4286_v18  ;;  %2706 = vmatprep.subr.bf16.mxu0 %v2859_v26 }
 0x89c   :  { %v1633_v3 = vpop.f32.mrf.mxu0  ;;  %v1674_v27 = vpop.f32.mrf.mxu1 }
 0x89d   :  { %v1634_v38 = vadd.f32 %v1633_v3, %v3547_v9  ;;  %v1675_v7 = vadd.f32 %v1674_v27, %v3613_v37  ;;  %v2864_v3 = vld [vmem:[%s4263_s2 + $0x90] sm:$0xff]   ;;  %v2865_v27 = vld [vmem:[%s4263_s2 + $0x88] sm:$0xff]  }
 0x89e   :  { %v1635_v52 = vpop.f32.mrf.mxu0  ;;  %v2684_v4 = vpop.f32.mrf.mxu1 }
 0x89f   :  { %v1683_v62 = vadd.f32 %v4290_v53, %v1634_v38  ;;  %v1636_v25 = vadd.f32 %v1635_v52, %v3600_v49  ;;  %v2866_v38 = vld [vmem:[%s4263_s2 + $0x80] sm:$0xff]   ;;  %v2867_v52 = vld [vmem:[%s4268_s4 + $0x38] sm:$0xff]   ;;  %v2868_v4 = vld [vmem:[%s4268_s4 + $0x30] sm:$0xff]  }
 0x8a0   :  { %v1637_v55 = vpop.f32.mrf.mxu0  ;;  %v1677_v41 = vpop.f32.mrf.mxu1  ;;  %v2869_v53 = vld [vmem:[%s4268_s4 + $0x28] sm:$0xff]  }
 0x8a1   :  { %v2292_v45 = vmul.f32 -1.442695, %v1683_v62  ;;  %v1690_v54 = vadd.f32 %v4291_v50, %v1636_v25  ;;  %v2870_v62 = vld [vmem:[%s4268_s4 + $0x20] sm:$0xff]   ;;  %v2871_v55 = vld [vmem:[%s4268_s4 + $0x18] sm:$0xff]   ;;  %v4293_v50 = vld [vmem:[#allocation8_spill] sm:$0xff] }
 0x8a2   :  { %v1638_v44 = vpop.f32.mrf.mxu0  ;;  %v2685_v23 = vpop.f32.mrf.mxu1 }
 0x8a3   :  { %2935 = vpow2.f32 %v2292_v45  ;;  %v2293_v56 = vmul.f32 -1.442695, %v1690_v54 }
 0x8a5   :  { %2937 = vpow2.f32 %v2293_v56 }
 0x8b0   :  { %v2936_v61 = vpop.eup %2935 }
 0x8b1   :  { %v1687_v63 = vadd.f32 1.0, %v2936_v61 }
 0x8b2   :  { %v2938_v1 = vpop.eup %2937 }
 0x8b3   :  { %2939 = vrcp.f32 %v1687_v63  ;;  %v1694_v5 = vadd.f32 1.0, %v2938_v1 }
 0x8b5   :  { %2941 = vrcp.f32 %v1694_v5 }
 0x8c0   :  { %v2940_v8 = vpop.eup %2939 }
 0x8c1   :  { %v1697_v13 = vmul.f32 %v2940_v8, %v1675_v7 }
 0x8c2   :  { %v2942_v39 = vpop.eup %2941 }
 0x8c3   :  { %v1698_v16 = vadd.f32 %v1697_v13, %v4292_v15  ;;  %v1700_v19 = vsub.f32 1.0, %v2942_v39  ;;  %v1702_v31 = vmul.f32 %v2942_v39, %v4019_v48  ;;  %v2861_v48 = vld [vmem:[%s4263_s2 + $0xa8] sm:$0xff]  }
 0x8c5   :  { %2943 = vtanh.f32 %v1698_v16 }
 0x8d2   :  { %v2944_v12 = vpop.eup %2943 }
 0x8d3   :  { %v1701_v29 = vmul.f32 %v2944_v12, %v1700_v19 }
 0x8d5   :  { %v1703_v33 = vadd.f32 %v1702_v31, %v1701_v29 }
 0x8d7   :  { %v4091_v34 = vmul.f32 %v1703_v33, %v439_v20  ;;  %v4294_v20 = vld [vmem:[#allocation7_spill] sm:$0xff]  ;;  %v4151_v33 = vpop.permute.xlu1 %398 }
 0x8d9   :  { %v4095_v22 = vadd.f32 %v1706_v35, %v4091_v34 }
 0x8db   :  { %v1708_v40 = vpack.c.bf16 %v4095_v22, %v4095_v22 }
 0x8dd   :  { %1742 = vmatmul.mubr.bf16.vlgmr.msra.gmra.mxu0 %v1708_v40  ;;  %2703 = vmatmul.mubr.bf16.vlgmr.msra.gmra.mxu1 %v1708_v40 }
 0x8de   :  { %2746 = vmatprep.mubr.msk.bf16.mxu1 %vm3001_vm0, %v4286_v18  ;;  %2707 = vmatpush3.bf16.msra.mxu0 %v2859_v26 }
 0x8df   :  { %2708 = vmatprep.subr.bf16.mxu0 %v2860_v46  ;;  %2731 = vmatpush3.bf16.msra.mxu1 %v2867_v52 }
 0x8e0   :  { %2732 = vmatprep.subr.bf16.mxu1 %v4286_v18 }
 0x8e2   :  { %2709 = vmatpush3.bf16.msra.mxu0 %v2860_v46 }
 0x8e3   :  { %2710 = vmatprep.subr.bf16.mxu0 %v2861_v48  ;;  %2733 = vmatpush3.bf16.msra.mxu1 %v2868_v4 }
 0x8e4   :  { %2734 = vmatprep.subr.bf16.mxu1 %v4286_v18 }
 0x8e6   :  { %2711 = vmatpush3.bf16.msra.mxu0 %v2861_v48 }
 0x8e7   :  { %2712 = vmatprep.subr.bf16.mxu0 %v2862_v59  ;;  %2735 = vmatpush3.bf16.msra.mxu1 %v2869_v53 }
 0x8e8   :  { %2736 = vmatprep.subr.bf16.mxu1 %v4286_v18 }
 0x8ea   :  { %2713 = vmatpush3.bf16.msra.mxu0 %v2862_v59  ;;  %v1816_v59 = vsel %vm26_vm1, %v3678_v57, %v4091_v34 }
 0x8eb   :  { %2714 = vmatprep.subr.bf16.mxu0 %v2863_v47  ;;  %2737 = vmatpush3.bf16.msra.mxu1 %v2870_v62 }
 0x8ec   :  { %2738 = vmatprep.subr.bf16.mxu1 %v4286_v18 }
 0x8ee   :  { %2715 = vmatpush3.bf16.msra.mxu0 %v2863_v47 }
 0x8ef   :  { %2716 = vmatprep.subr.bf16.mxu0 %v2864_v3  ;;  %2739 = vmatpush3.bf16.msra.mxu1 %v2871_v55 }
 0x8f0   :  { %2740 = vmatprep.subr.bf16.mxu1 %v4286_v18 }
 0x8f2   :  { %2717 = vmatpush3.bf16.msra.mxu0 %v2864_v3 }
 0x8f3   :  { %2718 = vmatprep.subr.bf16.mxu0 %v2865_v27 }
 0x8f6   :  { %2719 = vmatpush3.bf16.msra.mxu0 %v2865_v27 }
 0x8f7   :  { %2720 = vmatprep.subr.bf16.mxu0 %v2866_v38 }
 0x8fa   :  { %2721 = vmatpush3.bf16.msra.mxu0 %v2866_v38 }
 0x99d   :  { %v1743_v41 = vpop.f32.mrf.mxu0  ;;  %v1784_v45 = vpop.f32.mrf.mxu1 }
 0x99e   :  { %v1744_v25 = vadd.f32 %v1743_v41, %v3547_v9  ;;  %v1785_v60 = vadd.f32 %v1784_v45, %v3613_v37 }
 0x99f   :  { %v1745_v44 = vpop.f32.mrf.mxu0  ;;  %v2704_v23 = vpop.f32.mrf.mxu1 }
 0x9a0   :  { %v1793_v54 = vadd.f32 %v4293_v50, %v1744_v25  ;;  %v1746_v1 = vadd.f32 %v1745_v44, %v3600_v49 }
 0x9a1   :  { %v1747_v56 = vpop.f32.mrf.mxu0  ;;  %v1787_v61 = vpop.f32.mrf.mxu1 }
 0x9a2   :  { %v2294_v63 = vmul.f32 -1.442695, %v1793_v54  ;;  %v1800_v8 = vadd.f32 %v3606_v2, %v1746_v1  ;;  %v431_v2 = vpop.permute.xlu0 %430 }
 0x9a3   :  { %v1748_v5 = vpop.f32.mrf.mxu0  ;;  %v2705_v7 = vpop.f32.mrf.mxu1  ;;  %v440_v37 = vsel %vm26_vm1, %v4151_v33, %v431_v2 }
 0x9a4   :  { %2945 = vpow2.f32 %v2294_v63  ;;  %v2295_v13 = vmul.f32 -1.442695, %v1800_v8 }
 0x9a6   :  { %2947 = vpow2.f32 %v2295_v13 }
 0x9b1   :  { %v2946_v15 = vpop.eup %2945 }
 0x9b2   :  { %v1797_v16 = vadd.f32 1.0, %v2946_v15 }
 0x9b3   :  { %v2948_v9 = vpop.eup %2947 }
 0x9b4   :  { %2949 = vrcp.f32 %v1797_v16  ;;  %v1804_v39 = vadd.f32 1.0, %v2948_v9 }
 0x9b6   :  { %2951 = vrcp.f32 %v1804_v39 }
 0x9c1   :  { %v2950_v19 = vpop.eup %2949 }
 0x9c2   :  { %v1807_v12 = vmul.f32 %v2950_v19, %v1785_v60 }
 0x9c3   :  { %v2952_v49 = vpop.eup %2951 }
 0x9c4   :  { %v1808_v29 = vadd.f32 %v1807_v12, %v4294_v20  ;;  %v1810_v31 = vsub.f32 1.0, %v2952_v49  ;;  %v1812_v40 = vmul.f32 %v2952_v49, %v4095_v22  ;;  %v1821_v22 = vsel %vm26_vm1, %v4091_v34, %v3678_v57  ;;  %v2872_v57 = vld [vmem:[%s4268_s4 + $0x10] sm:$0xff]  }
 0x9c5   :  { %2741 = vmatpush3.bf16.msra.mxu1 %v2872_v57  ;;  %v3005_v49 = vmov 32  }
 0x9c6   :  { %2953 = vtanh.f32 %v1808_v29  ;;  %2742 = vmatprep.subr.bf16.mxu1 %v4286_v18  ;;  %2777 = vset.pattern.permute.xlu1 %v3005_v49 }
 0x9c7   :  { %2778 = vset.pattern.permute.xlu0 %v3005_v49 }
 0x9d3   :  { %v2954_v32 = vpop.eup %2953 }
 0x9d4   :  { %v1811_v35 = vmul.f32 %v2954_v32, %v1810_v31 }
 0x9d6   :  { %v1813_v26 = vadd.f32 %v1812_v40, %v1811_v35 }
 0x9d8   :  { %v1814_v46 = vmul.f32 %v1813_v26, %v440_v37  ;;  %v78_v37 = vld [vmem:[%s4266_s5 + $0x3] ss:$0 sm:$0xff] }
 0x9da   :  { %v1815_v48 = vsel %vm26_vm1, %v3623_v6, %v1814_v46  ;;  %v1822_v47 = vsel %vm26_vm1, %v1814_v46, %v3623_v6  ;;  %v2873_v6 = vld [vmem:[%s4268_s4 + $0x8] sm:$0xff]  }
 0x9db   :  { %v1823_v3 = vpack.c.bf16 %v1816_v59, %v1815_v48  ;;  %v1826_v27 = vpack.c.bf16 %v1822_v47, %v1821_v22  ;;  %2743 = vmatpush3.bf16.msra.mxu1 %v2873_v6 }
 0x9dc   :  { %2744 = vmatprep.subr.bf16.mxu1 %v4286_v18 }
 0x9dd   :  { %2722 = vmatprep.mubr.bf16.mxu0 %v1823_v3 }
 0x9de   :  { %2723 = vmatmul.mubr.bf16.vlgmr.msra.gmra.mxu0 %v1824_v43  ;;  %v2999_v43 = vld [vmem:[%s4266_s5 + $0x1] ss:$0 sm:$0xff] }
 0x9df   :  { %2726 = vmatprep.mubr.bf16.mxu0 %v1825_v21  ;;  %2745 = vmatpush3.bf16.msra.mxu1 %v2874_v36  ;;  %v4295_v21 = vld [vmem:[#allocation2_spill] sm:$0xff] }
 0x9e0   :  { %v333_v34 = vadd.f32 %v2999_v43, %v4295_v21 }
 0x9e2   :  { %v346_v62 = vmax.f32 %v333_v34, 0.0 }
 0x9e6   :  { %2727 = vmatmul.mubr.bf16.gmra.mxu0 %v1826_v27 }
 0xa9e   :  { %v2724_v58 = vpop.f32.mrf.mxu0 }
 0xa9f   :  { %v1918_v55 = vadd.f32 %v2724_v58, %v77_v42 }
 0xaa0   :  { %v1909_v51 = vpop.f32.mrf.mxu0 }
 0xaa1   :  { %v1910_v38 = vadd.f32 %v1909_v51, %v77_v42  ;;  %v1942_v54 = vmax.f32 %v1918_v55, 0.0 }
 0xaa2   :  { %v2725_v52 = vpop.f32.mrf.mxu0 }
 0xaa3   :  { %v1940_v4 = vmax.f32 %v1910_v38, 0.0  ;;  %v1950_v63 = vmul.f32 %v1942_v54, %v3726_v14  ;;  %v1921_v1 = vadd.f32 %v2725_v52, %v77_v42 }
 0xaa4   :  { %v1912_v53 = vpop.f32.mrf.mxu0 }
 0xaa5   :  { %v1948_v41 = vmul.f32 %v1940_v4, %v3618_v0  ;;  %v1913_v45 = vadd.f32 %v1912_v53, %v77_v42  ;;  %v1943_v8 = vmax.f32 %v1921_v1, 0.0 }
 0xaa6   :  { %v2728_v25 = vpop.f32.mrf.mxu0 }
 0xaa7   :  { %v2313_v44 = vpack.c.bf16 %v1948_v41, %v346_v62  ;;  %v1941_v23 = vmax.f32 %v1913_v45, 0.0  ;;  %v1951_v16 = vmul.f32 %v1943_v8, %v3781_v30  ;;  %v1934_v9 = vadd.f32 %v2728_v25, %v77_v42 }
 0xaa8   :  { %v1925_v50 = vpop.f32.mrf.mxu0 }
 0xaa9   :  { %2747 = vmatmul.mubr.msk.bf16.vlgmr.msra.gmra.mxu1 %vm2312_vm4, %v2313_v44  ;;  %v1949_v56 = vmul.f32 %v1941_v23, %v3671_v17  ;;  %v1926_v10 = vadd.f32 %v1925_v50, %v77_v42  ;;  %v1946_v60 = vmax.f32 %v1934_v9, 0.0 }
 0xaaa   :  { %2750 = vmatprep.mubr.msk.bf16.mxu1 %vm3001_vm0, %v4286_v18  ;;  %v2729_v61 = vpop.f32.mrf.mxu0 }
 0xaab   :  { %v1944_v0 = vmax.f32 %v1926_v10, 0.0  ;;  %v1957_v5 = vpack.c.bf16 %v1950_v63, %v1949_v56  ;;  %v1937_v14 = vadd.f32 %v2729_v61, %v77_v42  ;;  %v1954_v12 = vmul.f32 %v1946_v60, %v4085_v11 }
 0xaac   :  { %v1928_v7 = vpop.f32.mrf.mxu0 }
 0xaad   :  { %v1952_v13 = vmul.f32 %v1944_v0, %v3841_v28  ;;  %v1929_v15 = vadd.f32 %v1928_v7, %v77_v42  ;;  %v1947_v20 = vmax.f32 %v1937_v14, 0.0 }
 0xaaf   :  { %v1945_v17 = vmax.f32 %v1929_v15, 0.0  ;;  %v1958_v39 = vpack.c.bf16 %v1952_v13, %v1951_v16  ;;  %v1955_v30 = vmul.f32 %v1947_v20, %v4151_v33 }
 0xab1   :  { %2751 = vmatmul.mubr.bf16.gmra.mxu1 %v1957_v5  ;;  %v1953_v19 = vmul.f32 %v1945_v17, %v4006_v24  ;;  %v1960_v28 = vpack.c.bf16 %v1955_v30, %v1955_v30 }
 0xab2   :  { %2754 = vmatprep.mubr.msk.bf16.mxu1 %vm3001_vm0, %v4286_v18 }
 0xab3   :  { %v1959_v29 = vpack.c.bf16 %v1954_v12, %v1953_v19 }
 0xab9   :  { %2755 = vmatmul.mubr.bf16.gmra.mxu1 %v1958_v39 }
 0xaba   :  { %2758 = vmatprep.mubr.msk.bf16.mxu1 %vm3001_vm0, %v4286_v18 }
 0xac1   :  { %2759 = vmatmul.mubr.bf16.gmra.mxu1 %v1959_v29 }
 0xac2   :  { %2762 = vmatprep.mubr.msk.bf16.mxu1 %vm3001_vm0, %v4286_v18 }
 0xac9   :  { %2763 = vmatmul.mubr.bf16.gmra.mxu1 %v1960_v28 }
 0xb69   :  { %v2059_v31 = vpop.f32.mrf.mxu1 }
 0xb6a   :  { %v4217_v48 = vadd.f32 %v2059_v31, %v78_v37 }
 0xb6b   :  { %v2748_v32 = vpop.f32.mrf.mxu1 }
 0xb6d   :  { %v2062_v2 = vpop.f32.mrf.mxu1 }
 0xb6e   :  { %v4215_v46 = vadd.f32 %v2062_v2, %v78_v37 }
 0xb6f   :  { %v2749_v35 = vpop.f32.mrf.mxu1 }
 0xb70   :  { %v2097_v47 = vmax.f32 %v4217_v48, %v4215_v46 }
 0xb71   :  { %v2067_v24 = vpop.f32.mrf.mxu1 }
 0xb72   :  { %v4219_v59 = vadd.f32 %v2067_v24, %v78_v37 }
 0xb73   :  { %v2752_v40 = vpop.f32.mrf.mxu1 }
 0xb74   :  { %v2098_v57 = vmax.f32 %v2097_v47, %v4219_v59 }
 0xb75   :  { %v2070_v11 = vpop.f32.mrf.mxu1 }
 0xb76   :  { %v4223_v3 = vadd.f32 %v2070_v11, %v78_v37 }
 0xb77   :  { %v2753_v26 = vpop.f32.mrf.mxu1 }
 0xb78   :  { %v2099_v58 = vmax.f32 %v2098_v57, %v4223_v3 }
 0xb79   :  { %v2075_v18 = vpop.f32.mrf.mxu1 }
 0xb7a   :  { %v4226_v6 = vadd.f32 %v2075_v18, %v78_v37 }
 0xb7b   :  { %v2756_v33 = vpop.f32.mrf.mxu1 }
 0xb7c   :  { %v2100_v43 = vmax.f32 %v2099_v58, %v4226_v6 }
 0xb7d   :  { %v2078_v22 = vpop.f32.mrf.mxu1 }
 0xb7e   :  { %v4229_v42 = vadd.f32 %v2078_v22, %v78_v37 }
 0xb7f   :  { %v2757_v27 = vpop.f32.mrf.mxu1 }
 0xb80   :  { %v2101_v38 = vmax.f32 %v2100_v43, %v4229_v42 }
 0xb81   :  { %v2083_v36 = vpop.f32.mrf.mxu1 }
 0xb82   :  { %v4232_v21 = vadd.f32 %v2083_v36, %v78_v37 }
 0xb83   :  { %v2760_v51 = vpop.f32.mrf.mxu1 }
 0xb84   :  { %v2102_v53 = vmax.f32 %v2101_v38, %v4232_v21 }
 0xb85   :  { %v2086_v34 = vpop.f32.mrf.mxu1 }
 0xb86   :  { %v4235_v52 = vadd.f32 %v2086_v34, %v78_v37 }
 0xb87   :  { %v2761_v4 = vpop.f32.mrf.mxu1 }
 0xb88   :  { %v2103_v55 = vmax.f32 %v2102_v53, %v4235_v52 }
 0xb89   :  { %v2091_v62 = vpop.f32.mrf.mxu1 }
 0xb8a   :  { %v4239_v41 = vadd.f32 %v2091_v62, %v78_v37 }
 0xb8b   :  { %v2764_v45 = vpop.f32.mrf.mxu1 }
 0xb8c   :  { %v2104_v25 = vmax.f32 %v2103_v55, %v4239_v41 }
 0xb8d   :  { %v2094_v44 = vpop.f32.mrf.mxu1 }
 0xb8e   :  { %v2105_v23 = vsub.f32 %v4217_v48, %v2104_v25  ;;  %v2108_v50 = vsub.f32 %v4215_v46, %v2104_v25  ;;  %v2111_v54 = vsub.f32 %v4219_v59, %v2104_v25  ;;  %v2114_v56 = vsub.f32 %v4223_v3, %v2104_v25 }
 0xb8f   :  { %v2117_v10 = vsub.f32 %v4226_v6, %v2104_v25  ;;  %v2765_v61 = vpop.f32.mrf.mxu1  ;;  %v2120_v7 = vsub.f32 %v4229_v42, %v2104_v25  ;;  %v2123_v13 = vsub.f32 %v4232_v21, %v2104_v25  ;;  %v2126_v16 = vsub.f32 %v4235_v52, %v2104_v25 }
 0xb90   :  { %v2106_v63 = vmul.f32 1.442695, %v2105_v23  ;;  %v2109_v1 = vmul.f32 1.442695, %v2108_v50  ;;  %v2112_v0 = vmul.f32 1.442695, %v2111_v54  ;;  %v2129_v17 = vsub.f32 %v4239_v41, %v2104_v25 }
 0xb91   :  { %v2115_v5 = vmul.f32 1.442695, %v2114_v56  ;;  %v2118_v8 = vmul.f32 1.442695, %v2117_v10  ;;  %v2121_v15 = vmul.f32 1.442695, %v2120_v7 }
 0xb92   :  { %2955 = vpow2.f32 %v2106_v63  ;;  %v2124_v9 = vmul.f32 1.442695, %v2123_v13  ;;  %v2127_v39 = vmul.f32 1.442695, %v2126_v16  ;;  %v2130_v60 = vmul.f32 1.442695, %v2129_v17 }
 0xb93   :  { %2957 = vpow2.f32 %v2109_v1 }
 0xb94   :  { %2959 = vpow2.f32 %v2112_v0 }
 0xb95   :  { %2961 = vpow2.f32 %v2115_v5 }
 0xb96   :  { %2963 = vpow2.f32 %v2118_v8 }
 0xb97   :  { %2965 = vpow2.f32 %v2121_v15 }
 0xb98   :  { %2967 = vpow2.f32 %v2124_v9 }
 0xb99   :  { %2969 = vpow2.f32 %v2127_v39 }
 0xb9a   :  { %2971 = vpow2.f32 %v2130_v60 }
 0xb9f   :  { %v2956_v14 = vpop.eup %2955 }
 0xba0   :  { %v2958_v19 = vpop.eup %2957  ;;  %2134 = vperm.xlu1 %2777, %v2956_v14  }
 0xba1   :  { %v2194_v12 = vadd.f32 %v2958_v19, %v2956_v14  ;;  %2140 = vperm.xlu0 %2778, %v2958_v19   ;;  %v2960_v20 = vpop.eup %2959 }
 0xba2   :  { %v2962_v29 = vpop.eup %2961 }
 0xba3   :  { %v2195_v30 = vadd.f32 %v2960_v20, %v2194_v12  ;;  %v2964_v28 = vpop.eup %2963 }
 0xba4   :  { %2146 = vperm.xlu1 %2777, %v2960_v20   ;;  %v2966_v31 = vpop.eup %2965 }
 0xba5   :  { %v2196_v49 = vadd.f32 %v2962_v29, %v2195_v30  ;;  %2158 = vperm.xlu0 %2778, %v2964_v28   ;;  %v2968_v2 = vpop.eup %2967 }
 0xba6   :  { %v2970_v24 = vpop.eup %2969 }
 0xba7   :  { %v2197_v32 = vadd.f32 %v2964_v28, %v2196_v49  ;;  %v2972_v11 = vpop.eup %2971 }
 0xba8   :  { %2152 = vperm.xlu1 %2777, %v2962_v29  }
 0xba9   :  { %v2198_v35 = vadd.f32 %v2966_v31, %v2197_v32  ;;  %2170 = vperm.xlu0 %2778, %v2968_v2  }
 0xbab   :  { %v2199_v40 = vadd.f32 %v2968_v2, %v2198_v35 }
 0xbac   :  { %2164 = vperm.xlu1 %2777, %v2966_v31  }
 0xbad   :  { %v2200_v26 = vadd.f32 %v2970_v24, %v2199_v40  ;;  %2182 = vperm.xlu0 %2778, %v2972_v11  }
 0xbaf   :  { %v2201_v37 = vadd.f32 %v2972_v11, %v2200_v26 }
 0xbb0   :  { %2176 = vperm.xlu1 %2777, %v2970_v24  }
 0xbb1   :  { %2973 = vrcp.f32 %v2201_v37 }
 0xbbe   :  { %v2974_v18 = vpop.eup %2973 }
 0xbbf   :  { %2205 = vperm.xlu1 %2777, %v2974_v18  }
 0xc1b   :  { %v2135_v33 = vpop.permute.xlu1 %2134 }
 0xc1c   :  { %v2141_v22 = vpop.permute.xlu0 %2140  ;;  %v2137_v27 = vmul.f32 %v2135_v33, %v4217_v48 }
 0xc1d   :  { %v2143_v47 = vmul.f32 %v2141_v22, %v4215_v46 }
 0xc1f   :  { %v2147_v57 = vpop.permute.xlu1 %2146  ;;  %v2186_v58 = vadd.f32 %v2143_v47, %v2137_v27 }
 0xc20   :  { %v2149_v36 = vmul.f32 %v2147_v57, %v4219_v59  ;;  %v2159_v43 = vpop.permute.xlu0 %2158 }
 0xc21   :  { %v2161_v53 = vmul.f32 %v2159_v43, %v4226_v6 }
 0xc22   :  { %v2187_v34 = vadd.f32 %v2186_v58, %v2149_v36 }
 0xc23   :  { %v2153_v51 = vpop.permute.xlu1 %2152 }
 0xc24   :  { %v2155_v38 = vmul.f32 %v2153_v51, %v4223_v3  ;;  %v2171_v25 = vpop.permute.xlu0 %2170 }
 0xc25   :  { %v2173_v48 = vmul.f32 %v2171_v25, %v4232_v21 }
 0xc26   :  { %v2188_v4 = vadd.f32 %v2187_v34, %v2155_v38 }
 0xc27   :  { %v2165_v62 = vpop.permute.xlu1 %2164 }
 0xc28   :  { %v2189_v55 = vadd.f32 %v2188_v4, %v2161_v53  ;;  %v2167_v45 = vmul.f32 %v2165_v62, %v4229_v42  ;;  %v2183_v50 = vpop.permute.xlu0 %2182 }
 0xc29   :  { %v2185_v56 = vmul.f32 %v2183_v50, %v4239_v41 }
 0xc2a   :  { %v2190_v46 = vadd.f32 %v2189_v55, %v2167_v45 }
 0xc2b   :  { %v2177_v44 = vpop.permute.xlu1 %2176 }
 0xc2c   :  { %v2191_v23 = vadd.f32 %v2190_v46, %v2173_v48  ;;  %v2179_v59 = vmul.f32 %v2177_v44, %v4235_v52 }
 0xc2e   :  { %v2192_v54 = vadd.f32 %v2191_v23, %v2179_v59 }
 0xc30   :  { %v2193_v3 = vadd.f32 %v2192_v54, %v2185_v56 }
 0xc3a   :  { %v2206_v10 = vpop.permute.xlu1 %2205 }
 0xc3b   :  { %v2208_v61 = vmul.f32 %v2206_v10, %v2193_v3 }
 0xc3d   :  { %2209 = vst [vmem:[%s4269_s6] sm:$0xff] %v2208_v61 }

</bundles_post_ra>
